<compile_context>
chip_gen: v5e
topology: v5e:2x2
jax: 0.10.0
libtpu: 0.0.40
codegen_flags: <defaults>
</compile_context>

<pallas_src>
import functools

import jax
import jax.numpy as jnp
from jax import lax
from jax.experimental import pallas as pl
from jax.experimental.pallas import tpu as pltpu


# ----------------------------------------------------------------------------
# Kernel 1: RMSNorm + uv projection + SiLU + q/k affine   (grid = (B, S // ts))
# ----------------------------------------------------------------------------
def _flash_proj_kernel(x_ref, g_ref, wuv_ref, buv_ref, gamma_ref, beta_ref,
                       u_ref, v_ref, q_ref, k_ref, *, eps, e_dim):
    x = x_ref[0]                                              # (ts, H) f32
    # cramming RMSNorm: x * g / clamp(||x||_2, eps)
    nrm = jnp.sqrt(jnp.sum(x * x, axis=-1, keepdims=True))    # (ts, 1)
    xn = x * g_ref[...] / jnp.maximum(nrm, eps)
    # uv projection + SiLU (applied to the whole projection, as in FLASH)
    uvb = jnp.dot(xn, wuv_ref[...], preferred_element_type=jnp.float32) + buv_ref[...]
    uvb = uvb * (1.0 / (1.0 + jnp.exp(-uvb)))                 # SiLU (EUP exp)
    gamma = gamma_ref[...]                                    # (2, s)
    beta = beta_ref[...]                                      # (2, s)
    z = uvb[:, 2 * e_dim:]                                    # (ts, s)
    u_ref[0] = uvb[:, :e_dim].astype(u_ref.dtype)
    v_ref[0] = uvb[:, e_dim:2 * e_dim].astype(v_ref.dtype)
    q_ref[0] = (z * gamma[0:1, :] + beta[0:1, :]).astype(q_ref.dtype)
    k_ref[0] = (z * gamma[1:2, :] + beta[1:2, :]).astype(k_ref.dtype)


# ----------------------------------------------------------------------------
# Kernel 2: online-softmax attention + gate + out projection + residual
#           (grid = (B, S // tq, S // tk), kv axis last / "arbitrary")
# ----------------------------------------------------------------------------
def _flash_attn_kernel(q_ref, k_ref, v_ref, u_ref, x_ref, wo_ref, bo_ref,
                       o_ref, m_sc, l_sc, acc_sc):
    kv = pl.program_id(2)

    @pl.when(kv == 0)
    def _():
        m_sc[...] = jnp.full_like(m_sc, -jnp.inf)
        l_sc[...] = jnp.zeros_like(l_sc)
        acc_sc[...] = jnp.zeros_like(acc_sc)

    q = q_ref[0]                                              # (tq, s)
    k = k_ref[0]                                              # (tk, s)
    # q @ k^T without an explicit transpose (contract last dims on the MXU).
    s = lax.dot_general(q, k, (((1,), (1,)), ((), ())),
                        preferred_element_type=jnp.float32)   # (tq, tk)

    m_prev = m_sc[...]                                        # (tq, 1)
    m_new = jnp.maximum(m_prev, jnp.max(s, axis=-1, keepdims=True))
    alpha = jnp.exp(m_prev - m_new)
    p = jnp.exp(s - m_new)
    l_sc[...] = alpha * l_sc[...] + jnp.sum(p, axis=-1, keepdims=True)
    acc_sc[...] = alpha * acc_sc[...] + jnp.dot(
        p, v_ref[0], preferred_element_type=jnp.float32)      # (tq, e)
    m_sc[...] = m_new

    @pl.when(kv == pl.num_programs(2) - 1)
    def _():
        attn = acc_sc[...] / l_sc[...]                        # (tq, e)
        gated = u_ref[0] * attn
        y = jnp.dot(gated, wo_ref[...],
                    preferred_element_type=jnp.float32) + bo_ref[...]
        o_ref[0] = (x_ref[0] + y).astype(o_ref.dtype)         # residual (pre-norm)


# ----------------------------------------------------------------------------
# Wrapper
# ----------------------------------------------------------------------------
def flash_layer(states, params, *, eps=1e-8, block_seq=128, block_q=128, block_kv=128):
    """Pre-norm FLASH layer: states + FLASH(RMSNorm(states)).  states: (B, S, H) f32."""
    g, wuv, buv, gamma, beta, wo, bo = (
        params[k] for k in ("g", "wuv", "buv", "gamma", "beta", "wo", "bo"))
    B, S, H = states.shape
    P = wuv.shape[1]
    s_dim = gamma.shape[1]
    e_dim = (P - s_dim) // 2

    ts = min(block_seq, S)
    tq = min(block_q, S)
    tk = min(block_kv, S)
    assert S % ts == 0 and S % tq == 0 and S % tk == 0

    # ---- projection pass -----------------------------------------------------
    proj = pl.pallas_call(
        functools.partial(_flash_proj_kernel, eps=eps, e_dim=e_dim),
        grid_spec=pltpu.PrefetchScalarGridSpec(
            num_scalar_prefetch=0,
            grid=(B, S // ts),
            in_specs=[
                pl.BlockSpec((1, ts, H), lambda b, i: (b, i, 0)),
                pl.BlockSpec((1, H), lambda b, i: (0, 0)),        # resident
                pl.BlockSpec((H, P), lambda b, i: (0, 0)),        # resident
                pl.BlockSpec((1, P), lambda b, i: (0, 0)),        # resident
                pl.BlockSpec((2, s_dim), lambda b, i: (0, 0)),    # resident
                pl.BlockSpec((2, s_dim), lambda b, i: (0, 0)),    # resident
            ],
            out_specs=(
                pl.BlockSpec((1, ts, e_dim), lambda b, i: (b, i, 0)),
                pl.BlockSpec((1, ts, e_dim), lambda b, i: (b, i, 0)),
                pl.BlockSpec((1, ts, s_dim), lambda b, i: (b, i, 0)),
                pl.BlockSpec((1, ts, s_dim), lambda b, i: (b, i, 0)),
            ),
        ),
        out_shape=(
            jax.ShapeDtypeStruct((B, S, e_dim), states.dtype),
            jax.ShapeDtypeStruct((B, S, e_dim), states.dtype),
            jax.ShapeDtypeStruct((B, S, s_dim), states.dtype),
            jax.ShapeDtypeStruct((B, S, s_dim), states.dtype),
        ),
        compiler_params=pltpu.CompilerParams(
            dimension_semantics=("parallel", "parallel"),
            vmem_limit_bytes=32 * 1024 * 1024),
        cost_estimate=pl.CostEstimate(
            flops=2 * B * S * H * P,
            transcendentals=B * S * P,
            bytes_accessed=4 * (B * S * (H + 2 * P) + H * P)),
    )
    u, v, q, k = proj(states, g.reshape(1, H), wuv, buv.reshape(1, P), gamma, beta)

    # ---- attention + gate + output projection + residual ----------------------
    attn = pl.pallas_call(
        _flash_attn_kernel,
        grid_spec=pltpu.PrefetchScalarGridSpec(
            num_scalar_prefetch=0,
            grid=(B, S // tq, S // tk),
            in_specs=[
                pl.BlockSpec((1, tq, s_dim), lambda b, i, j: (b, i, 0)),
                pl.BlockSpec((1, tk, s_dim), lambda b, i, j: (b, j, 0)),
                pl.BlockSpec((1, tk, e_dim), lambda b, i, j: (b, j, 0)),
                pl.BlockSpec((1, tq, e_dim), lambda b, i, j: (b, i, 0)),
                pl.BlockSpec((1, tq, H), lambda b, i, j: (b, i, 0)),
                pl.BlockSpec((e_dim, H), lambda b, i, j: (0, 0)),   # resident
                pl.BlockSpec((1, H), lambda b, i, j: (0, 0)),       # resident
            ],
            out_specs=pl.BlockSpec((1, tq, H), lambda b, i, j: (b, i, 0)),
            scratch_shapes=[
                pltpu.VMEM((tq, 1), jnp.float32),       # running max
                pltpu.VMEM((tq, 1), jnp.float32),       # running denom
                pltpu.VMEM((tq, e_dim), jnp.float32),   # running numerator
            ],
        ),
        out_shape=jax.ShapeDtypeStruct((B, S, H), states.dtype),
        compiler_params=pltpu.CompilerParams(
            dimension_semantics=("parallel", "parallel", "arbitrary"),
            vmem_limit_bytes=32 * 1024 * 1024),
        cost_estimate=pl.CostEstimate(
            flops=2 * B * S * S * (s_dim + e_dim) + 2 * B * S * e_dim * H,
            transcendentals=B * S * S,
            bytes_accessed=4 * (B * S * (2 * s_dim + 2 * e_dim + 2 * H) + e_dim * H)),
    )
    return attn(q, k, v, u, states, wo, bo.reshape(1, H))


# ----------------------------------------------------------------------------
# Pure-JAX reference (same math, full f32 precision)
# ----------------------------------------------------------------------------
def _reference(x, params, eps):
    g, wuv, buv, gamma, beta, wo, bo = (
        params[k] for k in ("g", "wuv", "buv", "gamma", "beta", "wo", "bo"))
    e_dim = wo.shape[0]
    hi = jax.lax.Precision.HIGHEST
    nrm = jnp.sqrt(jnp.sum(x * x, axis=-1, keepdims=True))
    xn = x * g / jnp.maximum(nrm, eps)
    uvb = jnp.dot(xn, wuv, precision=hi) + buv
    uvb = uvb * (1.0 / (1.0 + jnp.exp(-uvb)))
    u = uvb[..., :e_dim]
    v = uvb[..., e_dim:2 * e_dim]
    z = uvb[..., 2 * e_dim:]
    q = z * gamma[0] + beta[0]
    k = z * gamma[1] + beta[1]
    scores = jnp.einsum("bnd,bmd->bnm", q, k, precision=hi)
    probs = jax.nn.softmax(scores, axis=-1)
    attn = jnp.einsum("bnm,bme->bne", probs, v, precision=hi)
    return x + jnp.dot(u * attn, wo, precision=hi) + bo


if __name__ == "__main__":
    key = jax.random.PRNGKey(0)
    k0, k1, k2, k3, k4, k5 = jax.random.split(key, 6)

    # Small but lane-dense shapes (multiples of 128 per the perf review).
    B, S, H = 2, 256, 128
    E, SQK = 2 * H, 128          # expansion dim, shared q/k dim
    P = 2 * E + SQK              # uv projection width

    x = jax.random.normal(k0, (B, S, H), dtype=jnp.float32)
    params = dict(
        g=jnp.ones((H,), jnp.float32),                                    # RMSNorm init
        wuv=jax.random.normal(k1, (H, P), dtype=jnp.float32),
        buv=jax.random.normal(k2, (P,), dtype=jnp.float32) * 0.1,
        gamma=jax.random.normal(k3, (2, SQK), dtype=jnp.float32),
        beta=jnp.zeros((2, SQK), jnp.float32),
        wo=jax.random.normal(k4, (E, H), dtype=jnp.float32) * 0.1,
        bo=jax.random.normal(k5, (H,), dtype=jnp.float32) * 0.1,
    )

    out = flash_layer(x, params, eps=1e-8)
    out = jax.block_until_ready(out)

    ref = _reference(x, params, eps=1e-8)
    assert out.shape == (B, S, H)
    max_err = float(jnp.max(jnp.abs(out - ref)))
    assert jnp.allclose(out, ref, atol=1e-3, rtol=1e-3), f"mismatch vs reference: {max_err}"

    print("KERNEL_OK")
</pallas_src>

<mosaic_0001>
module attributes {stable_mosaic.version = 11 : i64} {
  func.func @_flash_proj_kernel(%arg0: i32, %arg1: i32, %arg2: memref<1x128x128xf32, #tpu.memory_space<vmem>>, %arg3: memref<1x128xf32, #tpu.memory_space<vmem>>, %arg4: memref<128x640xf32, #tpu.memory_space<vmem>>, %arg5: memref<1x640xf32, #tpu.memory_space<vmem>>, %arg6: memref<2x128xf32, #tpu.memory_space<vmem>>, %arg7: memref<2x128xf32, #tpu.memory_space<vmem>>, %arg8: memref<1x128x256xf32, #tpu.memory_space<vmem>>, %arg9: memref<1x128x256xf32, #tpu.memory_space<vmem>>, %arg10: memref<1x128x128xf32, #tpu.memory_space<vmem>>, %arg11: memref<1x128x128xf32, #tpu.memory_space<vmem>>) attributes {dimension_semantics = [#tpu.dimension_semantics<parallel>, #tpu.dimension_semantics<parallel>], iteration_bounds = array<i64: 2, 2>, scalar_prefetch = 0 : i64, scratch_operands = 0 : i64, tpu.core_type = #tpu.core_type<tc>, window_params = [{transform_indices = @transform_0, window_bounds = array<i64: 1, 128, 128>}, {pipeline_mode = #tpu.pipeline_mode<synchronous>, transform_indices = @transform_1, window_bounds = array<i64: 1, 128>}, {pipeline_mode = #tpu.pipeline_mode<synchronous>, transform_indices = @transform_2, window_bounds = array<i64: 128, 640>}, {pipeline_mode = #tpu.pipeline_mode<synchronous>, transform_indices = @transform_3, window_bounds = array<i64: 1, 640>}, {pipeline_mode = #tpu.pipeline_mode<synchronous>, transform_indices = @transform_4, window_bounds = array<i64: 2, 128>}, {pipeline_mode = #tpu.pipeline_mode<synchronous>, transform_indices = @transform_5, window_bounds = array<i64: 2, 128>}, {transform_indices = @transform_6, window_bounds = array<i64: 1, 128, 256>}, {transform_indices = @transform_7, window_bounds = array<i64: 1, 128, 256>}, {transform_indices = @transform_8, window_bounds = array<i64: 1, 128, 128>}, {transform_indices = @transform_9, window_bounds = array<i64: 1, 128, 128>}]} {
    %c0 = arith.constant 0 : index
    %c0_0 = arith.constant 0 : index
    %c0_1 = arith.constant 0 : index
    %0 = vector.load %arg2[%c0, %c0_0, %c0_1] : memref<1x128x128xf32, #tpu.memory_space<vmem>>, vector<1x128x128xf32>
    %1 = vector.shape_cast %0 : vector<1x128x128xf32> to vector<128x128xf32>
    %2 = arith.mulf %1, %1 : vector<128x128xf32>
    %cst = arith.constant dense<0.000000e+00> : vector<128xf32>
    %3 = vector.multi_reduction <add>, %2, %cst [1] : vector<128x128xf32> to vector<128xf32>
    %4 = vector.shape_cast %3 : vector<128xf32> to vector<128x1xf32>
    %5 = math.sqrt %4 : vector<128x1xf32>
    %c0_2 = arith.constant 0 : index
    %c0_3 = arith.constant 0 : index
    %6 = vector.load %arg3[%c0_2, %c0_3] : memref<1x128xf32, #tpu.memory_space<vmem>>, vector<1x128xf32>
    %7 = vector.broadcast %6 : vector<1x128xf32> to vector<128x128xf32>
    %8 = arith.mulf %1, %7 : vector<128x128xf32>
    %cst_4 = arith.constant 9.99999993E-9 : f32
    %9 = vector.broadcast %cst_4 : f32 to vector<128x1xf32>
    %10 = arith.maximumf %5, %9 : vector<128x1xf32>
    %11 = vector.broadcast %10 : vector<128x1xf32> to vector<128x128xf32>
    %12 = arith.divf %8, %11 : vector<128x128xf32>
    %c0_5 = arith.constant 0 : index
    %c0_6 = arith.constant 0 : index
    %13 = vector.load %arg4[%c0_5, %c0_6] : memref<128x640xf32, #tpu.memory_space<vmem>>, vector<128x640xf32>
    %cst_7 = arith.constant dense<0.000000e+00> : vector<128x640xf32>
    %14 = tpu.matmul %12, %13, %cst_7 {dimension_numbers = #tpu.dot_dimension_numbers<[1], [0], [0], [1], [0, 0, 1, 1], [], []>} : vector<128x128xf32>, vector<128x640xf32>, vector<128x640xf32> -> vector<128x640xf32>
    %c0_8 = arith.constant 0 : index
    %c0_9 = arith.constant 0 : index
    %15 = vector.load %arg5[%c0_8, %c0_9] : memref<1x640xf32, #tpu.memory_space<vmem>>, vector<1x640xf32>
    %16 = vector.broadcast %15 : vector<1x640xf32> to vector<128x640xf32>
    %17 = arith.addf %14, %16 : vector<128x640xf32>
    %cst_10 = arith.constant 0.000000e+00 : f32
    %18 = vector.broadcast %cst_10 : f32 to vector<128x640xf32>
    %19 = arith.subf %18, %17 : vector<128x640xf32>
    %20 = math.exp %19 : vector<128x640xf32>
    %cst_11 = arith.constant 1.000000e+00 : f32
    %21 = vector.broadcast %cst_11 : f32 to vector<128x640xf32>
    %22 = arith.addf %21, %20 : vector<128x640xf32>
    %cst_12 = arith.constant 1.000000e+00 : f32
    %23 = vector.broadcast %cst_12 : f32 to vector<128x640xf32>
    %24 = arith.divf %23, %22 : vector<128x640xf32>
    %25 = arith.mulf %17, %24 : vector<128x640xf32>
    %c0_13 = arith.constant 0 : index
    %c0_14 = arith.constant 0 : index
    %26 = vector.load %arg6[%c0_13, %c0_14] : memref<2x128xf32, #tpu.memory_space<vmem>>, vector<2x128xf32>
    %c0_15 = arith.constant 0 : index
    %c0_16 = arith.constant 0 : index
    %27 = vector.load %arg7[%c0_15, %c0_16] : memref<2x128xf32, #tpu.memory_space<vmem>>, vector<2x128xf32>
    %28 = vector.extract_strided_slice %25 {offsets = [0, 512], sizes = [128, 128], strides = [1, 1]} : vector<128x640xf32> to vector<128x128xf32>
    %29 = vector.extract_strided_slice %25 {offsets = [0, 0], sizes = [128, 256], strides = [1, 1]} : vector<128x640xf32> to vector<128x256xf32>
    %c0_17 = arith.constant 0 : index
    %c0_18 = arith.constant 0 : index
    %c0_19 = arith.constant 0 : index
    %30 = vector.load %arg8[%c0_17, %c0_18, %c0_19] : memref<1x128x256xf32, #tpu.memory_space<vmem>>, vector<1x128x256xf32>
    %31 = vector.shape_cast %30 : vector<1x128x256xf32> to vector<128x256xf32>
    %32 = vector.shape_cast %29 : vector<128x256xf32> to vector<1x128x256xf32>
    tpu.vector_store %arg8[%c0_17, %c0_18, %c0_19], %32 {strides = array<i32>} : memref<1x128x256xf32, #tpu.memory_space<vmem>>, vector<1x128x256xf32>,
    %33 = vector.extract_strided_slice %25 {offsets = [0, 256], sizes = [128, 256], strides = [1, 1]} : vector<128x640xf32> to vector<128x256xf32>
    %c0_20 = arith.constant 0 : index
    %c0_21 = arith.constant 0 : index
    %c0_22 = arith.constant 0 : index
    %34 = vector.load %arg9[%c0_20, %c0_21, %c0_22] : memref<1x128x256xf32, #tpu.memory_space<vmem>>, vector<1x128x256xf32>
    %35 = vector.shape_cast %34 : vector<1x128x256xf32> to vector<128x256xf32>
    %36 = vector.shape_cast %33 : vector<128x256xf32> to vector<1x128x256xf32>
    tpu.vector_store %arg9[%c0_20, %c0_21, %c0_22], %36 {strides = array<i32>} : memref<1x128x256xf32, #tpu.memory_space<vmem>>, vector<1x128x256xf32>,
    %37 = vector.extract_strided_slice %26 {offsets = [0, 0], sizes = [1, 128], strides = [1, 1]} : vector<2x128xf32> to vector<1x128xf32>
    %38 = vector.broadcast %37 : vector<1x128xf32> to vector<128x128xf32>
    %39 = arith.mulf %28, %38 : vector<128x128xf32>
    %40 = vector.extract_strided_slice %27 {offsets = [0, 0], sizes = [1, 128], strides = [1, 1]} : vector<2x128xf32> to vector<1x128xf32>
    %41 = vector.broadcast %40 : vector<1x128xf32> to vector<128x128xf32>
    %42 = arith.addf %39, %41 : vector<128x128xf32>
    %c0_23 = arith.constant 0 : index
    %c0_24 = arith.constant 0 : index
    %c0_25 = arith.constant 0 : index
    %43 = vector.load %arg10[%c0_23, %c0_24, %c0_25] : memref<1x128x128xf32, #tpu.memory_space<vmem>>, vector<1x128x128xf32>
    %44 = vector.shape_cast %43 : vector<1x128x128xf32> to vector<128x128xf32>
    %45 = vector.shape_cast %42 : vector<128x128xf32> to vector<1x128x128xf32>
    tpu.vector_store %arg10[%c0_23, %c0_24, %c0_25], %45 {strides = array<i32>} : memref<1x128x128xf32, #tpu.memory_space<vmem>>, vector<1x128x128xf32>,
    %46 = vector.extract_strided_slice %26 {offsets = [1, 0], sizes = [1, 128], strides = [1, 1]} : vector<2x128xf32> to vector<1x128xf32>
    %47 = vector.broadcast %46 : vector<1x128xf32> to vector<128x128xf32>
    %48 = arith.mulf %28, %47 : vector<128x128xf32>
    %49 = vector.extract_strided_slice %27 {offsets = [1, 0], sizes = [1, 128], strides = [1, 1]} : vector<2x128xf32> to vector<1x128xf32>
    %50 = vector.broadcast %49 : vector<1x128xf32> to vector<128x128xf32>
    %51 = arith.addf %48, %50 : vector<128x128xf32>
    %c0_26 = arith.constant 0 : index
    %c0_27 = arith.constant 0 : index
    %c0_28 = arith.constant 0 : index
    %52 = vector.load %arg11[%c0_26, %c0_27, %c0_28] : memref<1x128x128xf32, #tpu.memory_space<vmem>>, vector<1x128x128xf32>
    %53 = vector.shape_cast %52 : vector<1x128x128xf32> to vector<128x128xf32>
    %54 = vector.shape_cast %51 : vector<128x128xf32> to vector<1x128x128xf32>
    tpu.vector_store %arg11[%c0_26, %c0_27, %c0_28], %54 {strides = array<i32>} : memref<1x128x128xf32, #tpu.memory_space<vmem>>, vector<1x128x128xf32>,
    return
  }
  func.func @transform_0(%arg0: i32, %arg1: i32) -> (i32, i32, i32) {
    %c0_i32 = arith.constant 0 : i32
    %c0_i32_0 = arith.constant 0 : i32
    return %arg0, %arg1, %c0_i32 : i32, i32, i32
  }
  func.func @transform_1(%arg0: i32, %arg1: i32) -> (i32, i32) {
    %c0_i32 = arith.constant 0 : i32
    %c0_i32_0 = arith.constant 0 : i32
    %c0_i32_1 = arith.constant 0 : i32
    return %c0_i32, %c0_i32_0 : i32, i32
  }
  func.func @transform_2(%arg0: i32, %arg1: i32) -> (i32, i32) {
    %c0_i32 = arith.constant 0 : i32
    %c0_i32_0 = arith.constant 0 : i32
    %c0_i32_1 = arith.constant 0 : i32
    return %c0_i32, %c0_i32_0 : i32, i32
  }
  func.func @transform_3(%arg0: i32, %arg1: i32) -> (i32, i32) {
    %c0_i32 = arith.constant 0 : i32
    %c0_i32_0 = arith.constant 0 : i32
    %c0_i32_1 = arith.constant 0 : i32
    return %c0_i32, %c0_i32_0 : i32, i32
  }
  func.func @transform_4(%arg0: i32, %arg1: i32) -> (i32, i32) {
    %c0_i32 = arith.constant 0 : i32
    %c0_i32_0 = arith.constant 0 : i32
    %c0_i32_1 = arith.constant 0 : i32
    return %c0_i32, %c0_i32_0 : i32, i32
  }
  func.func @transform_5(%arg0: i32, %arg1: i32) -> (i32, i32) {
    %c0_i32 = arith.constant 0 : i32
    %c0_i32_0 = arith.constant 0 : i32
    %c0_i32_1 = arith.constant 0 : i32
    return %c0_i32, %c0_i32_0 : i32, i32
  }
  func.func @transform_6(%arg0: i32, %arg1: i32) -> (i32, i32, i32) {
    %c0_i32 = arith.constant 0 : i32
    %c0_i32_0 = arith.constant 0 : i32
    return %arg0, %arg1, %c0_i32 : i32, i32, i32
  }
  func.func @transform_7(%arg0: i32, %arg1: i32) -> (i32, i32, i32) {
    %c0_i32 = arith.constant 0 : i32
    %c0_i32_0 = arith.constant 0 : i32
    return %arg0, %arg1, %c0_i32 : i32, i32, i32
  }
  func.func @transform_8(%arg0: i32, %arg1: i32) -> (i32, i32, i32) {
    %c0_i32 = arith.constant 0 : i32
    %c0_i32_0 = arith.constant 0 : i32
    return %arg0, %arg1, %c0_i32 : i32, i32, i32
  }
  func.func @transform_9(%arg0: i32, %arg1: i32) -> (i32, i32, i32) {
    %c0_i32 = arith.constant 0 : i32
    %c0_i32_0 = arith.constant 0 : i32
    return %arg0, %arg1, %c0_i32 : i32, i32, i32
  }
}

</mosaic_0001>

<bundles_post_ra>
// kernel: tpu_custom_call.1
= control target key start
LH: loop header
LB: loop body
LE: loop exit
PB: predicated region body
PF: predicated region fallthrough
CT: control target
= control target key end

     0   :  { %s7380_s0 = inlined_call_operand.hbm [shape: f32[2,256,128], index: 0, kind: input, shape index: {}]   ;;  %s7381_s1 = inlined_call_operand.hbm [shape: f32[1,128], index: 1, kind: input, shape index: {}]   ;;  %s7382_s2 = inlined_call_operand.hbm [shape: f32[128,640], index: 2, kind: input, shape index: {}]   ;;  %s7383_s3 = inlined_call_operand.hbm [shape: f32[1,640], index: 3, kind: input, shape index: {}]   ;;  %s7384_s4 = inlined_call_operand.vmem [shape: f32[2,128], index: 4, kind: input, shape index: {}]   ;;  %s7385_s5 = inlined_call_operand.vmem [shape: f32[2,128], index: 5, kind: input, shape index: {}]   ;;  %s7386_s6 = inlined_call_operand.hbm [shape: f32[2,256,256], index: 6, kind: output, shape index: {0}]   ;;  %s7387_s7 = inlined_call_operand.hbm [shape: f32[2,256,256], index: 7, kind: output, shape index: {1}]   ;;  %s7388_s8 = inlined_call_operand.hbm [shape: f32[2,256,128], index: 8, kind: output, shape index: {2}]   ;;  %s7389_s9 = inlined_call_operand.hbm [shape: f32[2,256,128], index: 9, kind: output, shape index: {3}]  }
   0x1   :  { %7402 = sst [smem:[#allocation27_spill]] %s7380_s0 }
   0x2   :  { %7403 = sst [smem:[#allocation28_spill]] %s7381_s1 }
   0x3   :  { %7404 = sst [smem:[#allocation29_spill]] %s7382_s2 }
   0x4   :  { %7405 = sst [smem:[#allocation30_spill]] %s7383_s3 }
   0x5   :  { %7406 = sst [smem:[#allocation31_spill]] %s7384_s4 }
   0x6   :  { %7407 = sst [smem:[#allocation32_spill]] %s7386_s6 }
   0x7   :  { %7408 = sst [smem:[#allocation33_spill]] %s7387_s7 }
   0x8   :  { %7409 = sst [smem:[#allocation34_spill]] %s7388_s8 }
   0x9   :  { %7410 = sst [smem:[#allocation35_spill]] %s7389_s9 }
   0xa   :  { %15 = vsyncpa [#allocation3], 0 }
   0xb   :  { %17 = vsyncpa [#allocation3 + $0x1], 0 }
   0xc   :  { %18 = vsyncpa [#allocation6], 0 }
   0xd   :  { %19 = vsyncpa [#allocation9], 0 }
   0xe   :  { %20 = vsyncpa [#allocation4], 0 }
   0xf   :  { %22 = vsyncpa [#allocation4 + $0x1], 0 }
  0x10   :  { %23 = vsyncpa [#allocation12], 0 }
  0x11   :  { %25 = vsyncpa [#allocation12 + $0x1], 0 }
  0x12   :  { %26 = vsyncpa [#allocation15], 0 }
  0x13   :  { %28 = vsyncpa [#allocation15 + $0x1], 0  ;;  %s4479_s30 = smov 0   ;;  %s4481_s10 = smov 0  }
  0x14   :  { %s4483_s11 = smov 0   ;;  %s4485_s12 = smov 0  }
  0x15   :  { %s4487_s13 = smov 0   ;;  %s4489_s14 = smov 0  }
  0x16   :  { %s4491_s15 = smov 0   ;;  %s4493_s16 = smov 0  }
  0x17 LB: > { %7411 = sst [smem:[#allocation22_spill]] %s4388_s30  ;;  %s4520_s17 = sadd.s32 4294967295, %s4416_s16   ;;  %s4416_s16 = sphi %s4493_s16, %s34_s16   ;;  %s4412_s15 = sphi %s4491_s15, %s7606_s15   ;;  %s4408_s14 = sphi %s4489_s14, %s7601_s14   ;;  %s4404_s13 = sphi %s4487_s13, %s7605_s13   ;;  %s4400_s12 = sphi %s4485_s12, %s7600_s12   ;;  %s4396_s11 = sphi %s4483_s11, %s7604_s11   ;;  %s4392_s10 = sphi %s4481_s10, %s7603_s10   ;;  %s4388_s30 = sphi %s4479_s30, %s7602_s30  }
  0x18   : > { %7412 = sst [smem:[#allocation23_spill]] %s4408_s14  ;;  %s7390_s18 = sadd.s32 4294967294, %s4416_s16  }
  0x19   : > { %p68_p0 = scmp.ne.s32.totalorder %s4392_s10, %s4388_s30  ;;  %p69_p1 = scmp.eq.s32.totalorder %s4520_s17, 0 }
  0x1a   : > { %p199_p2 = scmp.eq.s32.totalorder %s4520_s17, 3  ;;  %p205_p3 = scmp.eq.s32.totalorder %s7390_s18, 3 }
  0x1b   : > { %p4531_p4 = por %p69_p1, %p68_p0  ;;  %p3489_p5 = scmp.ge.s32.totalorder %s4416_s16, 1 }
  0x1c   : > { %p4536_p6 = por %p205_p3, %p68_p0  ;;  %p296_p7 = scmp.lt.s32.totalorder %s4416_s16, 5 }
  0x1d   : > { %s7416_s1 = sld [smem:[#allocation28_spill]]  ;;  %s4418_s25 = smov [#allocation5]  }
  0x1e   : > { %s7414_s20 = scalar_select %p4536_p6, 1, 0 }
  0x1f   : > { %p4544_p8 = pnand %p3489_p5, %p296_p7  ;;  %s310_s26 = sshll.u32 %s4418_s25, 4  ;;  %s311_s26 = int_to_ptr.vmem [resolvable:$true] %s310_s26 }
  0x20   : > { %7415 = sst [smem:[#allocation24_spill]] %s7414_s20  ;;  %s4419_s22 = smov [#allocation7]  }
  0x21   : > { %p3599_p9 = pneg %p4544_p8  ;;  %s7418_s2 = sld [smem:[#allocation29_spill]] }
  0x22   : > { %s321_s18 = sshll.u32 %s4419_s22, 4  ;;  %s4420_s25 = smov 640   ;;  %s322_s18 = int_to_ptr.vmem [resolvable:$true] %s321_s18 }
  0x23   : > { %s308_s23 = sshll.u32 %s7416_s1, 4  ;;  %p4555_p10 = pnand %p3599_p9, %p69_p1  ;;  %s309_s23 = int_to_ptr.hbm [resolvable:$true] %s308_s23 }
  0x24   : > { %s4421_s27 = smov 40   ;;  %s7420_s3 = sld [smem:[#allocation30_spill]] }
  0x25   : > { %3602 = dma.hbm_to_vmem [thread:$0]  (!%p4555_p10), %s309_s23, 16, %s311_s26, [#allocation6]  }
  0x26   : > { %s4422_s20 = smov [#allocation8]   ;;  %s43_s23 = sadd.s32 1, %s4408_s14 }
  0x27   : > { %s319_s29 = sshll.u32 %s7418_s2, 4  ;;  %s336_s22 = sshll.u32 %s4422_s20, 4  ;;  %s320_s29 = int_to_ptr.hbm [resolvable:$true] %s319_s29  ;;  %s337_s22 = int_to_ptr.vmem [resolvable:$true] %s336_s22 }
  0x28   : > { %3605 = dma.hbm_to_vmem [thread:$0]  (!%p4555_p10), %s320_s29, 10240, %s322_s18, [#allocation6], %s4420_s25, %s4420_s25, %s4421_s27  }
  0x29   : > { %p44_p11 = scmp.ge.s32.totalorder %s43_s23, 2  ;;  %s46_s26 = sadd.s32 1, %s4412_s15 }
  0x2a   : > { %s334_s2 = sshll.u32 %s7420_s3, 4  ;;  %s55_s30 = sadd.s32 1, %s4396_s11  ;;  %s335_s2 = int_to_ptr.hbm [resolvable:$true] %s334_s2 }
  0x2b   : > { %3608 = dma.hbm_to_vmem [thread:$0]  (!%p4555_p10), %s335_s2, 80, %s337_s22, [#allocation9]  }
  0x2c   : > { %p62_p12 = scmp.ne.s32.totalorder %s4396_s11, %s4392_s10  ;;  %s7608_s23 = smov (%p44_p11, %s43_s23), 0 }
  0x2d   : > { %7421 = sst [smem:[#allocation25_spill]] %s7608_s23  ;;  %s7610_s26 = smov (!%p44_p11, %s46_s26), %s4412_s15 }
  0x2e   : > { %s51_s1 = ssub.s32 %s4408_s14, %s7608_s23  ;;  %p63_p13 = scmp.eq.s32.totalorder %s4416_s16, 0 }
  0x2f   : > { %p48_p0 = scmp.ge.s32.totalorder %s7610_s26, 2  ;;  %p4581_p3 = por %p199_p2, %p62_p12 }
  0x30   : > { %p4585_p5 = por %p63_p13, %p62_p12  ;;  %p3629_p7 = scmp.lt.s32.totalorder %s4416_s16, 4 }
  0x31   : > { %s7422_s18 = scalar_select %p4581_p3, 1, 0 }
  0x32   : > { %s7612_s26 = smov (%p48_p0, %s7610_s26), 0  ;;  %s353_s20 = sand.u32 1, %s4396_s11  }
  0x33   : > { %7423 = sst [smem:[#allocation26_spill]] %s7422_s18  ;;  %s3495_s29 = sshll.u32 %s4408_s14, 4 }
  0x34   : > { %s50_s21 = ssub.s32 %s4412_s15, %s7612_s26  ;;  %s3494_s27 = sshll.u32 %s353_s20, 7 }
  0x35   : > { %s52_s25 = sor.u32 %s51_s1, %s50_s21  ;;  %s3496_s28 = sshll.u32 %s4412_s15, 5 }
  0x36   : > { %p53_p9 = scmp.eq.s32.totalorder %s52_s25, 0  ;;  %s357_s22 = scalar_lea.vmem [#allocation2], %s3494_s27 }
  0x37   : > { %s367_s3 = sshll.u32 %s357_s22, 4  ;;  %s362_s18 = sadd.s32 %s3496_s28, %s3495_s29  ;;  %s368_s3 = int_to_ptr.vmem [resolvable:$true] %s367_s3 }
  0x38   : > { %s4598_s23 = scalar_select %p53_p9, %s4396_s11, %s55_s30  }
  0x39   : > { %s3497_s9 = sshll.u32 %s362_s18, 3  ;;  %p3610_p2 = pnand %p3629_p7, %p4585_p5 }
  0x3a   : > { %s7425_s0 = sld [smem:[#allocation27_spill]]  ;;  %s354_s1 = scalar_lea.sflag [#allocation3], %s353_s20 }
  0x3b   : > { %s4423_s21 = smov 128   ;;  %s4424_s25 = smov 8  }
  0x3c   : > { %s4610_s30 = sand.u32 (!%p4544_p8), 1, %s4392_s10  }
  0x3d   : > { %s4613_s18 = sshll.u32 (!%p4544_p8), %s4610_s30, 7  ;;  %s382_s6 = scalar_lea.sflag (!%p4544_p8), [#allocation3], %s4610_s30 }
  0x3e   : > { %379 = sbr.rel (%p4544_p8) target bundleno = 856 (0x358), region = 44  ;;  %s4617_s8 = scalar_lea.vmem (!%p4544_p8), [#allocation2], %s4613_s18 }
  0x40   : > { %s364_s7 = scalar_lea.hbm %s7425_s0, %s3497_s9 }
  0x41   : > { %s365_s14 = sshll.u32 %s364_s7, 4  ;;  %s366_s14 = int_to_ptr.hbm [resolvable:$true] %s365_s14 }
  0x42   : > { %3612 = dma.hbm_to_vmem [thread:$0]  (!%p3610_p2), %s366_s14, 2048, %s368_s3, %s354_s1, %s4423_s21, %s4423_s21, %s4424_s25  }
  0x43   : > { %4363 = dma.done.wait (%p4531_p4), %s382_s6, 2048  }
  0x44   : > { %4365 = vsyncadd (%p4531_p4), %s382_s6, 4294965248 }
  0x45   : > { %4367 = dma.done.wait (%p69_p1), [#allocation6], 10256  }
  0x46   : > { %4369 = vsyncadd (%p69_p1), [#allocation6], 4294957040 }
  0x47   : > { %4371 = dma.done.wait (%p69_p1), [#allocation9], 80  }
  0x48   : > { %4373 = vsyncadd (%p69_p1), [#allocation9], 4294967216  ;;  %v4632_v0 = vld [vmem:[%s4617_s8 + $0x48] sm:$0xff]  ;;  %v4637_v2 = vld [vmem:[%s4617_s8 + $0x40] sm:$0xff]  ;;  %s3503_s3 = sshll.u32 %s4610_s30, 8  ;;  %s7475_s4 = sld [smem:[#allocation31_spill]] }
  0x49   : > { %v481_v1 = vmul.f32 %v4632_v0, %v4632_v0  ;;  %v4640_v3 = vld [vmem:[%s4617_s8] sm:$0xff]  ;;  %v480_v4 = vmul.f32 %v4637_v2, %v4637_v2  ;;  %v4647_v6 = vld [vmem:[%s4617_s8 + $0x68] sm:$0xff]  ;;  %v4662_v12 = vld [vmem:[%s4617_s8 + $0x50] sm:$0xff]  ;;  %s5484_s7 = scalar_lea.vmem [#allocation10], %s3503_s3  ;;  %s5924_s2 = scalar_lea.vmem [#allocation13], %s4613_s18 }
  0x4a   : > { %v472_v5 = vmul.f32 %v4640_v3, %v4640_v3  ;;  %v4650_v7 = vld [vmem:[%s4617_s8 + $0x60] sm:$0xff]  ;;  %v485_v9 = vmul.f32 %v4647_v6, %v4647_v6  ;;  %v4665_v13 = vld [vmem:[%s4617_s8 + $0x8] sm:$0xff]  ;;  %v482_v15 = vmul.f32 %v4662_v12, %v4662_v12  ;;  %v4677_v18 = vld [vmem:[%s4617_s8 + $0x30] sm:$0xff]  ;;  %s5933_s20 = scalar_lea.vmem [#allocation14], %s4613_s18  ;;  %s5947_s29 = scalar_lea.vmem [#allocation11], %s3503_s3 }
  0x4b   : > { %506 = vadd.xlane.f32.xlu2 %v481_v1  ;;  %504 = vadd.xlane.f32.xlu0 %v480_v4  ;;  %v4653_v8 = vld [vmem:[%s4617_s8 + $0x20] sm:$0xff]  ;;  %v484_v10 = vmul.f32 %v4650_v7, %v4650_v7  ;;  %v4668_v14 = vld [vmem:[%s4617_s8 + $0x28] sm:$0xff]  ;;  %v473_v16 = vmul.f32 %v4665_v13, %v4665_v13  ;;  %v4680_v19 = vld [vmem:[%s4617_s8 + $0x70] sm:$0xff]  ;;  %v478_v21 = vmul.f32 %v4677_v18, %v4677_v18  ;;  %s3527_s27 = sshll.u32 %s4400_s12, 5  ;;  %s3513_s28 = sshll.u32 %s4404_s13, 6 }
  0x4c   : > { %488 = vadd.xlane.f32.xlu1 %v472_v5  ;;  %v476_v11 = vmul.f32 %v4653_v8, %v4653_v8  ;;  %v477_v17 = vmul.f32 %v4668_v14, %v4668_v14  ;;  %v4683_v20 = vld [vmem:[%s4617_s8 + $0x10] sm:$0xff]  ;;  %v486_v22 = vmul.f32 %v4680_v19, %v4680_v19  ;;  %v4692_v24 = vld [vmem:[%s4617_s8 + $0x18] sm:$0xff]  ;;  %v1048_v35 = vld [vmem:[#allocation7 + $0x1e0] sm:$0xff]  ;;  %s7142_s22 = sadd.s32 %s3527_s27, %s3513_s28  ;;  %s3519_s21 = sshll.u32 %s4400_s12, 4 }
  0x4d   : > { %v474_v23 = vmul.f32 %v4683_v20, %v4683_v20  ;;  %v467_v25 = vld [vmem:[%s4617_s8 + $0x58] sm:$0xff]  ;;  %v475_v27 = vmul.f32 %v4692_v24, %v4692_v24  ;;  %v1053_v34 = vld [vmem:[#allocation7 + $0x208] sm:$0xff]  ;;  %v4708_v42 = vld [vmem:[#allocation5] ss:$0 sm:$0xff]  ;;  %s3514_s1 = sshll.u32 %s7142_s22, 3  ;;  %s3520_s25 = sshll.u32 %s4404_s13, 5 }
  0x4e   : > { %v471_v26 = vld [vmem:[%s4617_s8 + $0x78] sm:$0xff]  ;;  %v483_v28 = vmul.f32 %v467_v25, %v467_v25  ;;  %v1033_v41 = vld [vmem:[#allocation7 + $0x168] sm:$0xff]  ;;  %v1028_v43 = vld [vmem:[#allocation7 + $0x140] sm:$0xff]  ;;  %v4719_v50 = vmul.f32 %v4708_v42, %v4632_v0  ;;  %v4723_v51 = vmul.f32 %v4708_v42, %v4637_v2  ;;  %v4734_v55 = vmul.f32 %v4708_v42, %v4640_v3  ;;  %s7584_s18 = sld [smem:[#allocation33_spill]]  ;;  %s7188_s3 = sadd.s32 %s3520_s25, %s3519_s21 }
  0x4f   : > { %v487_v29 = vmul.f32 %v471_v26, %v471_v26  ;;  %v463_v30 = vld [vmem:[%s4617_s8 + $0x38] sm:$0xff]  ;;  %v4741_v59 = vmul.f32 %v4708_v42, %v4647_v6  ;;  %v4745_v60 = vmul.f32 %v4708_v42, %v4650_v7  ;;  %v4750_v62 = vmul.f32 %v4708_v42, %v4653_v8  ;;  %v1013_v1 = vld [vmem:[#allocation7 + $0xc8] sm:$0xff]  ;;  %s3222_s9 = sshll.u32 %s5947_s29, 4  ;;  %s3521_s19 = sshll.u32 %s7188_s3, 3  ;;  %s7211_s9 = int_to_ptr.vmem [resolvable:$true] %s3222_s9 }
  0x50   : > { %v479_v31 = vmul.f32 %v463_v30, %v463_v30  ;;  %v1063_v32 = vld [vmem:[#allocation7 + $0x258] sm:$0xff]  ;;  %v1058_v33 = vld [vmem:[#allocation7 + $0x230] sm:$0xff]  ;;  %v4756_v2 = vmul.f32 %v4708_v42, %v4662_v12  ;;  %v4760_v3 = vmul.f32 %v4708_v42, %v4665_v13  ;;  %v4764_v4 = vmul.f32 %v4708_v42, %v4668_v14  ;;  %s7585_s28 = sld [smem:[#allocation32_spill]] }
  0x51   : > { %1080 = vmatpush.msra.mxu0 %v1063_v32  ;;  %3530 = vmatpush.msra.mxu2 %v1063_v32  ;;  %v1043_v37 = vld [vmem:[#allocation7 + $0x1b8] sm:$0xff]  ;;  %v1038_v40 = vld [vmem:[#allocation7 + $0x190] sm:$0xff]  ;;  %v4768_v6 = vmul.f32 %v4708_v42, %v4677_v18  ;;  %v4772_v7 = vmul.f32 %v4708_v42, %v4680_v19  ;;  %s7586_s22 = sld [smem:[#allocation34_spill]] }
  0x52   : > { %3529 = vmatpush.msra.mxu1 %v1063_v32  ;;  %3531 = vmatpush.msra.mxu3 %v1063_v32  ;;  %v1023_v48 = vld [vmem:[#allocation7 + $0x118] sm:$0xff]  ;;  %v1018_v58 = vld [vmem:[#allocation7 + $0xf0] sm:$0xff]  ;;  %s7587_s24 = sld [smem:[#allocation35_spill]] }
  0x53   : > { %514 = vadd.xlane.f32.xlu2 %v485_v9  ;;  %512 = vadd.xlane.f32.xlu0 %v484_v10  ;;  %v1008_v10 = vld [vmem:[#allocation7 + $0xa0] sm:$0xff]  ;;  %v1003_v19 = vld [vmem:[#allocation7 + $0x78] sm:$0xff]  ;;  %v998_v30 = vld [vmem:[#allocation7 + $0x50] sm:$0xff] }
  0x54   : > { %496 = vadd.xlane.f32.xlu1 %v476_v11  ;;  %1081 = vmatpush.msra.mxu0 %v1058_v33  ;;  %s7181_s6 = scalar_lea.hbm %s7584_s18, %s3514_s1  ;;  %s4238_s25 = scalar_lea.hbm %s7584_s18, 1024 }
  0x55   : > { %3533 = vmatpush.msra.mxu2 %v1058_v33  ;;  %3532 = vmatpush.msra.mxu1 %v1058_v33  ;;  %s3224_s14 = sshll.u32 %s7181_s6, 4  ;;  %s3241_s6 = sshll.u32 %s5924_s2, 4  ;;  %s7217_s14 = int_to_ptr.hbm [resolvable:$true] %s3224_s14  ;;  %s7248_s6 = int_to_ptr.vmem [resolvable:$true] %s3241_s6 }
  0x56   : > { %3534 = vmatpush.msra.mxu3 %v1058_v33  ;;  %1082 = vmatpush.msra.mxu0 %v1053_v34  ;;  %s7224_s21 = scalar_lea.hbm %s7585_s28, %s3514_s1 }
  0x57   : > { %3536 = vmatpush.msra.mxu2 %v1053_v34  ;;  %3535 = vmatpush.msra.mxu1 %v1053_v34  ;;  %s3240_s13 = scalar_lea.hbm %s7586_s22, %s3521_s19 }
  0x58   : > { %3537 = vmatpush.msra.mxu3 %v1053_v34  ;;  %1083 = vmatpush.msra.mxu0 %v1048_v35  ;;  %s3259_s27 = scalar_lea.hbm %s7587_s24, %s3521_s19  ;;  %s3260_s19 = sshll.u32 %s5933_s20, 4  ;;  %s7264_s19 = int_to_ptr.vmem [resolvable:$true] %s3260_s19 }
  0x59   : > { %3539 = vmatpush.msra.mxu2 %v1048_v35  ;;  %3538 = vmatpush.msra.mxu1 %v1048_v35  ;;  %s3262_s1 = sshll.u32 %s3259_s27, 4  ;;  %s7266_s1 = int_to_ptr.hbm [resolvable:$true] %s3262_s1 }
  0x5a   : > { %3540 = vmatpush.msra.mxu3 %v1048_v35  ;;  %1084 = vmatpush.msra.mxu0 %v1043_v37 }
  0x5b   : > { %508 = vadd.xlane.f32.xlu2 %v482_v15  ;;  %490 = vadd.xlane.f32.xlu0 %v473_v16 }
  0x5c   : > { %498 = vadd.xlane.f32.xlu1 %v477_v17  ;;  %3542 = vmatpush.msra.mxu2 %v1043_v37 }
  0x5d   : > { %3541 = vmatpush.msra.mxu1 %v1043_v37  ;;  %3543 = vmatpush.msra.mxu3 %v1043_v37 }
  0x5e   : > { %1085 = vmatpush.msra.mxu0 %v1038_v40  ;;  %3545 = vmatpush.msra.mxu2 %v1038_v40 }
  0x5f   : > { %3544 = vmatpush.msra.mxu1 %v1038_v40  ;;  %3546 = vmatpush.msra.mxu3 %v1038_v40 }
  0x60   : > { %1086 = vmatpush.msra.mxu0 %v1033_v41  ;;  %3548 = vmatpush.msra.mxu2 %v1033_v41 }
  0x61   : > { %3547 = vmatpush.msra.mxu1 %v1033_v41  ;;  %3549 = vmatpush.msra.mxu3 %v1033_v41  ;;  %v993_v41 = vld [vmem:[#allocation7 + $0x28] sm:$0xff] }
  0x62   : > { %1087 = vmatpush.msra.mxu0 %v1028_v43  ;;  %3551 = vmatpush.msra.mxu2 %v1028_v43 }
  0x63   : > { %500 = vadd.xlane.f32.xlu2 %v478_v21  ;;  %516 = vadd.xlane.f32.xlu0 %v486_v22 }
  0x64   : > { %492 = vadd.xlane.f32.xlu1 %v474_v23  ;;  %3550 = vmatpush.msra.mxu1 %v1028_v43 }
  0x65   : > { %3552 = vmatpush.msra.mxu3 %v1028_v43  ;;  %1088 = vmatpush.msra.mxu0 %v1023_v48 }
  0x66   : > { %3554 = vmatpush.msra.mxu2 %v1023_v48  ;;  %3553 = vmatpush.msra.mxu1 %v1023_v48 }
  0x67   : > { %3555 = vmatpush.msra.mxu3 %v1023_v48  ;;  %1089 = vmatpush.msra.mxu0 %v1018_v58 }
  0x68   : > { %3557 = vmatpush.msra.mxu2 %v1018_v58  ;;  %3556 = vmatpush.msra.mxu1 %v1018_v58 }
  0x69   : > { %3558 = vmatpush.msra.mxu3 %v1018_v58  ;;  %1090 = vmatpush.msra.mxu0 %v1013_v1 }
  0x6a   : > { %3560 = vmatpush.msra.mxu2 %v1013_v1  ;;  %3559 = vmatpush.msra.mxu1 %v1013_v1 }
  0x6b   : > { %494 = vadd.xlane.f32.xlu2 %v475_v27  ;;  %510 = vadd.xlane.f32.xlu0 %v483_v28 }
  0x6c   : > { %518 = vadd.xlane.f32.xlu1 %v487_v29  ;;  %3561 = vmatpush.msra.mxu3 %v1013_v1 }
  0x6d   : > { %1091 = vmatpush.msra.mxu0 %v1008_v10  ;;  %3563 = vmatpush.msra.mxu2 %v1008_v10 }
  0x6e   : > { %3562 = vmatpush.msra.mxu1 %v1008_v10  ;;  %3564 = vmatpush.msra.mxu3 %v1008_v10 }
  0x6f   : > { %1092 = vmatpush.msra.mxu0 %v1003_v19  ;;  %3566 = vmatpush.msra.mxu2 %v1003_v19 }
  0x70   : > { %3565 = vmatpush.msra.mxu1 %v1003_v19  ;;  %3567 = vmatpush.msra.mxu3 %v1003_v19 }
  0x71   : > { %1093 = vmatpush.msra.mxu0 %v998_v30  ;;  %3569 = vmatpush.msra.mxu2 %v998_v30 }
  0x72   : > { %3568 = vmatpush.msra.mxu1 %v998_v30  ;;  %3570 = vmatpush.msra.mxu3 %v998_v30 }
  0x73   : > { %502 = vadd.xlane.f32.xlu0 %v479_v31  ;;  %1094 = vmatpush.msra.mxu0 %v993_v41 }
  0x74   : > { %3572 = vmatpush.msra.mxu2 %v993_v41  ;;  %3571 = vmatpush.msra.mxu1 %v993_v41 }
  0x75   : > { %3573 = vmatpush.msra.mxu3 %v993_v41  ;;  %v4868_v41 = vmul.f32 %v4708_v42, %v4683_v20 }
  0xbe   : > { %v4699_v36 = vpop.xlane.xlu2 %506  ;;  %v4702_v38 = vpop.xlane.xlu0 %504 }
  0xbf   : > { %3710 = vrsqrt.f32 %v4699_v36  ;;  %v4704_v39 = vpop.xlane.xlu1 %488  ;;  %vm635_vm0 = vcmp.eq.f32.partialorder %v4699_v36, inf  ;;  %vm637_vm1 = vcmp.eq.f32.partialorder %v4699_v36, 0.0  ;;  %v638_v12 = vand.u32 2147483648, %v4699_v36 }
  0xc0   : > { %3712 = vrsqrt.f32 %v4702_v38  ;;  %vm623_vm2 = vcmp.eq.f32.partialorder %v4702_v38, inf  ;;  %vm625_vm3 = vcmp.eq.f32.partialorder %v4702_v38, 0.0  ;;  %v626_v27 = vand.u32 2147483648, %v4702_v38 }
  0xc1   : > { %3714 = vrsqrt.f32 %v4704_v39  ;;  %vm527_vm4 = vcmp.eq.f32.partialorder %v4704_v39, inf  ;;  %vm529_vm5 = vcmp.eq.f32.partialorder %v4704_v39, 0.0  ;;  %v530_v48 = vand.u32 2147483648, %v4704_v39 }
  0xc5   : > { %v3711_v44 = vpop.eup %3710 }
  0xc6   : > { %v4710_v45 = vpop.eup %3712  ;;  %v629_v46 = vmul.f32 %v3711_v44, %v4699_v36  ;;  %v4713_v47 = vpop.xlane.xlu2 %514 }
  0xc7   : > { %v4715_v49 = vpop.eup %3714  ;;  %v617_v52 = vmul.f32 %v4710_v45, %v4702_v38  ;;  %3716 = vrsqrt.f32 %v4713_v47  ;;  %v4728_v53 = vpop.xlane.xlu0 %512  ;;  %vm683_vm6 = vcmp.eq.f32.partialorder %v4713_v47, inf  ;;  %vm685_vm7 = vcmp.eq.f32.partialorder %v4713_v47, 0.0 }
  0xc8   : > { %v4730_v54 = vpop.xlane.xlu1 %496  ;;  %v630_v56 = vmul.f32 %v3711_v44, %v629_v46  ;;  %v521_v57 = vmul.f32 %v4715_v49, %v4704_v39  ;;  %3718 = vrsqrt.f32 %v4728_v53  ;;  %v686_v1 = vand.u32 2147483648, %v4713_v47 }
  0xc9   : > { %v618_v61 = vmul.f32 %v4710_v45, %v617_v52  ;;  %3720 = vrsqrt.f32 %v4730_v54  ;;  %v988_v52 = vld [vmem:[#allocation7] sm:$0xff]  ;;  %vm671_vm8 = vcmp.eq.f32.partialorder %v4728_v53, inf  ;;  %vm673_vm9 = vcmp.eq.f32.partialorder %v4728_v53, 0.0 }
  0xca   : > { %v631_v63 = vmul.f32 0.5, %v630_v56  ;;  %v522_v0 = vmul.f32 %v4715_v49, %v521_v57  ;;  %1095 = vmatpush.msra.mxu0 %v988_v52  ;;  %3575 = vmatpush.msra.mxu2 %v988_v52  ;;  %v674_v30 = vand.u32 2147483648, %v4728_v53  ;;  %vm575_vm10 = vcmp.eq.f32.partialorder %v4730_v54, inf }
  0xcb   : > { %v619_v5 = vmul.f32 0.5, %v618_v61  ;;  %3574 = vmatpush.msra.mxu1 %v988_v52  ;;  %3576 = vmatpush.msra.mxu3 %v988_v52  ;;  %vm577_vm11 = vcmp.eq.f32.partialorder %v4730_v54, 0.0 }
  0xcc   : > { %v632_v8 = vsub.f32 1.5, %v631_v63  ;;  %v523_v9 = vmul.f32 0.5, %v522_v0 }
  0xcd   : > { %v4774_v11 = vpop.eup %3716  ;;  %v620_v13 = vsub.f32 1.5, %v619_v5 }
  0xce   : > { %v4779_v14 = vpop.eup %3718  ;;  %v633_v15 = vmul.f32 %v3711_v44, %v632_v8  ;;  %v524_v16 = vsub.f32 1.5, %v523_v9  ;;  %v677_v17 = vmul.f32 %v4774_v11, %v4713_v47  ;;  %v4784_v18 = vpop.xlane.xlu2 %508 }
  0xcf   : > { %v621_v21 = vmul.f32 %v4710_v45, %v620_v13  ;;  %v665_v22 = vmul.f32 %v4779_v14, %v4728_v53  ;;  %3722 = vrsqrt.f32 %v4784_v18  ;;  %v4791_v23 = vpop.xlane.xlu0 %490  ;;  %v3721_v25 = vpop.eup %3720  ;;  %vm647_vm12 = vcmp.eq.f32.partialorder %v4784_v18, inf }
  0xd0   : > { %v634_v26 = vmul.f32 %v633_v15, %v4699_v36  ;;  %v525_v28 = vmul.f32 %v4715_v49, %v524_v16  ;;  %v678_v29 = vmul.f32 %v4774_v11, %v677_v17  ;;  %v569_v33 = vmul.f32 %v3721_v25, %v4730_v54  ;;  %v4801_v34 = vpop.xlane.xlu1 %498 }
  0xd1   : > { %v622_v31 = vmul.f32 %v621_v21, %v4702_v38  ;;  %v666_v32 = vmul.f32 %v4779_v14, %v665_v22  ;;  %3724 = vrsqrt.f32 %v4791_v23  ;;  %vm649_vm13 = vcmp.eq.f32.partialorder %v4784_v18, 0.0 }
  0xd2   : > { %v636_v35 = vsel %vm635_vm0, %v4699_v36, %v634_v26  ;;  %v526_v37 = vmul.f32 %v525_v28, %v4704_v39  ;;  %v679_v40 = vmul.f32 0.5, %v678_v29  ;;  %v570_v45 = vmul.f32 %v3721_v25, %v569_v33 }
  0xd3   : > { %v624_v43 = vsel %vm623_vm2, %v4702_v38, %v622_v31  ;;  %v667_v44 = vmul.f32 0.5, %v666_v32  ;;  %v639_v57 = vsel %vm637_vm1, %v638_v12, %v636_v35  ;;  %3726 = vrsqrt.f32 %v4801_v34 }
  0xd4   : > { %v528_v46 = vsel %vm527_vm4, %v4704_v39, %v526_v37  ;;  %v680_v49 = vsub.f32 1.5, %v679_v40  ;;  %v571_v61 = vmul.f32 0.5, %v570_v45  ;;  %v627_v63 = vsel %vm625_vm3, %v626_v27, %v624_v43 }
  0xd5   : > { %v3723_v56 = vpop.eup %3722  ;;  %v668_v58 = vsub.f32 1.5, %v667_v44  ;;  %v531_v36 = vsel %vm529_vm5, %v530_v48, %v528_v46  ;;  %v4837_v16 = vmax.f32 %v627_v63, 1e-08  ;;  %v578_v31 = vand.u32 2147483648, %v4730_v54 }
  0xd6   : > { %v681_v0 = vmul.f32 %v4774_v11, %v680_v49  ;;  %v641_v5 = vmul.f32 %v3723_v56, %v4784_v18  ;;  %v572_v9 = vsub.f32 1.5, %v571_v61  ;;  %v4829_v10 = vpop.xlane.xlu2 %500  ;;  %v4833_v11 = vmax.f32 %v639_v57, 1e-08 }
  0xd7   : > { %v669_v8 = vmul.f32 %v4779_v14, %v668_v58  ;;  %v4831_v38 = vpop.xlane.xlu0 %516  ;;  %v3725_v12 = vpop.eup %3724  ;;  %v4841_v19 = vmax.f32 %v531_v36, 1e-08  ;;  %vm539_vm14 = vcmp.eq.f32.partialorder %v4791_v23, inf  ;;  %vm541_vm15 = vcmp.eq.f32.partialorder %v4791_v23, 0.0 }
  0xd8   : > { %v682_v13 = vmul.f32 %v681_v0, %v4713_v47  ;;  %v642_v15 = vmul.f32 %v3723_v56, %v641_v5  ;;  %v573_v14 = vmul.f32 %v3721_v25, %v572_v9  ;;  %v533_v17 = vmul.f32 %v3725_v12, %v4791_v23  ;;  %v4853_v29 = vpop.xlane.xlu1 %492 }
  0xd9   : > { %v670_v39 = vmul.f32 %v669_v8, %v4728_v53  ;;  %3728 = vrcp.f32 %v4833_v11  ;;  %v3727_v46 = vpop.eup %3726  ;;  %v542_v5 = vand.u32 2147483648, %v4791_v23  ;;  %vm587_vm0 = vcmp.eq.f32.partialorder %v4801_v34, inf }
  0xda   : > { %v684_v21 = vsel %vm683_vm6, %v4713_v47, %v682_v13  ;;  %v643_v22 = vmul.f32 0.5, %v642_v15  ;;  %v574_v25 = vmul.f32 %v573_v14, %v4730_v54  ;;  %v534_v28 = vmul.f32 %v3725_v12, %v533_v17 }
  0xdb   : > { %v687_v26 = vsel %vm685_vm7, %v686_v1, %v684_v21  ;;  %v672_v27 = vsel %vm671_vm8, %v4728_v53, %v670_v39  ;;  %3730 = vrcp.f32 %v4837_v16  ;;  %v650_v53 = vand.u32 2147483648, %v4784_v18 }
  0xdc   : > { %v644_v32 = vsub.f32 1.5, %v643_v22  ;;  %v4859_v47 = vmax.f32 %v687_v26, 1e-08  ;;  %v576_v33 = vsel %vm575_vm10, %v4730_v54, %v574_v25  ;;  %v535_v35 = vmul.f32 0.5, %v534_v28 }
  0xdd   : > { %v675_v37 = vsel %vm673_vm9, %v674_v30, %v672_v27  ;;  %3732 = vrcp.f32 %v4841_v19  ;;  %v579_v43 = vsel %vm577_vm11, %v578_v31, %v576_v33  ;;  %v581_v49 = vmul.f32 %v3727_v46, %v4801_v34 }
  0xde   : > { %v645_v40 = vmul.f32 %v3723_v56, %v644_v32  ;;  %v536_v44 = vsub.f32 1.5, %v535_v35  ;;  %3734 = vrsqrt.f32 %v4829_v10  ;;  %v4878_v54 = vmax.f32 %v675_v37, 1e-08  ;;  %v4881_v52 = vpop.xlane.xlu2 %494 }
  0xdf   : > { %v4871_v45 = vpop.xlane.xlu0 %510  ;;  %3736 = vrcp.f32 %v4859_v47  ;;  %v4883_v56 = vmax.f32 %v579_v43, 1e-08  ;;  %v4888_v58 = vpop.eup %3728  ;;  %v582_v0 = vmul.f32 %v3727_v46, %v581_v49  ;;  %v4908_v15 = vmul.f32 %v4708_v42, %v4692_v24 }
  0xe0   : > { %v646_v48 = vmul.f32 %v645_v40, %v4784_v18  ;;  %v537_v20 = vmul.f32 %v3725_v12, %v536_v44  ;;  %3738 = vrsqrt.f32 %v4831_v38  ;;  %v4904_v12 = vpop.xlane.xlu1 %518  ;;  %vm589_vm1 = vcmp.eq.f32.partialorder %v4801_v34, 0.0 }
  0xe1   : > { %3740 = vrsqrt.f32 %v4853_v29  ;;  %v4892_v1 = vpop.eup %3730  ;;  %v583_v9 = vmul.f32 0.5, %v582_v0  ;;  %v590_v24 = vand.u32 2147483648, %v4801_v34  ;;  %v602_v42 = vand.u32 2147483648, %v4829_v10 }
  0xe2   : > { %v648_v57 = vsel %vm647_vm12, %v4784_v18, %v646_v48  ;;  %v538_v63 = vmul.f32 %v537_v20, %v4791_v23  ;;  %3742 = vrsqrt.f32 %v4881_v52  ;;  %vm599_vm2 = vcmp.eq.f32.partialorder %v4829_v10, inf }
  0xe3   : > { %v651_v61 = vsel %vm649_vm13, %v650_v53, %v648_v57  ;;  %v4898_v18 = vpop.eup %3732  ;;  %3744 = vrcp.f32 %v4878_v54  ;;  %v584_v17 = vsub.f32 1.5, %v583_v9  ;;  %v698_v32 = vand.u32 2147483648, %v4831_v38 }
  0xe4   : > { %v4901_v36 = vmax.f32 %v651_v61, 1e-08  ;;  %v540_v8 = vsel %vm539_vm14, %v4791_v23, %v538_v63  ;;  %v3735_v13 = vpop.eup %3734  ;;  %3746 = vrcp.f32 %v4883_v56  ;;  %v554_v35 = vand.u32 2147483648, %v4853_v29 }
  0xe5   : > { %v543_v39 = vsel %vm541_vm15, %v542_v5, %v540_v8  ;;  %v4912_v14 = vpop.eup %3736  ;;  %v593_v23 = vmul.f32 %v3735_v13, %v4829_v10  ;;  %3748 = vrsqrt.f32 %v4871_v45  ;;  %v585_v25 = vmul.f32 %v3727_v46, %v584_v17 }
  0xe6   : > { %v3739_v22 = vpop.eup %3738  ;;  %v4919_v26 = vmax.f32 %v543_v39, 1e-08  ;;  %3750 = vrsqrt.f32 %v4904_v12  ;;  %vm601_vm3 = vcmp.eq.f32.partialorder %v4829_v10, 0.0  ;;  %vm695_vm4 = vcmp.eq.f32.partialorder %v4831_v38, inf }
  0xe7   : > { %v4917_v21 = vpop.xlane.xlu0 %502  ;;  %v3741_v27 = vpop.eup %3740  ;;  %3752 = vrcp.f32 %v4901_v36  ;;  %v594_v28 = vmul.f32 %v3735_v13, %v593_v23  ;;  %v689_v30 = vmul.f32 %v3739_v22, %v4831_v38  ;;  %v586_v40 = vmul.f32 %v585_v25, %v4801_v34 }
  0xe8   : > { %v3743_v31 = vpop.eup %3742  ;;  %v545_v33 = vmul.f32 %v3741_v27, %v4853_v29  ;;  %3754 = vrsqrt.f32 %v4917_v21  ;;  %v566_v20 = vand.u32 2147483648, %v4881_v52  ;;  %vm697_vm5 = vcmp.eq.f32.partialorder %v4831_v38, 0.0 }
  0xe9   : > { %v4931_v37 = vpop.eup %3744  ;;  %v595_v43 = vmul.f32 0.5, %v594_v28  ;;  %v690_v44 = vmul.f32 %v3739_v22, %v689_v30  ;;  %v557_v46 = vmul.f32 %v3743_v31, %v4881_v52  ;;  %3756 = vrcp.f32 %v4919_v26 }
  0xea   : > { %v4936_v48 = vpop.eup %3746  ;;  %v546_v53 = vmul.f32 %v3741_v27, %v545_v33  ;;  %v588_v61 = vsel %vm587_vm0, %v4801_v34, %v586_v40  ;;  %vm551_vm6 = vcmp.eq.f32.partialorder %v4853_v29, inf  ;;  %vm553_vm7 = vcmp.eq.f32.partialorder %v4853_v29, 0.0 }
  0xeb   : > { %v3749_v57 = vpop.eup %3748  ;;  %v596_v63 = vsub.f32 1.5, %v595_v43  ;;  %v691_v0 = vmul.f32 0.5, %v690_v44  ;;  %v558_v5 = vmul.f32 %v3743_v31, %v557_v46  ;;  %v591_v9 = vsel %vm589_vm1, %v590_v24, %v588_v61 }
  0xec   : > { %v4947_v8 = vpop.eup %3750  ;;  %v547_v39 = vmul.f32 0.5, %v546_v53  ;;  %vm563_vm8 = vcmp.eq.f32.partialorder %v4881_v52, inf  ;;  %v653_v17 = vmul.f32 %v3749_v57, %v4871_v45  ;;  %v749_v23 = vmul.f32 %v4898_v18, %v4841_v19 }
  0xed   : > { %v4956_v25 = vpop.eup %3752  ;;  %v597_v28 = vmul.f32 %v3735_v13, %v596_v63  ;;  %v692_v30 = vsub.f32 1.5, %v691_v0  ;;  %v559_v33 = vmul.f32 0.5, %v558_v5  ;;  %vm565_vm9 = vcmp.eq.f32.partialorder %v4881_v52, 0.0 }
  0xee   : > { %v710_v34 = vand.u32 2147483648, %v4904_v12  ;;  %v4960_v24 = vpop.eup %3754  ;;  %v548_v40 = vsub.f32 1.5, %v547_v39  ;;  %v654_v43 = vmul.f32 %v3749_v57, %v653_v17  ;;  %v701_v44 = vmul.f32 %v4947_v8, %v4904_v12 }
  0xef   : > { %v750_v46 = vsub.f32 1.0, %v749_v23  ;;  %v4964_v53 = vmax.f32 %v591_v9, 1e-08  ;;  %v598_v61 = vmul.f32 %v597_v28, %v4829_v10  ;;  %v693_v49 = vmul.f32 %v3739_v22, %v692_v30  ;;  %v4968_v63 = vpop.eup %3756 }
  0xf0   : > { %v560_v13 = vsub.f32 1.5, %v559_v33  ;;  %vm659_vm10 = vcmp.eq.f32.partialorder %v4871_v45, inf  ;;  %v549_v0 = vmul.f32 %v3741_v27, %v548_v40  ;;  %v655_v5 = vmul.f32 0.5, %v654_v43  ;;  %v1065_v43 = vld [vmem:[#allocation7 + $0x268] sm:$0xff] }
  0xf1   : > { %vm661_vm11 = vcmp.eq.f32.partialorder %v4871_v45, 0.0  ;;  %v702_v39 = vmul.f32 %v4947_v8, %v701_v44  ;;  %v605_v17 = vmul.f32 %v4960_v24, %v4917_v21  ;;  %v600_v9 = vsel %vm599_vm2, %v4829_v10, %v598_v61  ;;  %v1066_v44 = vld [vmem:[#allocation7 + $0x270] sm:$0xff]  ;;  %v1067_v61 = vld [vmem:[#allocation7 + $0x278] sm:$0xff]  ;;  %1210 = vmatpush.msrb.mxu2 %v1065_v43 }
  0xf2   : > { %v694_v22 = vmul.f32 %v693_v49, %v4831_v38  ;;  %v561_v23 = vmul.f32 %v3743_v31, %v560_v13  ;;  %vm707_vm12 = vcmp.eq.f32.partialorder %v4904_v12, inf  ;;  %v751_v28 = vmul.f32 %v4898_v18, %v750_v46  ;;  %1275 = vmatpush.msrb.mxu3 %v1066_v44  ;;  %v1061_v13 = vld [vmem:[#allocation7 + $0x248] sm:$0xff]  ;;  %1340 = vmatpush.msrb.mxu0 %v1067_v61 }
  0xf3   : > { %v603_v27 = vsel %vm601_vm3, %v602_v42, %v600_v9  ;;  %v550_v30 = vmul.f32 %v549_v0, %v4853_v29  ;;  %v656_v33 = vsub.f32 1.5, %v655_v5  ;;  %v703_v40 = vmul.f32 0.5, %v702_v39  ;;  %v1060_v42 = vld [vmem:[#allocation7 + $0x240] sm:$0xff]  ;;  %v1062_v0 = vld [vmem:[#allocation7 + $0x250] sm:$0xff] }
  0xf4   : > { %vm709_vm13 = vcmp.eq.f32.partialorder %v4904_v12, 0.0  ;;  %v4986_v49 = vmax.f32 %v603_v27, 1e-08  ;;  %v696_v31 = vsel %vm695_vm4, %v4831_v38, %v694_v22  ;;  %v562_v46 = vmul.f32 %v561_v23, %v4881_v52  ;;  %v1055_v23 = vld [vmem:[#allocation7 + $0x218] sm:$0xff]  ;;  %v1056_v27 = vld [vmem:[#allocation7 + $0x220] sm:$0xff]  ;;  %1211 = vmatpush.msrb.mxu2 %v1060_v42  ;;  %1276 = vmatpush.msrb.mxu3 %v1061_v13  ;;  %v1041_v13 = vld [vmem:[#allocation7 + $0x1a8] sm:$0xff] }
  0xf5   : > { %v606_v10 = vmul.f32 %v4960_v24, %v605_v17  ;;  %v699_v5 = vsel %vm697_vm5, %v698_v32, %v696_v31  ;;  %v552_v39 = vsel %vm551_vm6, %v4853_v29, %v550_v30  ;;  %v657_v9 = vmul.f32 %v3749_v57, %v656_v33  ;;  %v1057_v32 = vld [vmem:[#allocation7 + $0x228] sm:$0xff]  ;;  %1341 = vmatpush.msrb.mxu0 %v1062_v0  ;;  %v1050_v29 = vld [vmem:[#allocation7 + $0x1f0] sm:$0xff] }
  0xf6   : > { %v704_v22 = vsub.f32 1.5, %v703_v40  ;;  %3758 = vrcp.f32 %v4964_v53  ;;  %v5001_v17 = vmax.f32 %v699_v5, 1e-08  ;;  %v555_v43 = vsel %vm553_vm7, %v554_v35, %v552_v39  ;;  %v1051_v35 = vld [vmem:[#allocation7 + $0x1f8] sm:$0xff]  ;;  %1212 = vmatpush.msrb.mxu2 %v1055_v23  ;;  %1277 = vmatpush.msrb.mxu3 %v1056_v27 }
  0xf7   : > { %v564_v38 = vsel %vm563_vm8, %v4881_v52, %v562_v46  ;;  %v5010_v57 = vmax.f32 %v555_v43, 1e-08  ;;  %v658_v33 = vmul.f32 %v657_v9, %v4871_v45  ;;  %vm611_vm14 = vcmp.eq.f32.partialorder %v4917_v21, inf  ;;  %v1052_v52 = vld [vmem:[#allocation7 + $0x200] sm:$0xff]  ;;  %1342 = vmatpush.msrb.mxu0 %v1057_v32 }
  0xf8   : > { %v567_v30 = vsel %vm565_vm9, %v566_v20, %v564_v38  ;;  %v705_v40 = vmul.f32 %v4947_v8, %v704_v22  ;;  %3760 = vrcp.f32 %v4986_v49  ;;  %v607_v44 = vmul.f32 0.5, %v606_v10  ;;  %1213 = vmatpush.msrb.mxu2 %v1050_v29  ;;  %1278 = vmatpush.msrb.mxu3 %v1051_v35  ;;  %v1045_v29 = vld [vmem:[#allocation7 + $0x1c8] sm:$0xff] }
  0xf9   : > { %vm613_vm15 = vcmp.eq.f32.partialorder %v4917_v21, 0.0  ;;  %v752_v61 = vadd.f32 %v4898_v18, %v751_v28  ;;  %3762 = vrcp.f32 %v5001_v17  ;;  %v5023_v20 = vmax.f32 %v567_v30, 1e-08  ;;  %1343 = vmatpush.msrb.mxu0 %v1052_v52 }
  0xfa   : > { %v660_v8 = vsel %vm659_vm10, %v4871_v45, %v658_v33  ;;  %v706_v31 = vmul.f32 %v705_v40, %v4904_v12  ;;  %v7426_v46 = vand.u32 2147483648, %v4871_v45  ;;  %v608_v28 = vsub.f32 1.5, %v607_v44  ;;  %v1064_v40 = vld [vmem:[#allocation7 + $0x260] sm:$0xff]  ;;  %1214 = vmatpush.msrb.mxu2 %v1045_v29  ;;  %v1037_v29 = vld [vmem:[#allocation7 + $0x188] sm:$0xff] }
  0xfb   : > { %vm753_vm0 = vweird.f32 %v4841_v19  ;;  %vm754_vm1 = vweird.f32 %v4898_v18  ;;  %3764 = vrcp.f32 %v5010_v57  ;;  %v757_v45 = vand.u32 2147483647, %v4841_v19  ;;  %1145 = vmatpush.msrb.mxu1 %v1064_v40 }
  0xfc   : > { %v663_v10 = vsel %vm661_vm11, %v7426_v46, %v660_v8  ;;  %v708_v42 = vsel %vm707_vm12, %v4904_v12, %v706_v31  ;;  %vm5039_vm2 = vmor %vm753_vm0, %vm754_vm1  ;;  %v759_v0 = vand.u32 2147483648, %v4841_v19  ;;  %v5045_v5 = vpop.eup %3758  ;;  %v609_v9 = vmul.f32 %v4960_v24, %v608_v28  ;;  %v1046_v8 = vld [vmem:[#allocation7 + $0x1d0] sm:$0xff]  ;;  %v1047_v31 = vld [vmem:[#allocation7 + $0x1d8] sm:$0xff] }
  0xfd   : > { %v711_v39 = vsel %vm709_vm13, %v710_v34, %v708_v42  ;;  %v756_v22 = vsel %vm5039_vm2, %v4898_v18, %v752_v61  ;;  %v869_v23 = vmul.f32 %v4892_v1, %v4837_v16  ;;  %3766 = vrcp.f32 %v5023_v20  ;;  %v1059_v46 = vld [vmem:[#allocation7 + $0x238] sm:$0xff]  ;;  %1279 = vmatpush.msrb.mxu3 %v1046_v8  ;;  %v1040_v42 = vld [vmem:[#allocation7 + $0x1a0] sm:$0xff]  ;;  %1344 = vmatpush.msrb.mxu0 %v1047_v31 }
  0xfe   : > { %v5058_v19 = vmax.f32 %v663_v10, 1e-08  ;;  %v614_v27 = vand.u32 2147483648, %v4917_v21  ;;  %v760_v43 = vor.u32 1.1754944e-38, %v759_v0  ;;  %v5061_v38 = vpop.eup %3760  ;;  %v5063_v12 = vmax.f32 %v711_v39, 1e-08  ;;  %1146 = vmatpush.msrb.mxu1 %v1059_v46  ;;  %1215 = vmatpush.msrb.mxu2 %v1040_v42 }
  0xff   : > { %v610_v34 = vmul.f32 %v609_v9, %v4917_v21  ;;  %vm758_vm3 = vcmp.eq.f32.partialorder %v757_v45, 8.507059e+37  ;;  %v870_v24 = vsub.f32 1.0, %v869_v23  ;;  %v5066_v32 = vpop.eup %3762  ;;  %vm874_vm4 = vweird.f32 %v4892_v1  ;;  %v1042_v39 = vld [vmem:[#allocation7 + $0x1b0] sm:$0xff]  ;;  %1280 = vmatpush.msrb.mxu3 %v1041_v13 }
 0x100   : > { %v761_v18 = vsel %vm758_vm3, %v760_v43, %v756_v22  ;;  %v877_v30 = vand.u32 2147483647, %v4837_v16  ;;  %v879_v33 = vand.u32 2147483648, %v4837_v16  ;;  %v809_v52 = vmul.f32 %v4936_v48, %v4883_v56  ;;  %v1054_v9 = vld [vmem:[#allocation7 + $0x210] sm:$0xff]  ;;  %v1035_v22 = vld [vmem:[#allocation7 + $0x178] sm:$0xff]  ;;  %1345 = vmatpush.msrb.mxu0 %v1042_v39 }
 0x101   : > { %v612_v35 = vsel %vm611_vm14, %v4917_v21, %v610_v34  ;;  %v5075_v44 = vmul.f32 %v761_v18, %v4734_v55  ;;  %v871_v61 = vmul.f32 %v4892_v1, %v870_v24  ;;  %v5080_v10 = vpop.eup %3764  ;;  %3768 = vrcp.f32 %v5058_v19  ;;  %v1036_v18 = vld [vmem:[#allocation7 + $0x180] sm:$0xff]  ;;  %1147 = vmatpush.msrb.mxu1 %v1054_v9  ;;  %1216 = vmatpush.msrb.mxu2 %v1035_v22 }
 0x102   : > { %v615_v28 = vsel %vm613_vm15, %v614_v27, %v612_v35  ;;  %vm873_vm5 = vweird.f32 %v4837_v16  ;;  %vm5086_vm6 = vcmp.eq.f32.partialorder %v877_v30, 8.507059e+37  ;;  %3770 = vrcp.f32 %v5063_v12  ;;  %v1049_v30 = vld [vmem:[#allocation7 + $0x1e8] sm:$0xff]  ;;  %v1030_v35 = vld [vmem:[#allocation7 + $0x150] sm:$0xff]  ;;  %1281 = vmatpush.msrb.mxu3 %v1036_v18  ;;  %1346 = vmatpush.msrb.mxu0 %v1037_v29  ;;  %v1039_v29 = vld [vmem:[#allocation7 + $0x198] sm:$0xff] }
 0x103   : > { %v5091_v45 = vmax.f32 %v615_v28, 1e-08  ;;  %1096 = vmatmul.f32.vlgmr.msra.gmra.mxu0 %v5075_v44  ;;  %v872_v0 = vadd.f32 %v4892_v1, %v871_v61  ;;  %v810_v21 = vsub.f32 1.0, %v809_v52  ;;  %v5095_v23 = vpop.eup %3766  ;;  %vm5101_vm7 = vmor %vm873_vm5, %vm874_vm4  ;;  %v880_v43 = vor.u32 1.1754944e-38, %v879_v33  ;;  %1148 = vmatpush.msrb.mxu1 %v1049_v30  ;;  %v1032_v28 = vld [vmem:[#allocation7 + $0x160] sm:$0xff]  ;;  %v1025_v18 = vld [vmem:[#allocation7 + $0x128] sm:$0xff] }
 0x104   : > { %vm813_vm8 = vweird.f32 %v4883_v56  ;;  %v819_v34 = vand.u32 2147483648, %v4883_v56  ;;  %v884_v24 = vmul.f32 %v4888_v58, %v4833_v11  ;;  %vm814_vm9 = vweird.f32 %v4936_v48  ;;  %1217 = vmatpush.msrb.mxu2 %v1030_v35  ;;  %1347 = vmatpush.msrb.mxu0 %v1032_v28  ;;  %v1026_v30 = vld [vmem:[#allocation7 + $0x130] sm:$0xff]  ;;  %v1020_v35 = vld [vmem:[#allocation7 + $0x100] sm:$0xff] }
 0x105   : > { %v876_v16 = vsel %vm5101_vm7, %v4892_v1, %v872_v0  ;;  %v811_v40 = vmul.f32 %v4936_v48, %v810_v21  ;;  %v817_v33 = vand.u32 2147483647, %v4883_v56  ;;  %vm888_vm10 = vweird.f32 %v4833_v11  ;;  %v1031_v1 = vld [vmem:[#allocation7 + $0x158] sm:$0xff]  ;;  %vm5131_vm12 = vmor %vm813_vm8, %vm814_vm9 }
 0x106   : > { %v881_v61 = vsel %vm5086_vm6, %v880_v43, %v876_v16  ;;  %v885_v52 = vsub.f32 1.0, %v884_v24  ;;  %vm889_vm11 = vweird.f32 %v4888_v58  ;;  %3772 = vrcp.f32 %v5091_v45  ;;  %1282 = vmatpush.msrb.mxu3 %v1031_v1  ;;  %v1044_v24 = vld [vmem:[#allocation7 + $0x1c0] sm:$0xff]  ;;  %1218 = vmatpush.msrb.mxu2 %v1025_v18  ;;  %v1021_v1 = vld [vmem:[#allocation7 + $0x108] sm:$0xff]  ;;  %v1010_v18 = vld [vmem:[#allocation7 + $0xb0] sm:$0xff] }
 0x107   : > { %v5121_v8 = vmul.f32 %v881_v61, %v4723_v51  ;;  %v812_v31 = vadd.f32 %v4936_v48, %v811_v40  ;;  %v894_v46 = vand.u32 2147483648, %v4833_v11  ;;  %v5125_v55 = vpop.eup %3768  ;;  %v820_v13 = vor.u32 1.1754944e-38, %v819_v34  ;;  %vm5149_vm14 = vmor %vm888_vm10, %vm889_vm11  ;;  %1149 = vmatpush.msrb.mxu1 %v1044_v24  ;;  %v1029_v24 = vld [vmem:[#allocation7 + $0x148] sm:$0xff] }
 0x108   : > { %v886_v51 = vmul.f32 %v4888_v58, %v885_v52  ;;  %v892_v0 = vand.u32 2147483647, %v4833_v11  ;;  %v929_v21 = vmul.f32 %v4931_v37, %v4878_v54  ;;  %v5139_v39 = vpop.eup %3770  ;;  %vm818_vm13 = vcmp.eq.f32.partialorder %v817_v33, 8.507059e+37  ;;  %v1027_v33 = vld [vmem:[#allocation7 + $0x138] sm:$0xff]  ;;  %1283 = vmatpush.msrb.mxu3 %v1026_v30  ;;  %1219 = vmatpush.msrb.mxu2 %v1020_v35 }
 0x109   : > { %1120 = vmatmul.f32.vlgmr.msra.gmra.mxu2 %v5121_v8  ;;  %v816_v56 = vsel %vm5131_vm12, %v4936_v48, %v812_v31  ;;  %vm933_vm15 = vweird.f32 %v4878_v54  ;;  %v937_v22 = vand.u32 2147483647, %v4878_v54  ;;  %v939_v48 = vand.u32 2147483648, %v4878_v54  ;;  %1348 = vmatpush.msrb.mxu0 %v1027_v33  ;;  %v1022_v31 = vld [vmem:[#allocation7 + $0x110] sm:$0xff]  ;;  %v1012_v33 = vld [vmem:[#allocation7 + $0xc0] sm:$0xff] }
 0x10a   : > { %v821_v27 = vsel %vm818_vm13, %v820_v13, %v816_v56  ;;  %v887_v43 = vadd.f32 %v4888_v58, %v886_v51  ;;  %v930_v34 = vsub.f32 1.0, %v929_v21  ;;  %v895_v16 = vor.u32 1.1754944e-38, %v894_v46  ;;  %v1034_v13 = vld [vmem:[#allocation7 + $0x170] sm:$0xff]  ;;  %v1015_v51 = vld [vmem:[#allocation7 + $0xd8] sm:$0xff]  ;;  %1150 = vmatpush.msrb.mxu1 %v1039_v29  ;;  %1284 = vmatpush.msrb.mxu3 %v1021_v1 }
 0x10b   : > { %v5158_v11 = vmul.f32 %v821_v27, %v4750_v62  ;;  %vm934_vm0 = vweird.f32 %v4931_v37  ;;  %v764_v40 = vmul.f32 %v4968_v63, %v4919_v26  ;;  %vm893_vm1 = vcmp.eq.f32.partialorder %v892_v0, 8.507059e+37  ;;  %v1016_v0 = vld [vmem:[#allocation7 + $0xe0] sm:$0xff]  ;;  %v1017_v27 = vld [vmem:[#allocation7 + $0xe8] sm:$0xff]  ;;  %1349 = vmatpush.msrb.mxu0 %v1022_v31  ;;  %1220 = vmatpush.msrb.mxu2 %v1015_v51 }
 0x10c   : > { %v891_v61 = vsel %vm5149_vm14, %v4888_v58, %v887_v43  ;;  %v931_v52 = vmul.f32 %v4931_v37, %v930_v34  ;;  %vm5167_vm2 = vcmp.eq.f32.partialorder %v937_v22, 8.507059e+37  ;;  %v5171_v46 = vpop.eup %3772  ;;  %vm768_vm3 = vweird.f32 %v4919_v26  ;;  %vm5187_vm4 = vmor %vm933_vm15, %vm934_vm0  ;;  %1151 = vmatpush.msrb.mxu1 %v1034_v13  ;;  %1285 = vmatpush.msrb.mxu3 %v1016_v0  ;;  %v1024_v51 = vld [vmem:[#allocation7 + $0x120] sm:$0xff]  ;;  %v1005_v0 = vld [vmem:[#allocation7 + $0x88] sm:$0xff] }
 0x10d   : > { %1108 = vmatmul.f32.vlgmr.msra.gmra.mxu1 %v5158_v11  ;;  %v896_v28 = vsel %vm893_vm1, %v895_v16, %v891_v61  ;;  %v765_v42 = vsub.f32 1.0, %v764_v40  ;;  %v772_v58 = vand.u32 2147483647, %v4919_v26  ;;  %v940_v56 = vor.u32 1.1754944e-38, %v939_v48  ;;  %v1011_v40 = vld [vmem:[#allocation7 + $0xb8] sm:$0xff]  ;;  %1350 = vmatpush.msrb.mxu0 %v1017_v27 }
 0x10e   : > { %v932_v21 = vadd.f32 %v4931_v37, %v931_v52  ;;  %v774_v9 = vand.u32 2147483648, %v4919_v26  ;;  %v824_v22 = vmul.f32 %v5045_v5, %v4964_v53  ;;  %v5181_v43 = vmul.f32 %v896_v28, %v4719_v50  ;;  %1152 = vmatpush.msrb.mxu1 %v1029_v24  ;;  %1221 = vmatpush.msrb.mxu2 %v1010_v18  ;;  %v1019_v27 = vld [vmem:[#allocation7 + $0xf8] sm:$0xff]  ;;  %v1001_v18 = vld [vmem:[#allocation7 + $0x68] sm:$0xff] }
 0x10f   : > { %v766_v48 = vmul.f32 %v4968_v63, %v765_v42  ;;  %vm769_vm5 = vweird.f32 %v4968_v63  ;;  %vm828_vm6 = vweird.f32 %v4964_v53  ;;  %vm5197_vm7 = vcmp.eq.f32.partialorder %v772_v58, 8.507059e+37  ;;  %1286 = vmatpush.msrb.mxu3 %v1011_v40  ;;  %1351 = vmatpush.msrb.mxu0 %v1012_v33  ;;  %v1014_v40 = vld [vmem:[#allocation7 + $0xd0] sm:$0xff]  ;;  %v991_v58 = vld [vmem:[#allocation7 + $0x18] sm:$0xff] }
 0x110   : > { %v936_v50 = vsel %vm5187_vm4, %v4931_v37, %v932_v21  ;;  %v825_v30 = vsub.f32 1.0, %v824_v22  ;;  %v834_v16 = vand.u32 2147483648, %v4964_v53  ;;  %vm829_vm8 = vweird.f32 %v5045_v5  ;;  %vm770_vm9 = vmor %vm768_vm3, %vm769_vm5  ;;  %1153 = vmatpush.msrb.mxu1 %v1024_v51  ;;  %1222 = vmatpush.msrb.mxu2 %v1005_v0  ;;  %v1007_v22 = vld [vmem:[#allocation7 + $0x98] sm:$0xff]  ;;  %v992_v0 = vld [vmem:[#allocation7 + $0x20] sm:$0xff] }
 0x111   : > { %1123 = vmatmul.f32.gmra.mxu2 %v5181_v43  ;;  %v941_v29 = vsel %vm5167_vm2, %v940_v56, %v936_v50  ;;  %v767_v35 = vadd.f32 %v4968_v63, %v766_v48  ;;  %v899_v37 = vmul.f32 %v4956_v25, %v4901_v36  ;;  %v775_v52 = vor.u32 1.1754944e-38, %v774_v9  ;;  %vm5228_vm11 = vmor %vm828_vm6, %vm829_vm8  ;;  %v1006_v9 = vld [vmem:[#allocation7 + $0x90] sm:$0xff]  ;;  %1352 = vmatpush.msrb.mxu0 %v1007_v22 }
 0x112   : > { %v5210_v61 = vmul.f32 %v941_v29, %v4745_v60  ;;  %v826_v62 = vmul.f32 %v5045_v5, %v825_v30  ;;  %v832_v1 = vand.u32 2147483647, %v4964_v53  ;;  %v835_v28 = vor.u32 1.1754944e-38, %v834_v16  ;;  %1287 = vmatpush.msrb.mxu3 %v1006_v9  ;;  %v1002_v50 = vld [vmem:[#allocation7 + $0x70] sm:$0xff]  ;;  %1154 = vmatpush.msrb.mxu1 %v1019_v27 }
 0x113   : > { %v771_v31 = vsel %vm770_vm9, %v4968_v63, %v767_v35  ;;  %v900_v42 = vsub.f32 1.0, %v899_v37  ;;  %vm903_vm10 = vweird.f32 %v4901_v36  ;;  %v909_v63 = vand.u32 2147483648, %v4901_v36  ;;  %1353 = vmatpush.msrb.mxu0 %v1002_v50 }
 0x114   : > { %1132 = vmatmul.f32.vlgmr.msra.gmra.mxu3 %v5210_v61  ;;  %v776_v60 = vsel %vm5197_vm7, %v775_v52, %v771_v31  ;;  %v827_v26 = vadd.f32 %v5045_v5, %v826_v62  ;;  %v944_v13 = vmul.f32 %v4912_v14, %v4859_v47  ;;  %vm904_vm12 = vweird.f32 %v4956_v25  ;;  %v996_v62 = vld [vmem:[#allocation7 + $0x40] sm:$0xff]  ;;  %1155 = vmatpush.msrb.mxu1 %v1014_v40  ;;  %v990_v31 = vld [vmem:[#allocation7 + $0x10] sm:$0xff] }
 0x115   : > { %v5236_v21 = vmul.f32 %v776_v60, %v4760_v3  ;;  %v901_v56 = vmul.f32 %v4956_v25, %v900_v42  ;;  %v907_v53 = vand.u32 2147483647, %v4901_v36  ;;  %vm833_vm13 = vcmp.eq.f32.partialorder %v832_v1, 8.507059e+37  ;;  %v1000_v3 = vld [vmem:[#allocation7 + $0x60] sm:$0xff]  ;;  %vm5255_vm15 = vmor %vm903_vm10, %vm904_vm12  ;;  %1288 = vmatpush.msrb.mxu3 %v1001_v18  ;;  %v1009_v36 = vld [vmem:[#allocation7 + $0xa8] sm:$0xff] }
 0x116   : > { %v831_v34 = vsel %vm5228_vm11, %v5045_v5, %v827_v26  ;;  %v910_v48 = vor.u32 1.1754944e-38, %v909_v63  ;;  %v945_v24 = vsub.f32 1.0, %v944_v13  ;;  %vm949_vm14 = vweird.f32 %v4912_v14  ;;  %v995_v5 = vld [vmem:[#allocation7 + $0x38] sm:$0xff]  ;;  %1223 = vmatpush.msrb.mxu2 %v1000_v3  ;;  %1156 = vmatpush.msrb.mxu1 %v1009_v36 }
 0x117   : > { %1099 = vmatmul.f32.gmra.mxu0 %v5236_v21  ;;  %v836_v54 = vsel %vm833_vm13, %v835_v28, %v831_v34  ;;  %v902_v30 = vadd.f32 %v4956_v25, %v901_v56  ;;  %v954_v16 = vand.u32 2147483648, %v4859_v47  ;;  %v952_v37 = vand.u32 2147483647, %v4859_v47  ;;  %1289 = vmatpush.msrb.mxu3 %v996_v62  ;;  %v1004_v56 = vld [vmem:[#allocation7 + $0x80] sm:$0xff]  ;;  %v999_v34 = vld [vmem:[#allocation7 + $0x58] sm:$0xff] }
 0x118   : > { %v5249_v33 = vmul.f32 %v836_v54, %v4764_v4  ;;  %v946_v35 = vmul.f32 %v4912_v14, %v945_v24  ;;  %v779_v52 = vmul.f32 %v5080_v10, %v5010_v57  ;;  %v997_v4 = vld [vmem:[#allocation7 + $0x48] sm:$0xff]  ;;  %vm908_vm0 = vcmp.eq.f32.partialorder %v907_v53, 8.507059e+37  ;;  %1224 = vmatpush.msrb.mxu2 %v995_v5  ;;  %1157 = vmatpush.msrb.mxu1 %v1004_v56 }
 0x119   : > { %v906_v1 = vsel %vm5255_vm15, %v4956_v25, %v902_v30  ;;  %vm948_vm1 = vweird.f32 %v4859_v47  ;;  %vm783_vm2 = vweird.f32 %v5010_v57  ;;  %v955_v60 = vor.u32 1.1754944e-38, %v954_v16  ;;  %1354 = vmatpush.msrb.mxu0 %v997_v4  ;;  %1290 = vmatpush.msrb.mxu3 %v991_v58 }
 0x11a   : > { %1111 = vmatmul.f32.gmra.mxu1 %v5249_v33  ;;  %v911_v28 = vsel %vm908_vm0, %v910_v48, %v906_v1  ;;  %v947_v42 = vadd.f32 %v4912_v14, %v946_v35  ;;  %v780_v26 = vsub.f32 1.0, %v779_v52  ;;  %vm5275_vm3 = vmor %vm948_vm1, %vm949_vm14  ;;  %v787_v63 = vand.u32 2147483647, %v5010_v57  ;;  %1225 = vmatpush.msrb.mxu2 %v990_v31  ;;  %v989_v35 = vld [vmem:[#allocation7 + $0x8] sm:$0xff] }
 0x11b   : > { %v5271_v25 = vmul.f32 %v911_v28, %v4756_v2  ;;  %v789_v13 = vand.u32 2147483648, %v5010_v57  ;;  %v839_v51 = vmul.f32 %v5061_v38, %v4986_v49  ;;  %vm953_vm4 = vcmp.eq.f32.partialorder %v952_v37, 8.507059e+37  ;;  %1355 = vmatpush.msrb.mxu0 %v992_v0  ;;  %1158 = vmatpush.msrb.mxu1 %v999_v34 }
 0x11c   : > { %v951_v2 = vsel %vm5275_vm3, %v4912_v14, %v947_v42  ;;  %v781_v53 = vmul.f32 %v5080_v10, %v780_v26  ;;  %vm784_vm5 = vweird.f32 %v5080_v10  ;;  %vm843_vm6 = vweird.f32 %v4986_v49  ;;  %v4095_v26 = vld [vmem:[#allocation5] ss:$0 sm:$0xff] }
 0x11d   : > { %1126 = vmatmul.f32.gmra.mxu2 %v5271_v25  ;;  %v956_v9 = vsel %vm953_vm4, %v955_v60, %v951_v2  ;;  %v840_v22 = vsub.f32 1.0, %v839_v51  ;;  %v847_v27 = vand.u32 2147483647, %v4986_v49  ;;  %v849_v24 = vand.u32 2147483648, %v4986_v49  ;;  %vm785_vm7 = vmor %vm783_vm2, %vm784_vm5  ;;  %v4094_v60 = vld [vmem:[%s4617_s8 + $0x58] sm:$0xff] }
 0x11e   : > { %v5292_v48 = vmul.f32 %v956_v9, %v4741_v59  ;;  %v782_v14 = vadd.f32 %v5080_v10, %v781_v53  ;;  %v959_v3 = vmul.f32 %v5066_v32, %v5001_v17  ;;  %vm788_vm8 = vcmp.eq.f32.partialorder %v787_v63, 8.507059e+37  ;;  %v994_v59 = vld [vmem:[#allocation7 + $0x30] sm:$0xff] }
 0x11f   : > { %v790_v18 = vor.u32 1.1754944e-38, %v789_v13  ;;  %v841_v50 = vmul.f32 %v5061_v38, %v840_v22  ;;  %vm844_vm9 = vweird.f32 %v5061_v38  ;;  %vm5306_vm10 = vcmp.eq.f32.partialorder %v847_v27, 8.507059e+37  ;;  %1159 = vmatpush.msrb.mxu1 %v994_v59  ;;  %v4096_v9 = vld [vmem:[%s4617_s8 + $0x78] sm:$0xff] }
 0x120   : > { %1135 = vmatmul.f32.gmra.mxu3 %v5292_v48  ;;  %v786_v54 = vsel %vm785_vm7, %v5080_v10, %v782_v14  ;;  %v960_v16 = vsub.f32 1.0, %v959_v3  ;;  %vm964_vm11 = vweird.f32 %v5066_v32  ;;  %v969_v5 = vand.u32 2147483648, %v5001_v17  ;;  %vm845_vm12 = vmor %vm843_vm6, %vm844_vm9 }
 0x121   : > { %v791_v57 = vsel %vm788_vm8, %v790_v18, %v786_v54  ;;  %v842_v40 = vadd.f32 %v5061_v38, %v841_v50  ;;  %v794_v29 = vmul.f32 %v5095_v23, %v5023_v20  ;;  %v850_v10 = vor.u32 1.1754944e-38, %v849_v24  ;;  %1160 = vmatpush.msrb.mxu1 %v989_v35 }
 0x122   : > { %v5316_v37 = vmul.f32 %v791_v57, %v4868_v41  ;;  %v961_v52 = vmul.f32 %v5066_v32, %v960_v16  ;;  %v967_v62 = vand.u32 2147483647, %v5001_v17  ;;  %vm963_vm13 = vweird.f32 %v5001_v17 }
 0x123   : > { %v846_v4 = vsel %vm845_vm12, %v5061_v38, %v842_v40  ;;  %v970_v1 = vor.u32 1.1754944e-38, %v969_v5  ;;  %v795_v36 = vsub.f32 1.0, %v794_v29  ;;  %v802_v31 = vand.u32 2147483647, %v5023_v20  ;;  %vm965_vm14 = vmor %vm963_vm13, %vm964_vm11 }
 0x124   : > { %1102 = vmatmul.f32.gmra.mxu0 %v5316_v37  ;;  %v851_v41 = vsel %vm5306_vm10, %v850_v10, %v846_v4  ;;  %v962_v49 = vadd.f32 %v5066_v32, %v961_v52  ;;  %v804_v28 = vand.u32 2147483648, %v5023_v20  ;;  %vm799_vm15 = vweird.f32 %v5095_v23 }
 0x125   : > { %v5331_v42 = vmul.f32 %v851_v41, %v4768_v6  ;;  %v796_v17 = vmul.f32 %v5095_v23, %v795_v36  ;;  %v914_v38 = vmul.f32 %v5125_v55, %v5058_v19  ;;  %v727_v58 = vmul.f32 %v4095_v26, %v4094_v60 }
 0x126   : > { %v966_v47 = vsel %vm965_vm14, %v5066_v32, %v962_v49  ;;  %vm968_vm0 = vcmp.eq.f32.partialorder %v967_v62, 8.507059e+37  ;;  %vm798_vm1 = vweird.f32 %v5023_v20  ;;  %vm803_vm2 = vcmp.eq.f32.partialorder %v802_v31, 8.507059e+37 }
 0x127   : > { %1114 = vmatmul.f32.gmra.mxu1 %v5331_v42  ;;  %v971_v6 = vsel %vm968_vm0, %v970_v1, %v966_v47  ;;  %v797_v63 = vadd.f32 %v5095_v23, %v796_v17  ;;  %v915_v13 = vsub.f32 1.0, %v914_v38  ;;  %vm800_vm3 = vmor %vm798_vm1, %vm799_vm15  ;;  %v805_v0 = vor.u32 1.1754944e-38, %v804_v28 }
 0x128   : > { %v5345_v51 = vmul.f32 %v971_v6, %v4772_v7  ;;  %v924_v56 = vand.u32 2147483648, %v5058_v19  ;;  %v974_v32 = vmul.f32 %v5139_v39, %v5063_v12  ;;  %vm919_vm4 = vweird.f32 %v5125_v55 }
 0x129   : > { %v801_v2 = vsel %vm800_vm3, %v5095_v23, %v797_v63  ;;  %v916_v20 = vmul.f32 %v5125_v55, %v915_v13  ;;  %v922_v53 = vand.u32 2147483647, %v5058_v19  ;;  %v731_v22 = vmul.f32 %v4096_v9, %v4095_v26 }
 0x12a   : > { %1138 = vmatmul.f32.gmra.mxu3 %v5345_v51  ;;  %v806_v7 = vsel %vm803_vm2, %v805_v0, %v801_v2  ;;  %vm918_vm5 = vweird.f32 %v5058_v19  ;;  %v975_v27 = vsub.f32 1.0, %v974_v32  ;;  %v984_v23 = vand.u32 2147483648, %v5063_v12 }
 0x12b   : > { %v807_v34 = vmul.f32 %v806_v7, %v4908_v15  ;;  %v917_v14 = vadd.f32 %v5125_v55, %v916_v20  ;;  %v854_v24 = vmul.f32 %v5171_v46, %v5091_v45  ;;  %vm920_vm6 = vmor %vm918_vm5, %vm919_vm4  ;;  %v925_v3 = vor.u32 1.1754944e-38, %v924_v56 }
 0x12c   : > { %v976_v18 = vmul.f32 %v5139_v39, %v975_v27  ;;  %vm979_vm7 = vweird.f32 %v5139_v39  ;;  %v982_v50 = vand.u32 2147483647, %v5063_v12  ;;  %vm923_vm8 = vcmp.eq.f32.partialorder %v922_v53, 8.507059e+37 }
 0x12d   : > { %1105 = vmatmul.f32.gmra.mxu0 %v807_v34  ;;  %v921_v19 = vsel %vm920_vm6, %v5125_v55, %v917_v14  ;;  %vm978_vm9 = vweird.f32 %v5063_v12  ;;  %v855_v15 = vsub.f32 1.0, %v854_v24  ;;  %vm859_vm10 = vweird.f32 %v5171_v46  ;;  %v4097_v12 = vld [vmem:[%s4617_s8 + $0x38] sm:$0xff]  ;;  %s3243_s8 = sshll.u32 %s3240_s13, 4  ;;  %s7259_s8 = int_to_ptr.hbm [resolvable:$true] %s3243_s8 }
 0x12e   : > { %v926_v59 = vsel %vm923_vm8, %v925_v3, %v921_v19  ;;  %v977_v54 = vadd.f32 %v5139_v39, %v976_v18  ;;  %v864_v30 = vand.u32 2147483648, %v5091_v45  ;;  %vm980_vm11 = vmor %vm978_vm9, %vm979_vm7  ;;  %v985_v57 = vor.u32 1.1754944e-38, %v984_v23 }
 0x12f   : > { %v5370_v16 = vmul.f32 %v926_v59, %v727_v58  ;;  %v856_v40 = vmul.f32 %v5171_v46, %v855_v15  ;;  %v862_v5 = vand.u32 2147483647, %v5091_v45  ;;  %vm983_vm12 = vcmp.eq.f32.partialorder %v982_v50, 8.507059e+37 }
 0x130   : > { %v981_v55 = vsel %vm980_vm11, %v5139_v39, %v977_v54  ;;  %v723_v29 = vmul.f32 %v4097_v12, %v4095_v26  ;;  %vm858_vm13 = vweird.f32 %v5091_v45  ;;  %v865_v62 = vor.u32 1.1754944e-38, %v864_v30 }
 0x131   : > { %1129 = vmatmul.f32.gmra.mxu2 %v5370_v16  ;;  %v986_v35 = vsel %vm983_vm12, %v985_v57, %v981_v55  ;;  %v857_v10 = vadd.f32 %v5171_v46, %v856_v40  ;;  %vm860_vm14 = vmor %vm858_vm13, %vm859_vm10  ;;  %vm863_vm15 = vcmp.eq.f32.partialorder %v862_v5, 8.507059e+37 }
 0x132   : > { %v5379_v52 = vmul.f32 %v986_v35, %v731_v22 }
 0x133   : > { %v861_v4 = vsel %vm860_vm14, %v5171_v46, %v857_v10 }
 0x134   : > { %1141 = vmatmul.f32.gmra.mxu3 %v5379_v52  ;;  %v866_v39 = vsel %vm863_vm15, %v865_v62, %v861_v4 }
 0x135   : > { %v867_v1 = vmul.f32 %v866_v39, %v723_v29  ;;  %1356 = vmatmul.f32.vlgmr.msrb.gmra.mxu0 %v5075_v44 }
 0x137   : > { %1117 = vmatmul.f32.gmra.mxu1 %v867_v1 }
 0x139   : > { %1226 = vmatmul.f32.vlgmr.msrb.gmra.mxu2 %v5075_v44 }
 0x13c   : > { %1291 = vmatmul.f32.vlgmr.msrb.gmra.mxu3 %v5075_v44 }
 0x13d   : > { %1359 = vmatmul.f32.gmra.mxu0 %v5236_v21 }
 0x13f   : > { %1161 = vmatmul.f32.vlgmr.msrb.gmra.mxu1 %v5075_v44  ;;  %v5411_v44 = vld [vmem:[#allocation8] sm:$0x1f] }
 0x140   : > { %v5416_v45 = vperm.slane %v5411_v44, 0 }
 0x141   : > { %1229 = vmatmul.f32.gmra.mxu2 %v5236_v21 }
 0x144   : > { %1294 = vmatmul.f32.gmra.mxu3 %v5236_v21 }
 0x145   : > { %1362 = vmatmul.f32.gmra.mxu0 %v5316_v37 }
 0x147   : > { %1164 = vmatmul.f32.gmra.mxu1 %v5236_v21 }
 0x149   : > { %1232 = vmatmul.f32.gmra.mxu2 %v5316_v37 }
 0x14c   : > { %1297 = vmatmul.f32.gmra.mxu3 %v5316_v37 }
 0x14d   : > { %1365 = vmatmul.f32.gmra.mxu0 %v807_v34 }
 0x14f   : > { %1167 = vmatmul.f32.gmra.mxu1 %v5316_v37 }
 0x151   : > { %1235 = vmatmul.f32.gmra.mxu2 %v807_v34 }
 0x154   : > { %1300 = vmatmul.f32.gmra.mxu3 %v807_v34 }
 0x155   : > { %1368 = vmatmul.f32.gmra.mxu0 %v5158_v11 }
 0x157   : > { %1170 = vmatmul.f32.gmra.mxu1 %v807_v34 }
 0x159   : > { %1238 = vmatmul.f32.gmra.mxu2 %v5158_v11 }
 0x15c   : > { %1303 = vmatmul.f32.gmra.mxu3 %v5158_v11 }
 0x15d   : > { %1371 = vmatmul.f32.gmra.mxu0 %v5249_v33 }
 0x15f   : > { %1173 = vmatmul.f32.gmra.mxu1 %v5158_v11 }
 0x161   : > { %1241 = vmatmul.f32.gmra.mxu2 %v5249_v33 }
 0x164   : > { %1306 = vmatmul.f32.gmra.mxu3 %v5249_v33 }
 0x165   : > { %1374 = vmatmul.f32.gmra.mxu0 %v5331_v42 }
 0x167   : > { %1176 = vmatmul.f32.gmra.mxu1 %v5249_v33 }
 0x169   : > { %1244 = vmatmul.f32.gmra.mxu2 %v5331_v42 }
 0x16c   : > { %1309 = vmatmul.f32.gmra.mxu3 %v5331_v42 }
 0x16d   : > { %1377 = vmatmul.f32.gmra.mxu0 %v867_v1 }
 0x16f   : > { %1179 = vmatmul.f32.gmra.mxu1 %v5331_v42 }
 0x171   : > { %1247 = vmatmul.f32.gmra.mxu2 %v867_v1 }
 0x174   : > { %1312 = vmatmul.f32.gmra.mxu3 %v867_v1 }
 0x175   : > { %1380 = vmatmul.f32.gmra.mxu0 %v5121_v8 }
 0x177   : > { %1182 = vmatmul.f32.gmra.mxu1 %v867_v1 }
 0x179   : > { %1250 = vmatmul.f32.gmra.mxu2 %v5121_v8 }
 0x17c   : > { %1315 = vmatmul.f32.gmra.mxu3 %v5121_v8 }
 0x17d   : > { %1383 = vmatmul.f32.gmra.mxu0 %v5181_v43 }
 0x17f   : > { %1185 = vmatmul.f32.gmra.mxu1 %v5121_v8 }
 0x180   : > { %v1097_v11 = vpop.f32.mrf.mxu0 }
 0x181   : > { %1253 = vmatmul.f32.gmra.mxu2 %v5181_v43  ;;  %v5421_v46 = vadd.f32 %v1097_v11, %v5416_v45 }
 0x183   : > { %v1405_v21 = vsub.f32 0.0, %v5421_v46 }
 0x184   : > { %1318 = vmatmul.f32.gmra.mxu3 %v5181_v43 }
 0x185   : > { %1386 = vmatmul.f32.gmra.mxu0 %v5271_v25  ;;  %v1485_v33 = vmul.f32 1.442695, %v1405_v21 }
 0x187   : > { %1188 = vmatmul.f32.gmra.mxu1 %v5181_v43  ;;  %3774 = vpow2.f32 %v1485_v33 }
 0x189   : > { %1256 = vmatmul.f32.gmra.mxu2 %v5271_v25 }
 0x18a   : > { %v1109_v37 = vpop.f32.mrf.mxu1 }
 0x18b   : > { %v5429_v8 = vadd.f32 %v1109_v37, %v5416_v45 }
 0x18c   : > { %1321 = vmatmul.f32.gmra.mxu3 %v5271_v25  ;;  %v1121_v36 = vpop.f32.mrf.mxu2 }
 0x18d   : > { %v3775_v41 = vpop.eup %3774  ;;  %1389 = vmatmul.f32.gmra.mxu0 %v5370_v16  ;;  %v5434_v49 = vadd.f32 %v1121_v36, %v5416_v45  ;;  %v1425_v31 = vsub.f32 0.0, %v5429_v8 }
 0x18e   : > { %v1645_v28 = vadd.f32 1.0, %v3775_v41 }
 0x18f   : > { %1191 = vmatmul.f32.gmra.mxu1 %v5271_v25  ;;  %v1445_v43 = vsub.f32 0.0, %v5434_v49  ;;  %v1525_v42 = vmul.f32 1.442695, %v1425_v31 }
 0x190   : > { %3776 = vrcp.f32 %v1645_v28  ;;  %v1734_v9 = vand.u32 2147483647, %v1645_v28  ;;  %v1736_v22 = vand.u32 2147483648, %v1645_v28  ;;  %vm1730_vm1 = vweird.f32 %v1645_v28 }
 0x191   : > { %1259 = vmatmul.f32.gmra.mxu2 %v5370_v16  ;;  %v1565_v17 = vmul.f32 1.442695, %v1445_v43  ;;  %3778 = vpow2.f32 %v1525_v42 }
 0x192   : > { %v1737_v50 = vor.u32 1.1754944e-38, %v1736_v22  ;;  %vm1735_vm3 = vcmp.eq.f32.partialorder %v1734_v9, 8.507059e+37 }
 0x193   : > { %3780 = vpow2.f32 %v1565_v17 }
 0x194   : > { %1324 = vmatmul.f32.gmra.mxu3 %v5370_v16  ;;  %v1124_v38 = vpop.f32.mrf.mxu2  ;;  %v1100_v60 = vpop.f32.mrf.mxu0 }
 0x195   : > { %1392 = vmatmul.f32.gmra.mxu0 %v5210_v61  ;;  %v5443_v26 = vadd.f32 %v1124_v38, %v5416_v45  ;;  %v5446_v25 = vadd.f32 %v1100_v60, %v5416_v45 }
 0x196   : > { %v3777_v58 = vpop.eup %3776 }
 0x197   : > { %v3779_v47 = vpop.eup %3778  ;;  %v1726_v6 = vmul.f32 %v3777_v58, %v1645_v28  ;;  %1194 = vmatmul.f32.gmra.mxu1 %v5370_v16  ;;  %v1450_v63 = vsub.f32 0.0, %v5443_v26  ;;  %v1133_v13 = vpop.f32.mrf.mxu3  ;;  %v1410_v0 = vsub.f32 0.0, %v5446_v25  ;;  %vm1731_vm0 = vweird.f32 %v3777_v58 }
 0x198   : > { %v1112_v56 = vpop.f32.mrf.mxu1  ;;  %v5451_v32 = vadd.f32 1.0, %v3779_v47  ;;  %v5454_v2 = vadd.f32 %v1133_v13, %v5416_v45  ;;  %vm1732_vm2 = vmor %vm1730_vm1, %vm1731_vm0 }
 0x199   : > { %v3781_v20 = vpop.eup %3780  ;;  %v1727_v53 = vsub.f32 1.0, %v1726_v6  ;;  %1262 = vmatmul.f32.gmra.mxu2 %v5210_v61  ;;  %v1575_v7 = vmul.f32 1.442695, %v1450_v63  ;;  %v1495_v34 = vmul.f32 1.442695, %v1410_v0  ;;  %v5461_v14 = vadd.f32 %v1112_v56, %v5416_v45 }
 0x19a   : > { %v5457_v27 = vadd.f32 1.0, %v3781_v20  ;;  %3782 = vrcp.f32 %v5451_v32  ;;  %v1465_v24 = vsub.f32 0.0, %v5454_v2  ;;  %v2034_v30 = vand.u32 2147483647, %v5451_v32 }
 0x19b   : > { %v1728_v23 = vmul.f32 %v3777_v58, %v1727_v53  ;;  %3784 = vpow2.f32 %v1575_v7  ;;  %v1430_v19 = vsub.f32 0.0, %v5461_v14  ;;  %vm2030_vm4 = vweird.f32 %v5451_v32 }
 0x19c   : > { %3786 = vrcp.f32 %v5457_v27  ;;  %1327 = vmatmul.f32.gmra.mxu3 %v5210_v61  ;;  %v1605_v18 = vmul.f32 1.442695, %v1465_v24  ;;  %v2334_v29 = vand.u32 2147483647, %v5457_v27  ;;  %v2036_v35 = vand.u32 2147483648, %v5451_v32 }
 0x19d   : > { %v1729_v3 = vadd.f32 %v3777_v58, %v1728_v23  ;;  %1395 = vmatmul.f32.gmra.mxu0 %v5292_v48  ;;  %3788 = vpow2.f32 %v1495_v34  ;;  %v1535_v16 = vmul.f32 1.442695, %v1430_v19  ;;  %vm2330_vm5 = vweird.f32 %v5457_v27 }
 0x19e   : > { %3790 = vpow2.f32 %v1605_v18  ;;  %v2336_v4 = vand.u32 2147483648, %v5457_v27  ;;  %vm5490_vm7 = vcmp.eq.f32.partialorder %v2034_v30, 8.507059e+37  ;;  %vm5501_vm9 = vcmp.eq.f32.partialorder %v2334_v29, 8.507059e+37 }
 0x19f   : > { %v1733_v15 = vsel %vm1732_vm2, %v3777_v58, %v1729_v3  ;;  %1197 = vmatmul.f32.gmra.mxu1 %v5210_v61  ;;  %3792 = vpow2.f32 %v1535_v16  ;;  %v2037_v42 = vor.u32 1.1754944e-38, %v2036_v35 }
 0x1a0   : > { %v3783_v59 = vpop.eup %3782  ;;  %v1738_v54 = vsel %vm1735_vm3, %v1737_v50, %v1733_v15  ;;  %v1127_v57 = vpop.f32.mrf.mxu2  ;;  %v2337_v6 = vor.u32 1.1754944e-38, %v2336_v4 }
 0x1a1   : > { %v3785_v40 = vpop.eup %3784  ;;  %v2925_v5 = vmul.f32 %v1738_v54, %v5421_v46  ;;  %v2026_v55 = vmul.f32 %v3783_v59, %v5451_v32  ;;  %1265 = vmatmul.f32.gmra.mxu2 %v5292_v48  ;;  %v5476_v12 = vadd.f32 %v1127_v57, %v5416_v45  ;;  %vm2031_vm6 = vweird.f32 %v3783_v59  ;;  %v1103_v28 = vpop.f32.mrf.mxu0 }
 0x1a2   : > { %v3787_v61 = vpop.eup %3786  ;;  %v5480_v10 = vadd.f32 1.0, %v3785_v40  ;;  %vm2032_vm10 = vmor %vm2030_vm4, %vm2031_vm6  ;;  %v5515_v13 = vadd.f32 %v1103_v28, %v5416_v45 }
 0x1a3   : > { %3007 = vst [vmem:[%s5484_s7] sm:$0xff] %v2925_v5  ;;  %v2326_v62 = vmul.f32 %v3787_v61, %v5457_v27  ;;  %v2027_v39 = vsub.f32 1.0, %v2026_v55  ;;  %v3789_v1 = vpop.eup %3788  ;;  %v1455_v46 = vsub.f32 0.0, %v5476_v12  ;;  %v1136_v21 = vpop.f32.mrf.mxu3  ;;  %vm2331_vm8 = vweird.f32 %v3787_v61 }
 0x1a4   : > { %3794 = vrcp.f32 %v5480_v10  ;;  %1330 = vmatmul.f32.gmra.mxu3 %v5292_v48  ;;  %v3791_v33 = vpop.eup %3790  ;;  %v2411_v41 = vand.u32 2147483648, %v5480_v10  ;;  %v5498_v31 = vadd.f32 1.0, %v3789_v1  ;;  %v2409_v58 = vand.u32 2147483647, %v5480_v10  ;;  %vm2332_vm12 = vmor %vm2330_vm5, %vm2331_vm8 }
 0x1a5   : > { %v2327_v37 = vsub.f32 1.0, %v2326_v62  ;;  %v2028_v36 = vmul.f32 %v3783_v59, %v2027_v39  ;;  %1398 = vmatmul.f32.gmra.mxu0 %v5345_v51  ;;  %v5505_v17 = vadd.f32 1.0, %v3791_v33  ;;  %v3793_v47 = vpop.eup %3792  ;;  %v1585_v63 = vmul.f32 1.442695, %v1455_v46 }
 0x1a6   : > { %3796 = vrcp.f32 %v5498_v31  ;;  %vm2405_vm11 = vweird.f32 %v5480_v10  ;;  %v5518_v20 = vor.u32 1.1754944e-38, %v2411_v41  ;;  %v1809_v9 = vand.u32 2147483647, %v5498_v31 }
 0x1a7   : > { %v2328_v38 = vmul.f32 %v3787_v61, %v2327_v37  ;;  %v2029_v60 = vadd.f32 %v3783_v59, %v2028_v36  ;;  %1200 = vmatmul.f32.gmra.mxu1 %v5292_v48  ;;  %3798 = vrcp.f32 %v5505_v17  ;;  %v2636_v48 = vand.u32 2147483648, %v5505_v17 }
 0x1a8   : > { %v1811_v22 = vand.u32 2147483648, %v5498_v31  ;;  %v5529_v7 = vadd.f32 1.0, %v3793_v47  ;;  %vm5533_vm13 = vcmp.eq.f32.partialorder %v2409_v58, 8.507059e+37  ;;  %v2634_v27 = vand.u32 2147483647, %v5505_v17 }
 0x1a9   : > { %v2329_v0 = vadd.f32 %v3787_v61, %v2328_v38  ;;  %v2033_v56 = vsel %vm2032_vm10, %v3783_v59, %v2029_v60  ;;  %1268 = vmatmul.f32.gmra.mxu2 %v5345_v51  ;;  %vm1805_vm14 = vweird.f32 %v5498_v31  ;;  %v5543_v50 = vadd.f32 %v1136_v21, %v5416_v45 }
 0x1aa   : > { %v3795_v53 = vpop.eup %3794  ;;  %v2038_v32 = vsel %vm5490_vm7, %v2037_v42, %v2033_v56  ;;  %3800 = vrcp.f32 %v5529_v7  ;;  %vm2630_vm0 = vweird.f32 %v5505_v17  ;;  %v2637_v59 = vor.u32 1.1754944e-38, %v2636_v48  ;;  %v1106_v62 = vpop.f32.mrf.mxu0 }
 0x1ab   : > { %v2333_v34 = vsel %vm2332_vm12, %v3787_v61, %v2329_v0  ;;  %v2945_v23 = vmul.f32 %v2038_v32, %v5429_v8  ;;  %v2401_v24 = vmul.f32 %v3795_v53, %v5480_v10  ;;  %vm2406_vm15 = vweird.f32 %v3795_v53 }
 0x1ac   : > { %v2338_v18 = vsel %vm5501_vm9, %v2337_v6, %v2333_v34  ;;  %1333 = vmatmul.f32.gmra.mxu3 %v5345_v51  ;;  %v5546_v8 = vpop.eup %3796  ;;  %vm5554_vm1 = vcmp.eq.f32.partialorder %v1809_v9, 8.507059e+37  ;;  %v1812_v57 = vor.u32 1.1754944e-38, %v1811_v22  ;;  %v2109_v40 = vand.u32 2147483647, %v5529_v7  ;;  %vm2407_vm5 = vmor %vm2405_vm11, %vm2406_vm15 }
 0x1ad   : > { %v2965_v19 = vmul.f32 %v2338_v18, %v5434_v49  ;;  %3015 = vst [vmem:[%s5484_s7 + $0x40] sm:$0xff] %v2945_v23  ;;  %v2402_v15 = vsub.f32 1.0, %v2401_v24  ;;  %1401 = vmatmul.f32.gmra.mxu0 %v5379_v52  ;;  %v3799_v54 = vpop.eup %3798  ;;  %v1801_v30 = vmul.f32 %v5546_v8, %v5498_v31  ;;  %3802 = vpow2.f32 %v1585_v63  ;;  %v1115_v49 = vpop.f32.mrf.mxu1 }
 0x1ae   : > { %v1139_v5 = vpop.f32.mrf.mxu3  ;;  %v2626_v61 = vmul.f32 %v3799_v54, %v5505_v17  ;;  %vm5561_vm2 = vcmp.eq.f32.partialorder %v2634_v27, 8.507059e+37  ;;  %vm1806_vm3 = vweird.f32 %v5546_v8  ;;  %v2111_v35 = vand.u32 2147483648, %v5529_v7 }
 0x1af   : > { %3023 = vst [vmem:[%s5484_s7 + $0x80] sm:$0xff] %v2965_v19  ;;  %v2403_v55 = vmul.f32 %v3795_v53, %v2402_v15  ;;  %1203 = vmatmul.f32.gmra.mxu1 %v5345_v51  ;;  %vm2631_vm4 = vweird.f32 %v3799_v54  ;;  %v1802_v4 = vsub.f32 1.0, %v1801_v30  ;;  %v1470_v39 = vsub.f32 0.0, %v5543_v50  ;;  %vm1807_vm7 = vmor %vm1805_vm14, %vm1806_vm3 }
 0x1b0   : > { %v1415_v1 = vsub.f32 0.0, %v5515_v13  ;;  %v2627_v46 = vsub.f32 1.0, %v2626_v61  ;;  %v5571_v21 = vadd.f32 %v1115_v49, %v5416_v45  ;;  %v5574_v33 = vadd.f32 %v1139_v5, %v5416_v45  ;;  %v3801_v37 = vpop.eup %3800  ;;  %vm2632_vm8 = vmor %vm2630_vm0, %vm2631_vm4 }
 0x1b1   : > { %v2404_v11 = vadd.f32 %v3795_v53, %v2403_v55  ;;  %1271 = vmatmul.f32.gmra.mxu2 %v5379_v52  ;;  %v1803_v51 = vmul.f32 %v5546_v8, %v1802_v4  ;;  %v1615_v36 = vmul.f32 1.442695, %v1470_v39  ;;  %v5582_v28 = vadd.f32 %v1106_v62, %v5416_v45 }
 0x1b2   : > { %v1505_v41 = vmul.f32 1.442695, %v1415_v1  ;;  %v2628_v42 = vmul.f32 %v3799_v54, %v2627_v46  ;;  %v2101_v38 = vmul.f32 %v3801_v37, %v5529_v7  ;;  %vm2106_vm6 = vweird.f32 %v3801_v37 }
 0x1b3   : > { %v2408_v43 = vsel %vm2407_vm5, %v3795_v53, %v2404_v11  ;;  %v3803_v60 = vpop.eup %3802  ;;  %v1804_v10 = vadd.f32 %v5546_v8, %v1803_v51  ;;  %3804 = vpow2.f32 %v1615_v36  ;;  %v1435_v47 = vsub.f32 0.0, %v5571_v21 }
 0x1b4   : > { %v2413_v58 = vsel %vm5533_vm13, %v5518_v20, %v2408_v43  ;;  %1336 = vmatmul.f32.gmra.mxu3 %v5379_v52  ;;  %v2629_v63 = vadd.f32 %v3799_v54, %v2628_v42  ;;  %v2102_v0 = vsub.f32 1.0, %v2101_v38  ;;  %v5596_v56 = vadd.f32 1.0, %v3803_v60  ;;  %v1130_v9 = vpop.f32.mrf.mxu2 }
 0x1b5   : > { %v2970_v6 = vmul.f32 %v2413_v58, %v5443_v26  ;;  %v1808_v20 = vsel %vm1807_vm7, %v5546_v8, %v1804_v10  ;;  %3806 = vpow2.f32 %v1505_v41  ;;  %v1545_v48 = vmul.f32 1.442695, %v1435_v47  ;;  %v1118_v46 = vpop.f32.mrf.mxu1 }
 0x1b6   : > { %v1475_v53 = vsub.f32 0.0, %v5574_v33  ;;  %v2633_v26 = vsel %vm2632_vm8, %v3799_v54, %v2629_v63  ;;  %v1813_v31 = vsel %vm5554_vm1, %v1812_v57, %v1808_v20  ;;  %v2103_v32 = vmul.f32 %v3801_v37, %v2102_v0 }
 0x1b7   : > { %3025 = vst [vmem:[%s5484_s7 + $0x90] sm:$0xff] %v2970_v6  ;;  %3808 = vrcp.f32 %v5596_v56  ;;  %1206 = vmatmul.f32.gmra.mxu1 %v5379_v52  ;;  %v2638_v17 = vsel %vm5561_vm2, %v2637_v59, %v2633_v26  ;;  %v2930_v22 = vmul.f32 %v1813_v31, %v5446_v25  ;;  %v1142_v34 = vpop.f32.mrf.mxu3  ;;  %vm2105_vm9 = vweird.f32 %v5529_v7 }
 0x1b8   : > { %v2985_v23 = vmul.f32 %v2638_v17, %v5454_v2  ;;  %v2104_v24 = vadd.f32 %v3801_v37, %v2103_v32  ;;  %3810 = vpow2.f32 %v1545_v48  ;;  %vm2107_vm10 = vmor %vm2105_vm9, %vm2106_vm6  ;;  %v2112_v27 = vor.u32 1.1754944e-38, %v2111_v35 }
 0x1b9   : > { %v3805_v3 = vpop.eup %3804  ;;  %3009 = vst [vmem:[%s5484_s7 + $0x10] sm:$0xff] %v2930_v22  ;;  %v1625_v18 = vmul.f32 1.442695, %v1475_v53  ;;  %v1420_v52 = vsub.f32 0.0, %v5582_v28  ;;  %v5617_v8 = vadd.f32 %v1130_v9, %v5416_v45  ;;  %vm2110_vm11 = vcmp.eq.f32.partialorder %v2109_v40, 8.507059e+37 }
 0x1ba   : > { %3031 = vst [vmem:[%s5484_s7 + $0xc0] sm:$0xff] %v2985_v23  ;;  %v2108_v25 = vsel %vm2107_vm10, %v3801_v37, %v2104_v24  ;;  %v5622_v2 = vadd.f32 1.0, %v3805_v3  ;;  %v5625_v19 = vadd.f32 %v1142_v34, %v5416_v45  ;;  %v2484_v40 = vand.u32 2147483647, %v5596_v56 }
 0x1bb   : > { %v3807_v15 = vpop.eup %3806  ;;  %v2113_v59 = vsel %vm2110_vm11, %v2112_v27, %v2108_v25  ;;  %3812 = vpow2.f32 %v1625_v18  ;;  %v1515_v54 = vmul.f32 1.442695, %v1420_v52  ;;  %v1460_v30 = vsub.f32 0.0, %v5617_v8 }
 0x1bc   : > { %v2950_v57 = vmul.f32 %v2113_v59, %v5461_v14  ;;  %3814 = vrcp.f32 %v5622_v2  ;;  %v5632_v49 = vadd.f32 1.0, %v3807_v15  ;;  %v2486_v55 = vand.u32 2147483648, %v5596_v56 }
 0x1bd   : > { %v3809_v16 = vpop.eup %3808  ;;  %3816 = vpow2.f32 %v1515_v54  ;;  %v1595_v61 = vmul.f32 1.442695, %v1460_v30  ;;  %v1480_v29 = vsub.f32 0.0, %v5625_v19  ;;  %v2709_v62 = vand.u32 2147483647, %v5622_v2 }
 0x1be   : > { %v2476_v7 = vmul.f32 %v3809_v16, %v5596_v56  ;;  %v3811_v5 = vpop.eup %3810  ;;  %3017 = vst [vmem:[%s5484_s7 + $0x50] sm:$0xff] %v2950_v57  ;;  %v2711_v14 = vand.u32 2147483648, %v5622_v2  ;;  %3818 = vrcp.f32 %v5632_v49  ;;  %vm2480_vm12 = vweird.f32 %v5596_v56 }
 0x1bf   : > { %v5641_v4 = vadd.f32 1.0, %v3811_v5  ;;  %vm2481_vm13 = vweird.f32 %v3809_v16  ;;  %3820 = vpow2.f32 %v1595_v61  ;;  %v1635_v11 = vmul.f32 1.442695, %v1480_v29 }
 0x1c0   : > { %v2477_v35 = vsub.f32 1.0, %v2476_v7  ;;  %vm5643_vm14 = vcmp.eq.f32.partialorder %v2484_v40, 8.507059e+37  ;;  %v2487_v36 = vor.u32 1.1754944e-38, %v2486_v55  ;;  %vm2705_vm15 = vweird.f32 %v5622_v2  ;;  %vm2482_vm1 = vmor %vm2480_vm12, %vm2481_vm13 }
 0x1c1   : > { %v3813_v39 = vpop.eup %3812  ;;  %3822 = vrcp.f32 %v5641_v4  ;;  %vm5650_vm0 = vcmp.eq.f32.partialorder %v2709_v62, 8.507059e+37  ;;  %v2712_v38 = vor.u32 1.1754944e-38, %v2711_v14  ;;  %v1884_v60 = vand.u32 2147483647, %v5632_v49  ;;  %v1357_v14 = vpop.f32.mrf.mxu0 }
 0x1c2   : > { %v2478_v1 = vmul.f32 %v3809_v16, %v2477_v35  ;;  %v3815_v37 = vpop.eup %3814  ;;  %vm1880_vm2 = vweird.f32 %v5632_v49  ;;  %v1886_v10 = vand.u32 2147483648, %v5632_v49  ;;  %v5660_v47 = vadd.f32 1.0, %v3813_v39 }
 0x1c3   : > { %v2701_v43 = vmul.f32 %v3815_v37, %v5622_v2  ;;  %v3817_v58 = vpop.eup %3816  ;;  %3824 = vpow2.f32 %v1635_v11  ;;  %v5663_v6 = vadd.f32 %v1118_v46, %v5416_v45  ;;  %v5668_v53 = vperm.slane %v5411_v44, 4 }
 0x1c4   : > { %v2479_v41 = vadd.f32 %v3809_v16, %v2478_v1  ;;  %v3819_v63 = vpop.eup %3818  ;;  %v5665_v48 = vadd.f32 1.0, %v3817_v58  ;;  %v2184_v31 = vand.u32 2147483647, %v5641_v4  ;;  %v2186_v32 = vand.u32 2147483648, %v5641_v4 }
 0x1c5   : > { %v2702_v20 = vsub.f32 1.0, %v2701_v43  ;;  %v1876_v26 = vmul.f32 %v3819_v63, %v5632_v49  ;;  %v3821_v45 = vpop.eup %3820  ;;  %vm2706_vm3 = vweird.f32 %v3815_v37  ;;  %3826 = vrcp.f32 %v5660_v47 }
 0x1c6   : > { %v2483_v0 = vsel %vm2482_vm1, %v3809_v16, %v2479_v41  ;;  %vm5677_vm4 = vcmp.eq.f32.partialorder %v1884_v60, 8.507059e+37  ;;  %v1887_v24 = vor.u32 1.1754944e-38, %v1886_v10  ;;  %3828 = vrcp.f32 %v5665_v48  ;;  %vm2707_vm6 = vmor %vm2705_vm15, %vm2706_vm3 }
 0x1c7   : > { %v2488_v56 = vsel %vm5643_vm14, %v2487_v36, %v2483_v0  ;;  %v2703_v17 = vmul.f32 %v3815_v37, %v2702_v20  ;;  %v3823_v22 = vpop.eup %3822  ;;  %v1877_v34 = vsub.f32 1.0, %v1876_v26  ;;  %vm2180_vm5 = vweird.f32 %v5641_v4 }
 0x1c8   : > { %v2975_v9 = vmul.f32 %v2488_v56, %v5476_v12  ;;  %v2176_v27 = vmul.f32 %v3823_v22, %v5641_v4  ;;  %v1440_v12 = vsub.f32 0.0, %v5663_v6  ;;  %vm1881_vm7 = vweird.f32 %v3819_v63 }
 0x1c9   : > { %v2704_v3 = vadd.f32 %v3815_v37, %v2703_v17  ;;  %v3825_v18 = vpop.eup %3824  ;;  %v1878_v52 = vmul.f32 %v3819_v63, %v1877_v34  ;;  %vm5688_vm8 = vcmp.eq.f32.partialorder %v2184_v31, 8.507059e+37  ;;  %v2187_v15 = vor.u32 1.1754944e-38, %v2186_v32  ;;  %vm1882_vm10 = vmor %vm1880_vm2, %vm1881_vm7 }
 0x1ca   : > { %3027 = vst [vmem:[%s5484_s7 + $0xa0] sm:$0xff] %v2975_v9  ;;  %v2177_v54 = vsub.f32 1.0, %v2176_v27  ;;  %v2784_v30 = vand.u32 2147483647, %v5660_v47  ;;  %v5693_v16 = vadd.f32 1.0, %v3821_v45  ;;  %vm2181_vm9 = vweird.f32 %v3823_v22 }
 0x1cb   : > { %v2708_v59 = vsel %vm2707_vm6, %v3815_v37, %v2704_v3  ;;  %v1879_v7 = vadd.f32 %v3819_v63, %v1878_v52  ;;  %v2786_v2 = vand.u32 2147483648, %v5660_v47  ;;  %v3827_v40 = vpop.eup %3826  ;;  %v5702_v61 = vadd.f32 1.0, %v3825_v18  ;;  %vm2182_vm13 = vmor %vm2180_vm5, %vm2181_vm9  ;;  %v1162_v18 = vpop.f32.mrf.mxu1 }
 0x1cc   : > { %v2713_v57 = vsel %vm5650_vm0, %v2712_v38, %v2708_v59  ;;  %v2178_v55 = vmul.f32 %v3823_v22, %v2177_v54  ;;  %3830 = vrcp.f32 %v5693_v16  ;;  %v3829_v29 = vpop.eup %3828  ;;  %v2776_v62 = vmul.f32 %v3827_v40, %v5660_v47  ;;  %v1227_v38 = vpop.f32.mrf.mxu2 }
 0x1cd   : > { %v2990_v5 = vmul.f32 %v2713_v57, %v5543_v50  ;;  %v1883_v35 = vsel %vm1882_vm10, %v3819_v63, %v1879_v7  ;;  %vm2780_vm11 = vweird.f32 %v5660_v47  ;;  %vm1955_vm12 = vweird.f32 %v5665_v48  ;;  %v1292_v47 = vpop.f32.mrf.mxu3  ;;  %v1360_v52 = vpop.f32.mrf.mxu0 }
 0x1ce   : > { %v1888_v50 = vsel %vm5677_vm4, %v1887_v24, %v1883_v35  ;;  %v2179_v49 = vadd.f32 %v3823_v22, %v2178_v55  ;;  %v1951_v39 = vmul.f32 %v3829_v29, %v5665_v48  ;;  %v1959_v1 = vand.u32 2147483647, %v5665_v48 }
 0x1cf   : > { %3033 = vst [vmem:[%s5484_s7 + $0xd0] sm:$0xff] %v2990_v5  ;;  %v2935_v11 = vmul.f32 %v1888_v50, %v5515_v13  ;;  %v2777_v46 = vsub.f32 1.0, %v2776_v62  ;;  %vm5716_vm14 = vcmp.eq.f32.partialorder %v2784_v30, 8.507059e+37  ;;  %v1961_v51 = vand.u32 2147483648, %v5665_v48 }
 0x1d0   : > { %v2183_v36 = vsel %vm2182_vm13, %v3823_v22, %v2179_v49  ;;  %v2787_v41 = vor.u32 1.1754944e-38, %v2786_v2  ;;  %v1952_v43 = vsub.f32 1.0, %v1951_v39  ;;  %3832 = vrcp.f32 %v5702_v61 }
 0x1d1   : > { %3011 = vst [vmem:[%s5484_s7 + $0x20] sm:$0xff] %v2935_v11  ;;  %v2188_v13 = vsel %vm5688_vm8, %v2187_v15, %v2183_v36  ;;  %v2778_v42 = vmul.f32 %v3827_v40, %v2777_v46  ;;  %vm2781_vm15 = vweird.f32 %v3827_v40  ;;  %v2559_v4 = vand.u32 2147483647, %v5693_v16 }
 0x1d2   : > { %v3831_v60 = vpop.eup %3830  ;;  %v2955_v58 = vmul.f32 %v2188_v13, %v5571_v21  ;;  %v1953_v10 = vmul.f32 %v3829_v29, %v1952_v43  ;;  %vm1956_vm0 = vweird.f32 %v3829_v29  ;;  %vm5727_vm1 = vcmp.eq.f32.partialorder %v1959_v1, 8.507059e+37  ;;  %vm2782_vm2 = vmor %vm2780_vm11, %vm2781_vm15 }
 0x1d3   : > { %v2779_v0 = vadd.f32 %v3827_v40, %v2778_v42  ;;  %v1962_v20 = vor.u32 1.1754944e-38, %v1961_v51  ;;  %v2551_v56 = vmul.f32 %v3831_v60, %v5693_v16  ;;  %v1555_v26 = vmul.f32 1.442695, %v1440_v12  ;;  %vm1957_vm4 = vmor %vm1955_vm12, %vm1956_vm0  ;;  %v1165_v63 = vpop.f32.mrf.mxu1 }
 0x1d4   : > { %3019 = vst [vmem:[%s5484_s7 + $0x60] sm:$0xff] %v2955_v58  ;;  %v1954_v31 = vadd.f32 %v3829_v29, %v1953_v10  ;;  %vm2555_vm3 = vweird.f32 %v5693_v16  ;;  %v2561_v21 = vand.u32 2147483648, %v5693_v16  ;;  %v5738_v32 = vadd.f32 %v1357_v14, %v5668_v53  ;;  %v1230_v16 = vpop.f32.mrf.mxu2  ;;  %v3006_v58 = vld [vmem:[%s7385_s5] sm:$0x3] }
 0x1d5   : > { %v2783_v45 = vsel %vm2782_vm2, %v3827_v40, %v2779_v0  ;;  %v2552_v9 = vsub.f32 1.0, %v2551_v56  ;;  %vm5742_vm5 = vcmp.eq.f32.partialorder %v2559_v4, 8.507059e+37  ;;  %vm2855_vm6 = vweird.f32 %v5702_v61  ;;  %v1295_v43 = vpop.f32.mrf.mxu3 }
 0x1d6   : > { %3834 = vpow2.f32 %v1555_v26  ;;  %v3833_v22 = vpop.eup %3832  ;;  %v2788_v34 = vsel %vm5716_vm14, %v2787_v41, %v2783_v45  ;;  %v1958_v23 = vsel %vm1957_vm4, %v3829_v29, %v1954_v31  ;;  %vm2556_vm7 = vweird.f32 %v3831_v60 }
 0x1d7   : > { %v1409_v24 = vsub.f32 0.0, %v5738_v32  ;;  %v2995_v48 = vmul.f32 %v2788_v34, %v5574_v33  ;;  %v1963_v3 = vsel %vm5727_vm1, %v1962_v20, %v1958_v23  ;;  %v2553_v27 = vmul.f32 %v3831_v60, %v2552_v9  ;;  %vm2557_vm8 = vmor %vm2555_vm3, %vm2556_vm7 }
 0x1d8   : > { %v2851_v12 = vmul.f32 %v3833_v22, %v5702_v61  ;;  %v2940_v25 = vmul.f32 %v1963_v3, %v5582_v28  ;;  %v2562_v15 = vor.u32 1.1754944e-38, %v2561_v21  ;;  %v2859_v59 = vand.u32 2147483647, %v5702_v61  ;;  %v1363_v3 = vpop.f32.mrf.mxu0 }
 0x1d9   : > { %v1493_v54 = vmul.f32 1.442695, %v1409_v24  ;;  %3035 = vst [vmem:[%s5484_s7 + $0xe0] sm:$0xff] %v2995_v48  ;;  %v2554_v30 = vadd.f32 %v3831_v60, %v2553_v27  ;;  %v2861_v7 = vand.u32 2147483648, %v5702_v61  ;;  %v5759_v33 = vperm.slane %v5411_v44, 2 }
 0x1da   : > { %v2852_v57 = vsub.f32 1.0, %v2851_v12  ;;  %3013 = vst [vmem:[%s5484_s7 + $0x30] sm:$0xff] %v2940_v25  ;;  %v5766_v28 = vperm.slane %v5411_v44, 3  ;;  %v5769_v2 = vperm.slane %v5411_v44, 1  ;;  %v5772_v40 = vadd.f32 %v1360_v52, %v5668_v53  ;;  %v3005_v61 = vld [vmem:[%s7475_s4] sm:$0x3] }
 0x1db   : > { %3836 = vpow2.f32 %v1493_v54  ;;  %v2558_v55 = vsel %vm2557_vm8, %v3831_v60, %v2554_v30  ;;  %vm2856_vm9 = vweird.f32 %v3833_v22  ;;  %v5775_v35 = vadd.f32 %v1227_v38, %v5759_v33 }
 0x1dc   : > { %v3835_v5 = vpop.eup %3834  ;;  %v2853_v29 = vmul.f32 %v3833_v22, %v2852_v57  ;;  %v2563_v62 = vsel %vm5742_vm5, %v2562_v15, %v2558_v55  ;;  %v5782_v44 = vadd.f32 %v1292_v47, %v5766_v28  ;;  %v5785_v50 = vadd.f32 %v1162_v18, %v5769_v2  ;;  %vm2857_vm10 = vmor %vm2855_vm6, %vm2856_vm9  ;;  %v1233_v30 = vpop.f32.mrf.mxu2 }
 0x1dd   : > { %v5779_v14 = vadd.f32 1.0, %v3835_v5  ;;  %v2980_v49 = vmul.f32 %v2563_v62, %v5617_v8  ;;  %v1407_v1 = vsub.f32 0.0, %v5775_v35  ;;  %v1414_v11 = vsub.f32 0.0, %v5772_v40 }
 0x1de   : > { %v2854_v39 = vadd.f32 %v3833_v22, %v2853_v29  ;;  %vm2860_vm11 = vcmp.eq.f32.partialorder %v2859_v59, 8.507059e+37  ;;  %v2862_v46 = vor.u32 1.1754944e-38, %v2861_v7  ;;  %v5794_v37 = vadd.f32 %v1230_v16, %v5759_v33  ;;  %v1298_v29 = vpop.f32.mrf.mxu3 }
 0x1df   : > { %3838 = vrcp.f32 %v5779_v14  ;;  %3029 = vst [vmem:[%s5484_s7 + $0xb0] sm:$0xff] %v2980_v49  ;;  %v1489_v36 = vmul.f32 1.442695, %v1407_v1  ;;  %v1408_v8 = vsub.f32 0.0, %v5782_v44  ;;  %v1406_v41 = vsub.f32 0.0, %v5785_v50 }
 0x1e0   : > { %v2858_v51 = vsel %vm2857_vm10, %v3833_v22, %v2854_v39  ;;  %v1503_v4 = vmul.f32 1.442695, %v1414_v11  ;;  %v1412_v20 = vsub.f32 0.0, %v5794_v37  ;;  %v5810_v56 = vadd.f32 %v1295_v43, %v5766_v28 }
 0x1e1   : > { %v3837_v13 = vpop.eup %3836  ;;  %v2863_v42 = vsel %vm2860_vm11, %v2862_v46, %v2858_v51  ;;  %3840 = vpow2.f32 %v1489_v36  ;;  %v1491_v10 = vmul.f32 1.442695, %v1408_v8  ;;  %v1487_v0 = vmul.f32 1.442695, %v1406_v41 }
 0x1e2   : > { %v3000_v38 = vmul.f32 %v2863_v42, %v5625_v19  ;;  %v5803_v60 = vadd.f32 1.0, %v3837_v13  ;;  %3842 = vpow2.f32 %v1503_v4  ;;  %v2259_v26 = vand.u32 2147483647, %v5779_v14 }
 0x1e3   : > { %v2261_v19 = vand.u32 2147483648, %v5779_v14  ;;  %v5816_v31 = vperm.slane %v3005_v61, 0  ;;  %v5818_v45 = vperm.slane %v3006_v58, 0  ;;  %v1413_v9 = vsub.f32 0.0, %v5810_v56 }
 0x1e4   : > { %3037 = vst [vmem:[%s5484_s7 + $0xf0] sm:$0xff] %v3000_v38  ;;  %3844 = vrcp.f32 %v5803_v60  ;;  %v5822_v17 = vadd.f32 %v1165_v63, %v5769_v2  ;;  %v5825_v22 = vperm.slane %v3005_v61, 1  ;;  %v5827_v34 = vperm.slane %v3006_v58, 1 }
 0x1e5   : > { %v3839_v21 = vpop.eup %3838  ;;  %3846 = vpow2.f32 %v1491_v10  ;;  %v1499_v23 = vmul.f32 1.442695, %v1412_v20  ;;  %vm2255_vm12 = vweird.f32 %v5779_v14  ;;  %v1794_v24 = vand.u32 2147483647, %v5803_v60 }
 0x1e6   : > { %v2251_v47 = vmul.f32 %v3839_v21, %v5779_v14  ;;  %v1796_v48 = vand.u32 2147483648, %v5803_v60  ;;  %3848 = vpow2.f32 %v1487_v0  ;;  %vm5832_vm13 = vcmp.eq.f32.partialorder %v2259_v26, 8.507059e+37 }
 0x1e7   : > { %v3841_v27 = vpop.eup %3840  ;;  %v2262_v52 = vor.u32 1.1754944e-38, %v2261_v19  ;;  %v1501_v25 = vmul.f32 1.442695, %v1413_v9  ;;  %vm2256_vm14 = vweird.f32 %v3839_v21  ;;  %vm1790_vm15 = vweird.f32 %v5803_v60 }
 0x1e8   : > { %v2252_v12 = vsub.f32 1.0, %v2251_v47  ;;  %v3843_v15 = vpop.eup %3842  ;;  %v5837_v59 = vadd.f32 1.0, %v3841_v27  ;;  %v1411_v54 = vsub.f32 0.0, %v5822_v17  ;;  %3850 = vpow2.f32 %v1499_v23  ;;  %vm2257_vm1 = vmor %vm2255_vm12, %vm2256_vm14 }
 0x1e9   : > { %v5840_v5 = vadd.f32 1.0, %v3843_v15  ;;  %v5843_v55 = vadd.f32 %v1363_v3, %v5668_v53  ;;  %vm5846_vm0 = vcmp.eq.f32.partialorder %v1794_v24, 8.507059e+37  ;;  %v1797_v39 = vor.u32 1.1754944e-38, %v1796_v48 }
 0x1ea   : > { %v3845_v57 = vpop.eup %3844  ;;  %v2253_v7 = vmul.f32 %v3839_v21, %v2252_v12  ;;  %3852 = vrcp.f32 %v5837_v59  ;;  %v5854_v46 = vadd.f32 %v1233_v30, %v5759_v33  ;;  %v5860_v8 = vmul.f32 1.442695, %v1411_v54 }
 0x1eb   : > { %v3847_v16 = vpop.eup %3846  ;;  %v1786_v62 = vmul.f32 %v3845_v57, %v5803_v60  ;;  %3854 = vpow2.f32 %v1501_v25  ;;  %v5863_v41 = vadd.f32 %v1298_v29, %v5766_v28  ;;  %v1764_v13 = vand.u32 2147483647, %v5837_v59 }
 0x1ec   : > { %v2254_v1 = vadd.f32 %v3839_v21, %v2253_v7  ;;  %v5851_v11 = vadd.f32 1.0, %v3847_v16  ;;  %v3849_v51 = vpop.eup %3848  ;;  %3856 = vrcp.f32 %v5840_v5  ;;  %v1419_v42 = vsub.f32 0.0, %v5843_v55 }
 0x1ed   : > { %v1787_v36 = vsub.f32 1.0, %v1786_v62  ;;  %vm1791_vm2 = vweird.f32 %v3845_v57  ;;  %v1766_v4 = vand.u32 2147483648, %v5837_v59  ;;  %v5872_v10 = vadd.f32 1.0, %v3849_v51 }
 0x1ee   : > { %v2258_v43 = vsel %vm2257_vm1, %v3839_v21, %v2254_v1  ;;  %3858 = vrcp.f32 %v5851_v11  ;;  %v3851_v38 = vpop.eup %3850  ;;  %v1869_v63 = vand.u32 2147483647, %v5840_v5  ;;  %v1417_v0 = vsub.f32 0.0, %v5854_v46  ;;  %vm1792_vm4 = vmor %vm1790_vm15, %vm1791_vm2 }
 0x1ef   : > { %v2263_v14 = vsel %vm5832_vm13, %v2262_v52, %v2258_v43  ;;  %v1788_v61 = vmul.f32 %v3845_v57, %v1787_v36  ;;  %vm1760_vm3 = vweird.f32 %v5837_v59  ;;  %v1779_v19 = vand.u32 2147483647, %v5851_v11 }
 0x1f0   : > { %v2960_v58 = vmul.f32 %v2263_v14, %v5663_v6  ;;  %v3853_v20 = vpop.eup %3852  ;;  %v1418_v21 = vsub.f32 0.0, %v5863_v41  ;;  %vm5883_vm5 = vcmp.eq.f32.partialorder %v1764_v13, 8.507059e+37  ;;  %v1781_v23 = vand.u32 2147483648, %v5851_v11 }
 0x1f1   : > { %v1789_v26 = vadd.f32 %v3845_v57, %v1788_v61  ;;  %v3855_v9 = vpop.eup %3854  ;;  %v1756_v6 = vmul.f32 %v3853_v20, %v5837_v59  ;;  %3860 = vrcp.f32 %v5872_v10  ;;  %vm1865_vm6 = vweird.f32 %v5840_v5 }
 0x1f2   : > { %3021 = vst [vmem:[%s5484_s7 + $0x70] sm:$0xff] %v2960_v58  ;;  %v3857_v24 = vpop.eup %3856  ;;  %v1767_v3 = vor.u32 1.1754944e-38, %v1766_v4  ;;  %vm1775_vm7 = vweird.f32 %v5851_v11  ;;  %v5891_v27 = vadd.f32 1.0, %v3851_v38  ;;  %vm5896_vm8 = vcmp.eq.f32.partialorder %v1869_v63, 8.507059e+37 }
 0x1f3   : > { %v1793_v48 = vsel %vm1792_vm4, %v3845_v57, %v1789_v26  ;;  %v1757_v18 = vsub.f32 1.0, %v1756_v6  ;;  %v1861_v52 = vmul.f32 %v3857_v24, %v5840_v5  ;;  %vm1761_vm9 = vweird.f32 %v3853_v20 }
 0x1f4   : > { %v3859_v60 = vpop.eup %3858  ;;  %v1798_v12 = vsel %vm5846_vm0, %v1797_v39, %v1793_v48  ;;  %vm5902_vm10 = vcmp.eq.f32.partialorder %v1779_v19, 8.507059e+37  ;;  %v1871_v57 = vand.u32 2147483648, %v5840_v5  ;;  %v1782_v29 = vor.u32 1.1754944e-38, %v1781_v23  ;;  %vm1762_vm14 = vmor %vm1760_vm3, %vm1761_vm9 }
 0x1f5   : > { %v2929_v15 = vmul.f32 %v1798_v12, %v5738_v32  ;;  %v1771_v54 = vmul.f32 %v3859_v60, %v5851_v11  ;;  %v1758_v7 = vmul.f32 %v3853_v20, %v1757_v18  ;;  %v1749_v16 = vand.u32 2147483647, %v5872_v10 }
 0x1f6   : > { %v1862_v62 = vsub.f32 1.0, %v1861_v52  ;;  %vm1745_vm11 = vweird.f32 %v5872_v10  ;;  %3862 = vrcp.f32 %v5891_v27  ;;  %vm1776_vm12 = vweird.f32 %v3859_v60 }
 0x1f7   : > { %v3072_v49 = vmul.f32 %v5816_v31, %v2929_v15  ;;  %v3122_v39 = vmul.f32 %v5825_v22, %v2929_v15  ;;  %v1772_v1 = vsub.f32 1.0, %v1771_v54  ;;  %v3861_v32 = vpop.eup %3860  ;;  %v1759_v51 = vadd.f32 %v3853_v20, %v1758_v7  ;;  %vm1777_vm1 = vmor %vm1775_vm7, %vm1776_vm12  ;;  %v1168_v54 = vpop.f32.mrf.mxu1 }
 0x1f8   : > { %v1863_v36 = vmul.f32 %v3857_v24, %v1862_v62  ;;  %vm1866_vm13 = vweird.f32 %v3857_v24  ;;  %v1741_v61 = vmul.f32 %v3861_v32, %v5872_v10  ;;  %vm5918_vm15 = vcmp.eq.f32.partialorder %v1749_v16, 8.507059e+37 }
 0x1f9   : > { %v3089_v43 = vadd.f32 %v5818_v45, %v3072_v49  ;;  %v3139_v13 = vadd.f32 %v5827_v34, %v3122_v39  ;;  %v1773_v14 = vmul.f32 %v3859_v60, %v1772_v1  ;;  %v1763_v4 = vsel %vm1762_vm14, %v3853_v20, %v1759_v51  ;;  %vm1867_vm0 = vmor %vm1865_vm6, %vm1866_vm13  ;;  %v1236_v51 = vpop.f32.mrf.mxu2 }
 0x1fa   : > { %v1751_v58 = vand.u32 2147483648, %v5872_v10  ;;  %v1864_v63 = vadd.f32 %v3857_v24, %v1863_v36  ;;  %v1768_v26 = vsel %vm5883_vm5, %v1767_v3, %v1763_v4  ;;  %v1742_v19 = vsub.f32 1.0, %v1741_v61 }
 0x1fb   : > { %3105 = vst [vmem:[%s5924_s2] sm:$0xff] %v3089_v43  ;;  %v1774_v59 = vadd.f32 %v3859_v60, %v1773_v14  ;;  %v1872_v20 = vor.u32 1.1754944e-38, %v1871_v57  ;;  %v2927_v6 = vmul.f32 %v1768_v26, %v5775_v35  ;;  %v5940_v23 = vadd.f32 1.0, %v3855_v9 }
 0x1fc   : > { %3155 = vst [vmem:[%s5933_s20] sm:$0xff] %v3139_v13  ;;  %v1868_v47 = vsel %vm1867_vm0, %v3857_v24, %v1864_v63  ;;  %3864 = vpow2.f32 %v5860_v8  ;;  %v3863_v48 = vpop.eup %3862  ;;  %v1743_v5 = vmul.f32 %v3861_v32, %v1742_v19  ;;  %vm1746_vm2 = vweird.f32 %v3861_v32 }
 0x1fd   : > { %v1778_v3 = vsel %vm1777_vm1, %v3859_v60, %v1774_v59  ;;  %v1873_v12 = vsel %vm5896_vm8, %v1872_v20, %v1868_v47  ;;  %3039 = vst [vmem:[%s5947_s29] sm:$0xff] %v2927_v6  ;;  %v1752_v11 = vor.u32 1.1754944e-38, %v1751_v58  ;;  %v1831_v8 = vmul.f32 %v3863_v48, %v5891_v27  ;;  %vm1747_vm3 = vmor %vm1745_vm11, %vm1746_vm2  ;;  %v1301_v47 = vpop.f32.mrf.mxu3 }
 0x1fe   : > { %v1783_v35 = vsel %vm5902_vm10, %v1782_v29, %v1778_v3  ;;  %v2934_v9 = vmul.f32 %v1873_v12, %v5772_v40  ;;  %v1744_v60 = vadd.f32 %v3861_v32, %v1743_v5  ;;  %v1839_v18 = vand.u32 2147483647, %v5891_v27 }
 0x1ff   : > { %v2928_v24 = vmul.f32 %v1783_v35, %v5782_v44  ;;  %3866 = vrcp.f32 %v5940_v23  ;;  %v1832_v15 = vsub.f32 1.0, %v1831_v8  ;;  %v1841_v40 = vand.u32 2147483648, %v5891_v27 }
 0x200   : > { %v3073_v52 = vmul.f32 %v5816_v31, %v2934_v9  ;;  %v3123_v25 = vmul.f32 %v5825_v22, %v2934_v9  ;;  %v1748_v30 = vsel %vm1747_vm3, %v3861_v32, %v1744_v60  ;;  %vm1836_vm4 = vweird.f32 %v3863_v48  ;;  %v1366_v32 = vpop.f32.mrf.mxu0 }
 0x201   : > { %3040 = vst [vmem:[%s5947_s29 + $0x8] sm:$0xff] %v2928_v24  ;;  %v1513_v44 = vmul.f32 1.442695, %v1419_v42  ;;  %v1509_v57 = vmul.f32 1.442695, %v1417_v0  ;;  %v1753_v7 = vsel %vm5918_vm15, %v1752_v11, %v1748_v30  ;;  %v1833_v62 = vmul.f32 %v3863_v48, %v1832_v15 }
 0x202   : > { %v3865_v10 = vpop.eup %3864  ;;  %v3090_v29 = vadd.f32 %v5818_v45, %v3073_v52  ;;  %v3140_v16 = vadd.f32 %v5827_v34, %v3123_v25  ;;  %v2926_v49 = vmul.f32 %v1753_v7, %v5785_v50  ;;  %vm1835_vm5 = vweird.f32 %v5891_v27 }
 0x203   : > { %v5973_v39 = vadd.f32 1.0, %v3865_v10  ;;  %v1834_v42 = vadd.f32 %v3863_v48, %v1833_v62  ;;  %3868 = vpow2.f32 %v1513_v44  ;;  %v1511_v0 = vmul.f32 1.442695, %v1418_v21  ;;  %vm1837_vm6 = vmor %vm1835_vm5, %vm1836_vm4 }
 0x204   : > { %3106 = vst [vmem:[%s5924_s2 + $0x8] sm:$0xff] %v3090_v29  ;;  %v5979_v1 = vadd.f32 %v1168_v54, %v5769_v2  ;;  %vm1840_vm7 = vcmp.eq.f32.partialorder %v1839_v18, 8.507059e+37  ;;  %v1842_v50 = vor.u32 1.1754944e-38, %v1841_v40  ;;  %v1854_v27 = vand.u32 2147483647, %v5940_v23 }
 0x205   : > { %v3867_v36 = vpop.eup %3866  ;;  %3008 = vst [vmem:[%s5484_s7 + $0x8] sm:$0xff] %v2926_v49  ;;  %3870 = vrcp.f32 %v5973_v39  ;;  %v1838_v43 = vsel %vm1837_vm6, %v3863_v48, %v1834_v42  ;;  %v1856_v13 = vand.u32 2147483648, %v5940_v23  ;;  %v1824_v61 = vand.u32 2147483647, %v5973_v39  ;;  %v1171_v48 = vpop.f32.mrf.mxu1 }
 0x206   : > { %3156 = vst [vmem:[%s5933_s20 + $0x8] sm:$0xff] %v3140_v16  ;;  %v1846_v21 = vmul.f32 %v3867_v36, %v5940_v23  ;;  %3872 = vpow2.f32 %v1509_v57  ;;  %v1843_v14 = vsel %vm1840_vm7, %v1842_v50, %v1838_v43  ;;  %v1416_v58 = vsub.f32 0.0, %v5979_v1 }
 0x207   : > { %3874 = vpow2.f32 %v1511_v0  ;;  %v2932_v4 = vmul.f32 %v1843_v14, %v5794_v37  ;;  %v5992_v63 = vadd.f32 %v1366_v32, %v5668_v53  ;;  %vm1850_vm8 = vweird.f32 %v5940_v23  ;;  %v1239_v23 = vpop.f32.mrf.mxu2 }
 0x208   : > { %v1847_v38 = vsub.f32 1.0, %v1846_v21  ;;  %vm5995_vm9 = vcmp.eq.f32.partialorder %v1854_v27, 8.507059e+37  ;;  %v6000_v59 = vadd.f32 %v1236_v51, %v5759_v33  ;;  %vm1851_vm10 = vweird.f32 %v3867_v36  ;;  %v1369_v44 = vpop.f32.mrf.mxu0 }
 0x209   : > { %v3869_v19 = vpop.eup %3868  ;;  %3041 = vst [vmem:[%s5947_s29 + $0x10] sm:$0xff] %v2932_v4  ;;  %v1857_v37 = vor.u32 1.1754944e-38, %v1856_v13  ;;  %v1507_v6 = vmul.f32 1.442695, %v1416_v58  ;;  %vm1820_vm11 = vweird.f32 %v5973_v39  ;;  %v1826_v5 = vand.u32 2147483648, %v5973_v39  ;;  %vm1852_vm13 = vmor %vm1850_vm8, %vm1851_vm10 }
 0x20a   : > { %v1848_v20 = vmul.f32 %v3867_v36, %v1847_v38  ;;  %v6005_v12 = vadd.f32 1.0, %v3869_v19  ;;  %v1424_v35 = vsub.f32 0.0, %v5992_v63  ;;  %vm6009_vm12 = vcmp.eq.f32.partialorder %v1824_v61, 8.507059e+37 }
 0x20b   : > { %v3871_v3 = vpop.eup %3870  ;;  %3876 = vpow2.f32 %v1507_v6  ;;  %v1422_v18 = vsub.f32 0.0, %v6000_v59  ;;  %v6019_v52 = vadd.f32 %v1301_v47, %v5766_v28  ;;  %v6022_v25 = vadd.f32 %v1171_v48, %v5769_v2 }
 0x20c   : > { %v3873_v11 = vpop.eup %3872  ;;  %v1849_v9 = vadd.f32 %v3867_v36, %v1848_v20  ;;  %v1816_v8 = vmul.f32 %v3871_v3, %v5973_v39  ;;  %3878 = vrcp.f32 %v6005_v12  ;;  %vm1821_vm14 = vweird.f32 %v3871_v3 }
 0x20d   : > { %v3875_v60 = vpop.eup %3874  ;;  %v6024_v54 = vadd.f32 1.0, %v3873_v11  ;;  %v1944_v10 = vand.u32 2147483647, %v6005_v12  ;;  %v1523_v7 = vmul.f32 1.442695, %v1424_v35  ;;  %v1946_v62 = vand.u32 2147483648, %v6005_v12  ;;  %vm1822_vm15 = vmor %vm1820_vm11, %vm1821_vm14 }
 0x20e   : > { %v1853_v15 = vsel %vm1852_vm13, %v3867_v36, %v1849_v9  ;;  %v1817_v40 = vsub.f32 1.0, %v1816_v8  ;;  %v6026_v30 = vadd.f32 1.0, %v3875_v60  ;;  %v1827_v49 = vor.u32 1.1754944e-38, %v1826_v5 }
 0x20f   : > { %v1858_v57 = vsel %vm5995_vm9, %v1857_v37, %v1853_v15  ;;  %3880 = vrcp.f32 %v6024_v54  ;;  %v6036_v42 = vadd.f32 %v1369_v44, %v5668_v53  ;;  %v6039_v0 = vadd.f32 %v1239_v23, %v5759_v33 }
 0x210   : > { %v2933_v29 = vmul.f32 %v1858_v57, %v5810_v56  ;;  %v1818_v16 = vmul.f32 %v3871_v3, %v1817_v40  ;;  %3882 = vrcp.f32 %v6026_v30  ;;  %v1423_v56 = vsub.f32 0.0, %v6019_v52 }
 0x211   : > { %v3877_v32 = vpop.eup %3876  ;;  %3884 = vpow2.f32 %v1523_v7  ;;  %v1421_v36 = vsub.f32 0.0, %v6022_v25  ;;  %vm1940_vm0 = vweird.f32 %v6005_v12  ;;  %v1914_v27 = vand.u32 2147483647, %v6024_v54 }
 0x212   : > { %3042 = vst [vmem:[%s5947_s29 + $0x18] sm:$0xff] %v2933_v29  ;;  %v1819_v51 = vadd.f32 %v3871_v3, %v1818_v16  ;;  %v3879_v50 = vpop.eup %3878  ;;  %v6049_v43 = vadd.f32 1.0, %v3877_v32  ;;  %v1519_v21 = vmul.f32 1.442695, %v1422_v18  ;;  %vm6052_vm1 = vcmp.eq.f32.partialorder %v1944_v10, 8.507059e+37 }
 0x213   : > { %v1936_v14 = vmul.f32 %v3879_v50, %v6005_v12  ;;  %v1947_v4 = vor.u32 1.1754944e-38, %v1946_v62  ;;  %v1916_v38 = vand.u32 2147483648, %v6024_v54  ;;  %v1929_v58 = vand.u32 2147483647, %v6026_v30 }
 0x214   : > { %v1823_v13 = vsel %vm1822_vm15, %v3871_v3, %v1819_v51  ;;  %v1931_v26 = vand.u32 2147483648, %v6026_v30  ;;  %3886 = vrcp.f32 %v6049_v43  ;;  %vm1910_vm2 = vweird.f32 %v6024_v54 }
 0x215   : > { %v1828_v39 = vsel %vm6009_vm12, %v1827_v49, %v1823_v13  ;;  %v3881_v19 = vpop.eup %3880  ;;  %v1937_v37 = vsub.f32 1.0, %v1936_v14  ;;  %vm1925_vm3 = vweird.f32 %v6026_v30  ;;  %vm6066_vm4 = vcmp.eq.f32.partialorder %v1914_v27, 8.507059e+37 }
 0x216   : > { %v2931_v20 = vmul.f32 %v1828_v39, %v5822_v17  ;;  %v3883_v6 = vpop.eup %3882  ;;  %v1906_v47 = vmul.f32 %v3881_v19, %v6024_v54  ;;  %3888 = vpow2.f32 %v1519_v21  ;;  %v1521_v3 = vmul.f32 1.442695, %v1423_v56 }
 0x217   : > { %v3885_v5 = vpop.eup %3884  ;;  %v1938_v35 = vmul.f32 %v3879_v50, %v1937_v37  ;;  %vm1941_vm5 = vweird.f32 %v3879_v50  ;;  %v1917_v11 = vor.u32 1.1754944e-38, %v1916_v38  ;;  %v1921_v17 = vmul.f32 %v3883_v6, %v6026_v30  ;;  %v1304_v37 = vpop.f32.mrf.mxu3 }
 0x218   : > { %3010 = vst [vmem:[%s5484_s7 + $0x18] sm:$0xff] %v2931_v20  ;;  %v1907_v9 = vsub.f32 1.0, %v1906_v47  ;;  %vm6072_vm6 = vcmp.eq.f32.partialorder %v1929_v58, 8.507059e+37  ;;  %v1932_v24 = vor.u32 1.1754944e-38, %v1931_v26  ;;  %v6076_v60 = vadd.f32 1.0, %v3885_v5  ;;  %vm1942_vm8 = vmor %vm1940_vm0, %vm1941_vm5 }
 0x219   : > { %v1939_v18 = vadd.f32 %v3879_v50, %v1938_v35  ;;  %vm1911_vm7 = vweird.f32 %v3881_v19  ;;  %v1922_v15 = vsub.f32 1.0, %v1921_v17  ;;  %3890 = vpow2.f32 %v1521_v3 }
 0x21a   : > { %v3887_v40 = vpop.eup %3886  ;;  %v1908_v44 = vmul.f32 %v3881_v19, %v1907_v9  ;;  %vm1895_vm9 = vweird.f32 %v6049_v43  ;;  %3892 = vrcp.f32 %v6076_v60  ;;  %v1517_v23 = vmul.f32 1.442695, %v1421_v36  ;;  %vm1912_vm11 = vmor %vm1910_vm2, %vm1911_vm7 }
 0x21b   : > { %v1429_v57 = vsub.f32 0.0, %v6036_v42  ;;  %v1943_v10 = vsel %vm1942_vm8, %v3879_v50, %v1939_v18  ;;  %v1923_v7 = vmul.f32 %v3883_v6, %v1922_v15  ;;  %vm1926_vm10 = vweird.f32 %v3883_v6 }
 0x21c   : > { %v1891_v29 = vmul.f32 %v3887_v40, %v6049_v43  ;;  %v3889_v16 = vpop.eup %3888  ;;  %v1948_v62 = vsel %vm6052_vm1, %v1947_v4, %v1943_v10  ;;  %v1909_v49 = vadd.f32 %v3881_v19, %v1908_v44  ;;  %v1899_v12 = vand.u32 2147483647, %v6049_v43  ;;  %vm1927_vm12 = vmor %vm1925_vm3, %vm1926_vm10 }
 0x21d   : > { %v1901_v32 = vand.u32 2147483648, %v6049_v43  ;;  %v2939_v51 = vmul.f32 %v1948_v62, %v5843_v55  ;;  %v1924_v56 = vadd.f32 %v3883_v6, %v1923_v7  ;;  %v6092_v50 = vadd.f32 1.0, %v3889_v16 }
 0x21e   : > { %v1892_v36 = vsub.f32 1.0, %v1891_v29  ;;  %v1913_v27 = vsel %vm1912_vm11, %v3881_v19, %v1909_v49  ;;  %vm1896_vm13 = vweird.f32 %v3887_v40  ;;  %3894 = vpow2.f32 %v1517_v23 }
 0x21f   : > { %v1533_v21 = vmul.f32 1.442695, %v1429_v57  ;;  %v3891_v13 = vpop.eup %3890  ;;  %v3074_v14 = vmul.f32 %v5816_v31, %v2939_v51  ;;  %v3124_v55 = vmul.f32 %v5825_v22, %v2939_v51  ;;  %v1918_v54 = vsel %vm6066_vm4, %v1917_v11, %v1913_v27  ;;  %vm1897_vm15 = vmor %vm1895_vm9, %vm1896_vm13 }
 0x220   : > { %v1928_v61 = vsel %vm1927_vm12, %v3883_v6, %v1924_v56  ;;  %v3893_v4 = vpop.eup %3892  ;;  %v2937_v38 = vmul.f32 %v1918_v54, %v5854_v46  ;;  %v1893_v39 = vmul.f32 %v3887_v40, %v1892_v36  ;;  %3896 = vrcp.f32 %v6092_v50  ;;  %v1174_v54 = vpop.f32.mrf.mxu1 }
 0x221   : > { %v1933_v30 = vsel %vm6072_vm6, %v1932_v24, %v1928_v61  ;;  %v3091_v58 = vadd.f32 %v5818_v45, %v3074_v14  ;;  %v3141_v26 = vadd.f32 %v5827_v34, %v3124_v55  ;;  %v2011_v20 = vmul.f32 %v3893_v4, %v6076_v60 }
 0x222   : > { %v2938_v19 = vmul.f32 %v1933_v30, %v5863_v41  ;;  %3043 = vst [vmem:[%s5947_s29 + $0x20] sm:$0xff] %v2937_v38  ;;  %v1894_v6 = vadd.f32 %v3887_v40, %v1893_v39  ;;  %vm6109_vm14 = vcmp.eq.f32.partialorder %v1899_v12, 8.507059e+37  ;;  %v1902_v47 = vor.u32 1.1754944e-38, %v1901_v32 }
 0x223   : > { %v2019_v48 = vand.u32 2147483647, %v6076_v60  ;;  %3107 = vst [vmem:[%s5924_s2 + $0x10] sm:$0xff] %v3091_v58  ;;  %v2012_v3 = vsub.f32 1.0, %v2011_v20  ;;  %v2021_v41 = vand.u32 2147483648, %v6076_v60  ;;  %v6119_v5 = vadd.f32 1.0, %v3891_v13 }
 0x224   : > { %3898 = vpow2.f32 %v1533_v21  ;;  %v3895_v35 = vpop.eup %3894  ;;  %3157 = vst [vmem:[%s5933_s20 + $0x10] sm:$0xff] %v3141_v26  ;;  %v1898_v11 = vsel %vm1897_vm15, %v3887_v40, %v1894_v6  ;;  %vm2016_vm0 = vweird.f32 %v3893_v4  ;;  %v1427_v17 = vsub.f32 0.0, %v6039_v0 }
 0x225   : > { %v6124_v9 = vadd.f32 %v1304_v37, %v5766_v28  ;;  %3044 = vst [vmem:[%s5947_s29 + $0x28] sm:$0xff] %v2938_v19  ;;  %v1903_v43 = vsel %vm6109_vm14, %v1902_v47, %v1898_v11  ;;  %v2013_v8 = vmul.f32 %v3893_v4, %v2012_v3  ;;  %v1989_v24 = vand.u32 2147483647, %v6092_v50  ;;  %v1372_v47 = vpop.f32.mrf.mxu0  ;;  %v1242_v11 = vpop.f32.mrf.mxu2 }
 0x226   : > { %3900 = vrcp.f32 %v6119_v5  ;;  %v3897_v18 = vpop.eup %3896  ;;  %v2936_v15 = vmul.f32 %v1903_v43, %v5979_v1  ;;  %vm2015_vm1 = vweird.f32 %v6076_v60  ;;  %vm6133_vm2 = vcmp.eq.f32.partialorder %v2019_v48, 8.507059e+37 }
 0x227   : > { %v2014_v44 = vadd.f32 %v3893_v4, %v2013_v8  ;;  %v2022_v23 = vor.u32 1.1754944e-38, %v2021_v41  ;;  %v1981_v57 = vmul.f32 %v3897_v18, %v6092_v50  ;;  %v6138_v10 = vadd.f32 1.0, %v3895_v35  ;;  %vm2017_vm3 = vmor %vm2015_vm1, %vm2016_vm0 }
 0x228   : > { %3012 = vst [vmem:[%s5484_s7 + $0x28] sm:$0xff] %v2936_v15  ;;  %vm1985_vm4 = vweird.f32 %v6092_v50  ;;  %v1991_v7 = vand.u32 2147483648, %v6092_v50  ;;  %v1529_v1 = vmul.f32 1.442695, %v1427_v17  ;;  %v1428_v60 = vsub.f32 0.0, %v6124_v9 }
 0x229   : > { %v2018_v16 = vsel %vm2017_vm3, %v3893_v4, %v2014_v44  ;;  %v1982_v62 = vsub.f32 1.0, %v1981_v57  ;;  %vm6145_vm5 = vcmp.eq.f32.partialorder %v1989_v24, 8.507059e+37  ;;  %3902 = vrcp.f32 %v6138_v10 }
 0x22a   : > { %v3899_v29 = vpop.eup %3898  ;;  %v2023_v12 = vsel %vm6133_vm2, %v2022_v23, %v2018_v16  ;;  %vm1986_vm6 = vweird.f32 %v3897_v18  ;;  %v2004_v32 = vand.u32 2147483647, %v6119_v5  ;;  %3904 = vpow2.f32 %v1529_v1  ;;  %v1307_v1 = vpop.f32.mrf.mxu3 }
 0x22b   : > { %v6153_v51 = vadd.f32 1.0, %v3899_v29  ;;  %v2944_v36 = vmul.f32 %v2023_v12, %v5992_v63  ;;  %v1983_v27 = vmul.f32 %v3897_v18, %v1982_v62  ;;  %v1531_v21 = vmul.f32 1.442695, %v1428_v60  ;;  %vm1987_vm8 = vmor %vm1985_vm4, %vm1986_vm6 }
 0x22c   : > { %v3901_v56 = vpop.eup %3900  ;;  %v1992_v13 = vor.u32 1.1754944e-38, %v1991_v7  ;;  %vm2000_vm7 = vweird.f32 %v6119_v5  ;;  %v2006_v55 = vand.u32 2147483648, %v6119_v5  ;;  %vm6165_vm9 = vcmp.eq.f32.partialorder %v2004_v32, 8.507059e+37  ;;  %v1177_v32 = vpop.f32.mrf.mxu1 }
 0x22d   : > { %v1996_v14 = vmul.f32 %v3901_v56, %v6119_v5  ;;  %v3075_v61 = vmul.f32 %v5816_v31, %v2944_v36  ;;  %v3125_v4 = vmul.f32 %v5825_v22, %v2944_v36  ;;  %v1984_v38 = vadd.f32 %v3897_v18, %v1983_v27 }
 0x22e   : > { %3906 = vrcp.f32 %v6153_v51  ;;  %v1974_v39 = vand.u32 2147483647, %v6138_v10  ;;  %v1976_v58 = vand.u32 2147483648, %v6138_v10  ;;  %vm2001_vm10 = vweird.f32 %v3901_v56 }
 0x22f   : > { %v1997_v63 = vsub.f32 1.0, %v1996_v14  ;;  %v3903_v26 = vpop.eup %3902  ;;  %v3092_v19 = vadd.f32 %v5818_v45, %v3075_v61  ;;  %v3142_v20 = vadd.f32 %v5827_v34, %v3125_v4  ;;  %v1988_v37 = vsel %vm1987_vm8, %v3897_v18, %v1984_v38  ;;  %vm2002_vm13 = vmor %vm2000_vm7, %vm2001_vm10 }
 0x230   : > { %3908 = vpow2.f32 %v1531_v21  ;;  %v1993_v50 = vsel %vm6145_vm5, %v1992_v13, %v1988_v37  ;;  %v1966_v46 = vmul.f32 %v3903_v26, %v6138_v10  ;;  %v3905_v48 = vpop.eup %3904  ;;  %v2007_v41 = vor.u32 1.1754944e-38, %v2006_v55 }
 0x231   : > { %v1998_v6 = vmul.f32 %v3901_v56, %v1997_v63  ;;  %3108 = vst [vmem:[%s5924_s2 + $0x18] sm:$0xff] %v3092_v19  ;;  %v2942_v3 = vmul.f32 %v1993_v50, %v6000_v59  ;;  %vm1970_vm11 = vweird.f32 %v6138_v10  ;;  %v6180_v35 = vadd.f32 %v1174_v54, %v5769_v2 }
 0x232   : > { %3158 = vst [vmem:[%s5933_s20 + $0x18] sm:$0xff] %v3142_v20  ;;  %v1967_v43 = vsub.f32 1.0, %v1966_v46  ;;  %vm6183_vm12 = vcmp.eq.f32.partialorder %v1974_v39, 8.507059e+37  ;;  %v6187_v24 = vadd.f32 1.0, %v3905_v48  ;;  %vm1971_vm14 = vweird.f32 %v3903_v26  ;;  %v1375_v48 = vpop.f32.mrf.mxu0 }
 0x233   : > { %v1999_v17 = vadd.f32 %v3901_v56, %v1998_v6  ;;  %3045 = vst [vmem:[%s5947_s29 + $0x30] sm:$0xff] %v2942_v3  ;;  %v1977_v59 = vor.u32 1.1754944e-38, %v1976_v58  ;;  %v1426_v15 = vsub.f32 0.0, %v6180_v35  ;;  %v6195_v40 = vadd.f32 %v1372_v47, %v5668_v53  ;;  %vm1972_vm0 = vmor %vm1970_vm11, %vm1971_vm14 }
 0x234   : > { %v3907_v18 = vpop.eup %3906  ;;  %v1968_v23 = vmul.f32 %v3903_v26, %v1967_v43  ;;  %v6199_v7 = vadd.f32 %v1242_v11, %v5759_v33  ;;  %vm2090_vm15 = vweird.f32 %v6153_v51  ;;  %v2094_v29 = vand.u32 2147483647, %v6153_v51 }
 0x235   : > { %v2003_v44 = vsel %vm2002_vm13, %v3901_v56, %v1999_v17  ;;  %v2086_v57 = vmul.f32 %v3907_v18, %v6153_v51  ;;  %3910 = vrcp.f32 %v6187_v24  ;;  %v2096_v12 = vand.u32 2147483648, %v6153_v51 }
 0x236   : > { %v3909_v60 = vpop.eup %3908  ;;  %v2008_v5 = vsel %vm6165_vm9, %v2007_v41, %v2003_v44  ;;  %v1969_v62 = vadd.f32 %v3903_v26, %v1968_v23  ;;  %v1527_v36 = vmul.f32 1.442695, %v1426_v15  ;;  %v1434_v27 = vsub.f32 0.0, %v6195_v40 }
 0x237   : > { %v2943_v16 = vmul.f32 %v2008_v5, %v6019_v52  ;;  %v2087_v49 = vsub.f32 1.0, %v2086_v57  ;;  %v6211_v56 = vadd.f32 1.0, %v3909_v60  ;;  %v6215_v21 = vadd.f32 %v1307_v1, %v5766_v28  ;;  %v1245_v5 = vpop.f32.mrf.mxu2 }
 0x238   : > { %v1973_v13 = vsel %vm1972_vm0, %v3903_v26, %v1969_v62  ;;  %vm2091_vm1 = vweird.f32 %v3907_v18  ;;  %v1432_v14 = vsub.f32 0.0, %v6199_v7  ;;  %vm6221_vm2 = vcmp.eq.f32.partialorder %v2094_v29, 8.507059e+37 }
 0x239   : > { %3046 = vst [vmem:[%s5947_s29 + $0x38] sm:$0xff] %v2943_v16  ;;  %v2088_v52 = vmul.f32 %v3907_v18, %v2087_v49  ;;  %v1978_v55 = vsel %vm6183_vm12, %v1977_v59, %v1973_v13  ;;  %3912 = vrcp.f32 %v6211_v56  ;;  %v6227_v54 = vadd.f32 %v1177_v32, %v5769_v2  ;;  %vm2092_vm3 = vmor %vm2090_vm15, %vm2091_vm1 }
 0x23a   : > { %v2941_v61 = vmul.f32 %v1978_v55, %v6022_v25  ;;  %v2064_v38 = vand.u32 2147483647, %v6187_v24  ;;  %3914 = vpow2.f32 %v1527_v36  ;;  %v2097_v30 = vor.u32 1.1754944e-38, %v2096_v12 }
 0x23b   : > { %v2089_v4 = vadd.f32 %v3907_v18, %v2088_v52  ;;  %v3911_v63 = vpop.eup %3910  ;;  %v1543_v39 = vmul.f32 1.442695, %v1434_v27  ;;  %v1539_v58 = vmul.f32 1.442695, %v1432_v14  ;;  %v1433_v26 = vsub.f32 0.0, %v6215_v21  ;;  %v1310_v27 = vpop.f32.mrf.mxu3 }
 0x23c   : > { %3014 = vst [vmem:[%s5484_s7 + $0x38] sm:$0xff] %v2941_v61  ;;  %v2056_v20 = vmul.f32 %v3911_v63, %v6187_v24  ;;  %vm2060_vm4 = vweird.f32 %v6187_v24  ;;  %v2066_v25 = vand.u32 2147483648, %v6187_v24  ;;  %v1431_v51 = vsub.f32 0.0, %v6227_v54 }
 0x23d   : > { %v2093_v19 = vsel %vm2092_vm3, %v3907_v18, %v2089_v4  ;;  %3916 = vpow2.f32 %v1543_v39  ;;  %v1541_v50 = vmul.f32 1.442695, %v1433_v26  ;;  %vm6242_vm5 = vcmp.eq.f32.partialorder %v2064_v38, 8.507059e+37 }
 0x23e   : > { %v2098_v37 = vsel %vm6221_vm2, %v2097_v30, %v2093_v19  ;;  %v2057_v46 = vsub.f32 1.0, %v2056_v20  ;;  %3918 = vpow2.f32 %v1539_v58  ;;  %vm2061_vm6 = vweird.f32 %v3911_v63 }
 0x23f   : > { %v2949_v6 = vmul.f32 %v2098_v37, %v6036_v42  ;;  %v3913_v3 = vpop.eup %3912  ;;  %v2079_v41 = vand.u32 2147483647, %v6211_v56  ;;  %3920 = vpow2.f32 %v1541_v50  ;;  %v1537_v11 = vmul.f32 1.442695, %v1431_v51  ;;  %vm2062_vm7 = vmor %vm2060_vm4, %vm2061_vm6 }
 0x240   : > { %v3915_v17 = vpop.eup %3914  ;;  %v2058_v18 = vmul.f32 %v3911_v63, %v2057_v46  ;;  %v2071_v42 = vmul.f32 %v3913_v3, %v6211_v56  ;;  %v2081_v59 = vand.u32 2147483648, %v6211_v56  ;;  %v6254_v44 = vadd.f32 %v1375_v48, %v5668_v53 }
 0x241   : > { %v3076_v43 = vmul.f32 %v5816_v31, %v2949_v6  ;;  %v3126_v8 = vmul.f32 %v5825_v22, %v2949_v6  ;;  %v6251_v15 = vadd.f32 1.0, %v3915_v17  ;;  %3922 = vpow2.f32 %v1537_v11 }
 0x242   : > { %v2059_v1 = vadd.f32 %v3911_v63, %v2058_v18  ;;  %v2072_v60 = vsub.f32 1.0, %v2071_v42  ;;  %v2067_v16 = vor.u32 1.1754944e-38, %v2066_v25  ;;  %vm2075_vm8 = vweird.f32 %v6211_v56 }
 0x243   : > { %v3093_v23 = vadd.f32 %v5818_v45, %v3076_v43  ;;  %v3143_v57 = vadd.f32 %v5827_v34, %v3126_v8  ;;  %v3917_v29 = vpop.eup %3916  ;;  %vm6262_vm9 = vcmp.eq.f32.partialorder %v2079_v41, 8.507059e+37  ;;  %3924 = vrcp.f32 %v6251_v15 }
 0x244   : > { %v3919_v49 = vpop.eup %3918  ;;  %v2063_v12 = vsel %vm2062_vm7, %v3911_v63, %v2059_v1  ;;  %v2073_v32 = vmul.f32 %v3913_v3, %v2072_v60  ;;  %vm2076_vm10 = vweird.f32 %v3913_v3  ;;  %v6268_v36 = vadd.f32 1.0, %v3917_v29  ;;  %v1180_v1 = vpop.f32.mrf.mxu1 }
 0x245   : > { %3109 = vst [vmem:[%s5924_s2 + $0x20] sm:$0xff] %v3093_v23  ;;  %v3921_v13 = vpop.eup %3920  ;;  %v2068_v24 = vsel %vm6242_vm5, %v2067_v16, %v2063_v12  ;;  %v2082_v52 = vor.u32 1.1754944e-38, %v2081_v59  ;;  %v6273_v14 = vadd.f32 1.0, %v3919_v49  ;;  %v6276_v55 = vadd.f32 %v1245_v5, %v5759_v33  ;;  %vm2077_vm11 = vmor %vm2075_vm8, %vm2076_vm10  ;;  %v1248_v23 = vpop.f32.mrf.mxu2 }
 0x246   : > { %3159 = vst [vmem:[%s5933_s20 + $0x20] sm:$0xff] %v3143_v57  ;;  %v2947_v10 = vmul.f32 %v2068_v24, %v6039_v0  ;;  %v2074_v61 = vadd.f32 %v3913_v3, %v2073_v32  ;;  %3926 = vrcp.f32 %v6268_v36  ;;  %v1439_v4 = vsub.f32 0.0, %v6254_v44 }
 0x247   : > { %v3923_v38 = vpop.eup %3922  ;;  %v2049_v63 = vand.u32 2147483647, %v6251_v15  ;;  %v2051_v30 = vand.u32 2147483648, %v6251_v15  ;;  %3928 = vrcp.f32 %v6273_v14  ;;  %v6287_v39 = vadd.f32 %v1310_v27, %v5766_v28 }
 0x248   : > { %3047 = vst [vmem:[%s5947_s29 + $0x40] sm:$0xff] %v2947_v10  ;;  %v2078_v0 = vsel %vm2077_vm11, %v3913_v3, %v2074_v61  ;;  %vm2045_vm12 = vweird.f32 %v6251_v15  ;;  %v2169_v58 = vand.u32 2147483647, %v6268_v36  ;;  %v6292_v26 = vadd.f32 1.0, %v3921_v13 }
 0x249   : > { %v3925_v56 = vpop.eup %3924  ;;  %v2083_v19 = vsel %vm6262_vm9, %v2082_v52, %v2078_v0  ;;  %v2171_v20 = vand.u32 2147483648, %v6268_v36  ;;  %v2141_v25 = vand.u32 2147483648, %v6273_v14  ;;  %v6298_v37 = vadd.f32 1.0, %v3923_v38 }
 0x24a   : > { %v2948_v50 = vmul.f32 %v2083_v19, %v6124_v9  ;;  %v2041_v51 = vmul.f32 %v3925_v56, %v6251_v15  ;;  %v2139_v6 = vand.u32 2147483647, %v6273_v14  ;;  %v1553_v46 = vmul.f32 1.442695, %v1439_v4 }
 0x24b   : > { %vm6303_vm13 = vcmp.eq.f32.partialorder %v2049_v63, 8.507059e+37  ;;  %v2052_v48 = vor.u32 1.1754944e-38, %v2051_v30  ;;  %vm2165_vm14 = vweird.f32 %v6268_v36  ;;  %3930 = vrcp.f32 %v6292_v26 }
 0x24c   : > { %v3927_v3 = vpop.eup %3926  ;;  %3048 = vst [vmem:[%s5947_s29 + $0x48] sm:$0xff] %v2948_v50  ;;  %v2042_v41 = vsub.f32 1.0, %v2041_v51  ;;  %vm2135_vm15 = vweird.f32 %v6273_v14  ;;  %v2156_v9 = vand.u32 2147483648, %v6292_v26  ;;  %3932 = vrcp.f32 %v6298_v37 }
 0x24d   : > { %v3929_v11 = vpop.eup %3928  ;;  %vm2046_vm0 = vweird.f32 %v3925_v56  ;;  %v2161_v17 = vmul.f32 %v3927_v3, %v6268_v36  ;;  %vm6314_vm1 = vcmp.eq.f32.partialorder %v2169_v58, 8.507059e+37  ;;  %v2172_v8 = vor.u32 1.1754944e-38, %v2171_v20 }
 0x24e   : > { %v2142_v18 = vor.u32 1.1754944e-38, %v2141_v25  ;;  %v2043_v42 = vmul.f32 %v3925_v56, %v2042_v41  ;;  %vm2166_vm2 = vweird.f32 %v3927_v3  ;;  %v2131_v59 = vmul.f32 %v3929_v11, %v6273_v14  ;;  %vm2047_vm6 = vmor %vm2045_vm12, %vm2046_vm0 }
 0x24f   : > { %vm6319_vm3 = vcmp.eq.f32.partialorder %v2139_v6, 8.507059e+37  ;;  %v2154_v57 = vand.u32 2147483647, %v6292_v26  ;;  %v2162_v60 = vsub.f32 1.0, %v2161_v17  ;;  %vm2136_vm4 = vweird.f32 %v3929_v11  ;;  %vm2167_vm11 = vmor %vm2165_vm14, %vm2166_vm2 }
 0x250   : > { %v2124_v5 = vand.u32 2147483647, %v6298_v37  ;;  %3934 = vpow2.f32 %v1553_v46  ;;  %v2044_v29 = vadd.f32 %v3925_v56, %v2043_v42  ;;  %v2132_v16 = vsub.f32 1.0, %v2131_v59  ;;  %vm2137_vm12 = vmor %vm2135_vm15, %vm2136_vm4 }
 0x251   : > { %vm2150_vm5 = vweird.f32 %v6292_v26  ;;  %v2157_v62 = vor.u32 1.1754944e-38, %v2156_v9  ;;  %v1437_v49 = vsub.f32 0.0, %v6276_v55  ;;  %v3931_v12 = vpop.eup %3930  ;;  %v2163_v32 = vmul.f32 %v3927_v3, %v2162_v60 }
 0x252   : > { %vm2120_vm7 = vweird.f32 %v6298_v37  ;;  %v2126_v27 = vand.u32 2147483648, %v6298_v37  ;;  %v1438_v13 = vsub.f32 0.0, %v6287_v39  ;;  %v6334_v24 = vadd.f32 %v1180_v1, %v5769_v2  ;;  %v3933_v52 = vpop.eup %3932 }
 0x253   : > { %v2048_v10 = vsel %vm2047_vm6, %v3925_v56, %v2044_v29  ;;  %v2133_v61 = vmul.f32 %v3929_v11, %v2132_v16  ;;  %v2146_v4 = vmul.f32 %v3931_v12, %v6292_v26  ;;  %vm2151_vm8 = vweird.f32 %v3931_v12  ;;  %v1183_v29 = vpop.f32.mrf.mxu1 }
 0x254   : > { %vm6337_vm9 = vcmp.eq.f32.partialorder %v2154_v57, 8.507059e+37  ;;  %v2053_v15 = vsel %vm6303_vm13, %v2052_v48, %v2048_v10  ;;  %v2164_v63 = vadd.f32 %v3927_v3, %v2163_v32  ;;  %v2116_v30 = vmul.f32 %v3933_v52, %v6298_v37  ;;  %v1378_v48 = vpop.f32.mrf.mxu0  ;;  %vm2152_vm14 = vmor %vm2150_vm5, %vm2151_vm8 }
 0x255   : > { %vm2121_vm10 = vweird.f32 %v3933_v52  ;;  %v2946_v0 = vmul.f32 %v2053_v15, %v6180_v35  ;;  %v2134_v58 = vadd.f32 %v3929_v11, %v2133_v61  ;;  %v2147_v56 = vsub.f32 1.0, %v2146_v4 }
 0x256   : > { %v1549_v19 = vmul.f32 1.442695, %v1437_v49  ;;  %v3935_v20 = vpop.eup %3934  ;;  %v2168_v25 = vsel %vm2167_vm11, %v3927_v3, %v2164_v63  ;;  %v2117_v50 = vsub.f32 1.0, %v2116_v30  ;;  %v1551_v51 = vmul.f32 1.442695, %v1438_v13  ;;  %vm2122_vm15 = vmor %vm2120_vm7, %vm2121_vm10 }
 0x257   : > { %v1436_v6 = vsub.f32 0.0, %v6334_v24  ;;  %3016 = vst [vmem:[%s5484_s7 + $0x48] sm:$0xff] %v2946_v0  ;;  %v2173_v35 = vsel %vm6314_vm1, %v2172_v8, %v2168_v25  ;;  %v2138_v46 = vsel %vm2137_vm12, %v3929_v11, %v2134_v58  ;;  %v2148_v36 = vmul.f32 %v3931_v12, %v2147_v56 }
 0x258   : > { %v6355_v47 = vadd.f32 1.0, %v3935_v20  ;;  %v2954_v3 = vmul.f32 %v2173_v35, %v6195_v40  ;;  %v2143_v14 = vsel %vm6319_vm3, %v2142_v18, %v2138_v46  ;;  %v2118_v41 = vmul.f32 %v3933_v52, %v2117_v50 }
 0x259   : > { %3936 = vpow2.f32 %v1549_v19  ;;  %v2952_v9 = vmul.f32 %v2143_v14, %v6199_v7  ;;  %v2149_v17 = vadd.f32 %v3931_v12, %v2148_v36  ;;  %vm6361_vm13 = vcmp.eq.f32.partialorder %v2124_v5, 8.507059e+37  ;;  %v1313_v5 = vpop.f32.mrf.mxu3 }
 0x25a   : > { %3938 = vrcp.f32 %v6355_v47  ;;  %v3077_v11 = vmul.f32 %v5816_v31, %v2954_v3  ;;  %v3127_v43 = vmul.f32 %v5825_v22, %v2954_v3  ;;  %v2119_v40 = vadd.f32 %v3933_v52, %v2118_v41 }
 0x25b   : > { %v6372_v8 = vadd.f32 %v1378_v48, %v5668_v53  ;;  %3049 = vst [vmem:[%s5947_s29 + $0x50] sm:$0xff] %v2952_v9  ;;  %v2153_v7 = vsel %vm2152_vm14, %v3931_v12, %v2149_v17  ;;  %v2127_v18 = vor.u32 1.1754944e-38, %v2126_v27  ;;  %3940 = vpow2.f32 %v1551_v51 }
 0x25c   : > { %v1547_v59 = vmul.f32 1.442695, %v1436_v6  ;;  %v3094_v57 = vadd.f32 %v5818_v45, %v3077_v11  ;;  %v3144_v26 = vadd.f32 %v5827_v34, %v3127_v43  ;;  %v2158_v1 = vsel %vm6337_vm9, %v2157_v62, %v2153_v7  ;;  %v1381_v19 = vpop.f32.mrf.mxu0 }
 0x25d   : > { %v2123_v60 = vsel %vm2122_vm15, %v3933_v52, %v2119_v40  ;;  %v2953_v16 = vmul.f32 %v2158_v1, %v6215_v21  ;;  %v1444_v32 = vsub.f32 0.0, %v6372_v8  ;;  %v6389_v27 = vadd.f32 %v1248_v23, %v5759_v33 }
 0x25e   : > { %v2128_v37 = vsel %vm6361_vm13, %v2127_v18, %v2123_v60  ;;  %3110 = vst [vmem:[%s5924_s2 + $0x28] sm:$0xff] %v3094_v57  ;;  %3942 = vpow2.f32 %v1547_v59  ;;  %v6395_v21 = vadd.f32 %v1313_v5, %v5766_v28  ;;  %v6398_v52 = vadd.f32 %v1183_v29, %v5769_v2 }
 0x25f   : > { %v3937_v49 = vpop.eup %3936  ;;  %v2951_v12 = vmul.f32 %v2128_v37, %v6227_v54  ;;  %3160 = vst [vmem:[%s5933_s20 + $0x28] sm:$0xff] %v3144_v26  ;;  %v1563_v54 = vmul.f32 1.442695, %v1444_v32  ;;  %v1442_v61 = vsub.f32 0.0, %v6389_v27  ;;  %v2244_v38 = vand.u32 2147483647, %v6355_v47 }
 0x260   : > { %v3939_v62 = vpop.eup %3938  ;;  %v6392_v13 = vadd.f32 1.0, %v3937_v49  ;;  %3050 = vst [vmem:[%s5947_s29 + $0x58] sm:$0xff] %v2953_v16  ;;  %v2246_v0 = vand.u32 2147483648, %v6355_v47  ;;  %v1443_v58 = vsub.f32 0.0, %v6395_v21  ;;  %v1441_v56 = vsub.f32 0.0, %v6398_v52 }
 0x261   : > { %v2236_v10 = vmul.f32 %v3939_v62, %v6355_v47  ;;  %v3941_v4 = vpop.eup %3940  ;;  %3018 = vst [vmem:[%s5484_s7 + $0x58] sm:$0xff] %v2951_v12  ;;  %v1559_v30 = vmul.f32 1.442695, %v1442_v61  ;;  %vm2241_vm0 = vweird.f32 %v3939_v62  ;;  %vm2240_vm1 = vweird.f32 %v6355_v47 }
 0x262   : > { %3944 = vrcp.f32 %v6392_v13  ;;  %v6406_v63 = vadd.f32 1.0, %v3941_v4  ;;  %v2214_v50 = vand.u32 2147483647, %v6392_v13  ;;  %v2216_v51 = vand.u32 2147483648, %v6392_v13  ;;  %vm2242_vm3 = vmor %vm2240_vm1, %vm2241_vm0 }
 0x263   : > { %v2237_v15 = vsub.f32 1.0, %v2236_v10  ;;  %3946 = vpow2.f32 %v1563_v54  ;;  %v1561_v35 = vmul.f32 1.442695, %v1443_v58  ;;  %vm2245_vm2 = vcmp.eq.f32.partialorder %v2244_v38, 8.507059e+37 }
 0x264   : > { %v3943_v20 = vpop.eup %3942  ;;  %3948 = vrcp.f32 %v6406_v63  ;;  %v1557_v36 = vmul.f32 1.442695, %v1441_v56  ;;  %v6418_v48 = vadd.f32 %v1381_v19, %v5668_v53  ;;  %v2247_v14 = vor.u32 1.1754944e-38, %v2246_v0 }
 0x265   : > { %v2238_v25 = vmul.f32 %v3939_v62, %v2237_v15  ;;  %v6415_v6 = vadd.f32 1.0, %v3943_v20  ;;  %3950 = vpow2.f32 %v1559_v30  ;;  %vm2210_vm4 = vweird.f32 %v6392_v13 }
 0x266   : > { %v2229_v41 = vand.u32 2147483647, %v6406_v63  ;;  %vm6425_vm5 = vcmp.eq.f32.partialorder %v2214_v50, 8.507059e+37  ;;  %v2217_v11 = vor.u32 1.1754944e-38, %v2216_v51  ;;  %vm2225_vm6 = vweird.f32 %v6406_v63 }
 0x267   : > { %v2239_v46 = vadd.f32 %v3939_v62, %v2238_v25  ;;  %3952 = vrcp.f32 %v6415_v6  ;;  %v2231_v40 = vand.u32 2147483648, %v6406_v63  ;;  %v1449_v57 = vsub.f32 0.0, %v6418_v48 }
 0x268   : > { %v3945_v3 = vpop.eup %3944  ;;  %3954 = vpow2.f32 %v1561_v35  ;;  %vm6436_vm7 = vcmp.eq.f32.partialorder %v2229_v41, 8.507059e+37  ;;  %v2199_v5 = vand.u32 2147483647, %v6415_v6  ;;  %v2201_v29 = vand.u32 2147483648, %v6415_v6 }
 0x269   : > { %v3947_v47 = vpop.eup %3946  ;;  %v2243_v9 = vsel %vm2242_vm3, %v3939_v62, %v2239_v46  ;;  %v2206_v17 = vmul.f32 %v3945_v3, %v6392_v13  ;;  %3956 = vpow2.f32 %v1557_v36  ;;  %vm2211_vm8 = vweird.f32 %v3945_v3 }
 0x26a   : > { %v2248_v43 = vsel %vm2245_vm2, %v2247_v14, %v2243_v9  ;;  %v6431_v7 = vadd.f32 1.0, %v3947_v47  ;;  %v3949_v18 = vpop.eup %3948  ;;  %v2232_v32 = vor.u32 1.1754944e-38, %v2231_v40  ;;  %vm2195_vm9 = vweird.f32 %v6415_v6  ;;  %vm2212_vm10 = vmor %vm2210_vm4, %vm2211_vm8 }
 0x26b   : > { %v2959_v59 = vmul.f32 %v2248_v43, %v6254_v44  ;;  %v2207_v23 = vsub.f32 1.0, %v2206_v17  ;;  %v3951_v26 = vpop.eup %3950  ;;  %v2221_v1 = vmul.f32 %v3949_v18, %v6406_v63  ;;  %vm2226_vm11 = vweird.f32 %v3949_v18 }
 0x26c   : > { %3958 = vrcp.f32 %v6431_v7  ;;  %v6446_v62 = vadd.f32 1.0, %v3951_v26  ;;  %vm6453_vm12 = vcmp.eq.f32.partialorder %v2199_v5, 8.507059e+37  ;;  %v2202_v0 = vor.u32 1.1754944e-38, %v2201_v29  ;;  %vm2227_vm14 = vmor %vm2225_vm6, %vm2226_vm11  ;;  %v1251_v26 = vpop.f32.mrf.mxu2 }
 0x26d   : > { %v3078_v16 = vmul.f32 %v5816_v31, %v2959_v59  ;;  %v3128_v44 = vmul.f32 %v5825_v22, %v2959_v59  ;;  %v2208_v37 = vmul.f32 %v3945_v3, %v2207_v23  ;;  %v3953_v49 = vpop.eup %3952  ;;  %v2222_v12 = vsub.f32 1.0, %v2221_v1  ;;  %v1316_v1 = vpop.f32.mrf.mxu3 }
 0x26e   : > { %v2191_v4 = vmul.f32 %v3953_v49, %v6415_v6  ;;  %v3955_v38 = vpop.eup %3954  ;;  %vm2315_vm13 = vweird.f32 %v6431_v7  ;;  %v2319_v20 = vand.u32 2147483647, %v6431_v7  ;;  %3960 = vrcp.f32 %v6446_v62 }
 0x26f   : > { %v3095_v10 = vadd.f32 %v5818_v45, %v3078_v16  ;;  %v3145_v54 = vadd.f32 %v5827_v34, %v3128_v44  ;;  %v2209_v61 = vadd.f32 %v3945_v3, %v2208_v37  ;;  %v2223_v15 = vmul.f32 %v3949_v18, %v2222_v12  ;;  %v3957_v58 = vpop.eup %3956  ;;  %v1186_v44 = vpop.f32.mrf.mxu1 }
 0x270   : > { %v2192_v19 = vsub.f32 1.0, %v2191_v4  ;;  %v2321_v51 = vand.u32 2147483648, %v6431_v7  ;;  %v1573_v35 = vmul.f32 1.442695, %v1449_v57  ;;  %vm2196_vm15 = vweird.f32 %v3953_v49 }
 0x271   : > { %3111 = vst [vmem:[%s5924_s2 + $0x30] sm:$0xff] %v3095_v10  ;;  %v2213_v56 = vsel %vm2212_vm10, %v3945_v3, %v2209_v61  ;;  %v2224_v50 = vadd.f32 %v3949_v18, %v2223_v15  ;;  %v2289_v41 = vand.u32 2147483647, %v6446_v62  ;;  %v2291_v47 = vand.u32 2147483648, %v6446_v62  ;;  %vm2197_vm0 = vmor %vm2195_vm9, %vm2196_vm15 }
 0x272   : > { %v3959_v13 = vpop.eup %3958  ;;  %3161 = vst [vmem:[%s5933_s20 + $0x30] sm:$0xff] %v3145_v54  ;;  %v2218_v25 = vsel %vm6425_vm5, %v2217_v11, %v2213_v56  ;;  %v2193_v36 = vmul.f32 %v3953_v49, %v2192_v19  ;;  %v6472_v9 = vadd.f32 1.0, %v3955_v38  ;;  %v6477_v63 = vadd.f32 1.0, %v3957_v58 }
 0x273   : > { %v2957_v46 = vmul.f32 %v2218_v25, %v6276_v55  ;;  %v2311_v3 = vmul.f32 %v3959_v13, %v6431_v7  ;;  %v2228_v14 = vsel %vm2227_vm14, %v3949_v18, %v2224_v50  ;;  %vm6482_vm1 = vcmp.eq.f32.partialorder %v2319_v20, 8.507059e+37 }
 0x274   : > { %v2233_v55 = vsel %vm6436_vm7, %v2232_v32, %v2228_v14  ;;  %v2194_v17 = vadd.f32 %v3953_v49, %v2193_v36  ;;  %v2322_v40 = vor.u32 1.1754944e-38, %v2321_v51  ;;  %3962 = vrcp.f32 %v6472_v9  ;;  %v3961_v18 = vpop.eup %3960 }
 0x275   : > { %3051 = vst [vmem:[%s5947_s29 + $0x60] sm:$0xff] %v2957_v46  ;;  %v2312_v42 = vsub.f32 1.0, %v2311_v3  ;;  %v2958_v11 = vmul.f32 %v2233_v55, %v6287_v39  ;;  %vm2316_vm2 = vweird.f32 %v3959_v13  ;;  %3964 = vrcp.f32 %v6477_v63 }
 0x276   : > { %v2198_v59 = vsel %vm2197_vm0, %v3953_v49, %v2194_v17  ;;  %v2281_v6 = vmul.f32 %v3961_v18, %v6446_v62  ;;  %vm2285_vm3 = vweird.f32 %v6446_v62  ;;  %vm6493_vm4 = vcmp.eq.f32.partialorder %v2289_v41, 8.507059e+37  ;;  %vm2317_vm5 = vmor %vm2315_vm13, %vm2316_vm2  ;;  %v1384_v41 = vpop.f32.mrf.mxu0 }
 0x277   : > { %v2313_v23 = vmul.f32 %v3959_v13, %v2312_v42  ;;  %3052 = vst [vmem:[%s5947_s29 + $0x68] sm:$0xff] %v2958_v11  ;;  %v2203_v39 = vsel %vm6453_vm12, %v2202_v0, %v2198_v59  ;;  %v2292_v29 = vor.u32 1.1754944e-38, %v2291_v47  ;;  %v2304_v16 = vand.u32 2147483647, %v6472_v9 }
 0x278   : > { %v2956_v60 = vmul.f32 %v2203_v39, %v6334_v24  ;;  %v2282_v37 = vsub.f32 1.0, %v2281_v6  ;;  %vm2286_vm6 = vweird.f32 %v3961_v18  ;;  %v2306_v49 = vand.u32 2147483648, %v6472_v9 }
 0x279   : > { %v2314_v5 = vadd.f32 %v3959_v13, %v2313_v23  ;;  %3966 = vpow2.f32 %v1573_v35  ;;  %vm2300_vm7 = vweird.f32 %v6472_v9  ;;  %v2274_v32 = vand.u32 2147483647, %v6477_v63  ;;  %vm2287_vm11 = vmor %vm2285_vm3, %vm2286_vm6  ;;  %v1254_v23 = vpop.f32.mrf.mxu2 }
 0x27a   : > { %3020 = vst [vmem:[%s5484_s7 + $0x68] sm:$0xff] %v2956_v60  ;;  %v6506_v24 = vadd.f32 %v1251_v26, %v5759_v33  ;;  %v6509_v10 = vadd.f32 %v1316_v1, %v5766_v28  ;;  %v3963_v54 = vpop.eup %3962  ;;  %v2283_v61 = vmul.f32 %v3961_v18, %v2282_v37  ;;  %v2276_v4 = vand.u32 2147483648, %v6477_v63  ;;  %v1319_v1 = vpop.f32.mrf.mxu3 }
 0x27b   : > { %v2318_v12 = vsel %vm2317_vm5, %v3959_v13, %v2314_v5  ;;  %v6515_v38 = vadd.f32 %v1186_v44, %v5769_v2  ;;  %v3965_v15 = vpop.eup %3964  ;;  %v2296_v0 = vmul.f32 %v3963_v54, %v6472_v9  ;;  %vm2301_vm8 = vweird.f32 %v3963_v54 }
 0x27c   : > { %v2323_v7 = vsel %vm6482_vm1, %v2322_v40, %v2318_v12  ;;  %vm6519_vm9 = vcmp.eq.f32.partialorder %v2304_v16, 8.507059e+37  ;;  %v1447_v56 = vsub.f32 0.0, %v6506_v24  ;;  %v2284_v19 = vadd.f32 %v3961_v18, %v2283_v61  ;;  %vm2302_vm12 = vmor %vm2300_vm7, %vm2301_vm8 }
 0x27d   : > { %v2964_v30 = vmul.f32 %v2323_v7, %v6372_v8  ;;  %v2266_v20 = vmul.f32 %v3965_v15, %v6477_v63  ;;  %vm2271_vm10 = vweird.f32 %v3965_v15  ;;  %v1448_v13 = vsub.f32 0.0, %v6509_v10 }
 0x27e   : > { %v2297_v8 = vsub.f32 1.0, %v2296_v0  ;;  %v1569_v51 = vmul.f32 1.442695, %v1447_v56  ;;  %v2288_v46 = vsel %vm2287_vm11, %v3961_v18, %v2284_v19  ;;  %v1446_v14 = vsub.f32 0.0, %v6515_v38 }
 0x27f   : > { %v3079_v25 = vmul.f32 %v5816_v31, %v2964_v30  ;;  %v3129_v50 = vmul.f32 %v5825_v22, %v2964_v30  ;;  %v3967_v35 = vpop.eup %3966  ;;  %v2267_v36 = vsub.f32 1.0, %v2266_v20  ;;  %v1571_v3 = vmul.f32 1.442695, %v1448_v13 }
 0x280   : > { %v2293_v17 = vsel %vm6493_vm4, %v2292_v29, %v2288_v46  ;;  %v2298_v62 = vmul.f32 %v3963_v54, %v2297_v8  ;;  %v6537_v43 = vadd.f32 1.0, %v3967_v35  ;;  %3968 = vpow2.f32 %v1569_v51 }
 0x281   : > { %v3096_v47 = vadd.f32 %v5818_v45, %v3079_v25  ;;  %v3146_v55 = vadd.f32 %v5827_v34, %v3129_v50  ;;  %v2962_v42 = vmul.f32 %v2293_v17, %v6389_v27  ;;  %v2268_v11 = vmul.f32 %v3965_v15, %v2267_v36  ;;  %v1387_v50 = vpop.f32.mrf.mxu0  ;;  %v1257_v8 = vpop.f32.mrf.mxu2 }
 0x282   : > { %v2299_v40 = vadd.f32 %v3963_v54, %v2298_v62  ;;  %3970 = vpow2.f32 %v1571_v3  ;;  %v1567_v18 = vmul.f32 1.442695, %v1446_v14  ;;  %v6541_v59 = vadd.f32 %v1384_v41, %v5668_v53 }
 0x283   : > { %3112 = vst [vmem:[%s5924_s2 + $0x38] sm:$0xff] %v3096_v47  ;;  %v2307_v39 = vor.u32 1.1754944e-38, %v2306_v49  ;;  %v2269_v27 = vadd.f32 %v3965_v15, %v2268_v11  ;;  %vm2270_vm13 = vweird.f32 %v6477_v63  ;;  %3972 = vrcp.f32 %v6537_v43 }
 0x284   : > { %3162 = vst [vmem:[%s5933_s20 + $0x38] sm:$0xff] %v3146_v55  ;;  %v2303_v6 = vsel %vm2302_vm12, %v3963_v54, %v2299_v40  ;;  %vm2272_vm14 = vmor %vm2270_vm13, %vm2271_vm10  ;;  %v2277_v57 = vor.u32 1.1754944e-38, %v2276_v4  ;;  %3974 = vpow2.f32 %v1567_v18  ;;  %v1454_v26 = vsub.f32 0.0, %v6541_v59 }
 0x285   : > { %3053 = vst [vmem:[%s5947_s29 + $0x70] sm:$0xff] %v2962_v42  ;;  %v2308_v9 = vsel %vm6519_vm9, %v2307_v39, %v2303_v6  ;;  %v2273_v60 = vsel %vm2272_vm14, %v3965_v15, %v2269_v27  ;;  %vm2275_vm15 = vcmp.eq.f32.partialorder %v2274_v32, 8.507059e+37  ;;  %v6555_v63 = vadd.f32 %v1254_v23, %v5759_v33 }
 0x286   : > { %v2963_v5 = vmul.f32 %v2308_v9, %v6395_v21  ;;  %v2278_v29 = vsel %vm2275_vm15, %v2277_v57, %v2273_v60  ;;  %v1583_v16 = vmul.f32 1.442695, %v1454_v26  ;;  %v3969_v44 = vpop.eup %3968  ;;  %v2394_v49 = vand.u32 2147483647, %v6537_v43 }
 0x287   : > { %v2961_v37 = vmul.f32 %v2278_v29, %v6398_v52  ;;  %v1452_v12 = vsub.f32 0.0, %v6555_v63  ;;  %v6562_v54 = vadd.f32 %v1319_v1, %v5766_v28  ;;  %v2396_v32 = vand.u32 2147483648, %v6537_v43  ;;  %v1189_v52 = vpop.f32.mrf.mxu1 }
 0x288   : > { %v3971_v7 = vpop.eup %3970  ;;  %3054 = vst [vmem:[%s5947_s29 + $0x78] sm:$0xff] %v2963_v5  ;;  %v6566_v61 = vadd.f32 1.0, %v3969_v44  ;;  %3976 = vpow2.f32 %v1583_v16  ;;  %vm2390_vm0 = vweird.f32 %v6537_v43  ;;  %vm6574_vm1 = vcmp.eq.f32.partialorder %v2394_v49, 8.507059e+37 }
 0x289   : > { %v3973_v21 = vpop.eup %3972  ;;  %3022 = vst [vmem:[%s5484_s7 + $0x78] sm:$0xff] %v2961_v37  ;;  %v6569_v4 = vadd.f32 1.0, %v3971_v7  ;;  %v1579_v15 = vmul.f32 1.442695, %v1452_v12  ;;  %v1453_v56 = vsub.f32 0.0, %v6562_v54  ;;  %v2397_v20 = vor.u32 1.1754944e-38, %v2396_v32 }
 0x28a   : > { %v3975_v30 = vpop.eup %3974  ;;  %v2386_v0 = vmul.f32 %v3973_v21, %v6537_v43  ;;  %3978 = vrcp.f32 %v6566_v61  ;;  %v6583_v25 = vadd.f32 %v1189_v52, %v5769_v2  ;;  %v2364_v51 = vand.u32 2147483647, %v6566_v61 }
 0x28b   : > { %3980 = vrcp.f32 %v6569_v4  ;;  %v6580_v13 = vadd.f32 1.0, %v3975_v30  ;;  %v2366_v35 = vand.u32 2147483648, %v6566_v61  ;;  %v2381_v46 = vand.u32 2147483648, %v6569_v4 }
 0x28c   : > { %v2387_v19 = vsub.f32 1.0, %v2386_v0  ;;  %3982 = vpow2.f32 %v1579_v15  ;;  %vm2391_vm2 = vweird.f32 %v3973_v21  ;;  %v2379_v14 = vand.u32 2147483647, %v6569_v4 }
 0x28d   : > { %3984 = vrcp.f32 %v6580_v13  ;;  %v1581_v47 = vmul.f32 1.442695, %v1453_v56  ;;  %v6593_v55 = vadd.f32 %v1387_v50, %v5668_v53  ;;  %v6596_v17 = vadd.f32 %v1257_v8, %v5759_v33  ;;  %vm2392_vm5 = vmor %vm2390_vm0, %vm2391_vm2 }
 0x28e   : > { %v3977_v36 = vpop.eup %3976  ;;  %v2388_v3 = vmul.f32 %v3973_v21, %v2387_v19  ;;  %vm2360_vm3 = vweird.f32 %v6566_v61  ;;  %vm2375_vm4 = vweird.f32 %v6569_v4  ;;  %v1451_v11 = vsub.f32 0.0, %v6583_v25 }
 0x28f   : > { %v6590_v41 = vadd.f32 1.0, %v3977_v36  ;;  %vm6604_vm6 = vcmp.eq.f32.partialorder %v2364_v51, 8.507059e+37  ;;  %v2367_v39 = vor.u32 1.1754944e-38, %v2366_v35  ;;  %v2382_v27 = vor.u32 1.1754944e-38, %v2381_v46 }
 0x290   : > { %v3979_v62 = vpop.eup %3978  ;;  %v2389_v42 = vadd.f32 %v3973_v21, %v2388_v3  ;;  %vm6609_vm7 = vcmp.eq.f32.partialorder %v2379_v14, 8.507059e+37  ;;  %v2349_v1 = vand.u32 2147483647, %v6580_v13  ;;  %vm2345_vm8 = vweird.f32 %v6580_v13 }
 0x291   : > { %v3981_v40 = vpop.eup %3980  ;;  %v2356_v18 = vmul.f32 %v3979_v62, %v6566_v61  ;;  %3986 = vrcp.f32 %v6590_v41  ;;  %v2351_v5 = vand.u32 2147483648, %v6580_v13  ;;  %v1577_v49 = vmul.f32 1.442695, %v1451_v11 }
 0x292   : > { %v2393_v6 = vsel %vm2392_vm5, %v3973_v21, %v2389_v42  ;;  %v2371_v57 = vmul.f32 %v3981_v40, %v6569_v4  ;;  %v3983_v43 = vpop.eup %3982  ;;  %3988 = vpow2.f32 %v1581_v47  ;;  %vm2361_vm9 = vweird.f32 %v3979_v62 }
 0x293   : > { %v2398_v9 = vsel %vm6574_vm1, %v2397_v20, %v2393_v6  ;;  %v2357_v60 = vsub.f32 1.0, %v2356_v18  ;;  %v3985_v29 = vpop.eup %3984  ;;  %v6620_v37 = vadd.f32 1.0, %v3983_v43  ;;  %v1459_v32 = vsub.f32 0.0, %v6593_v55  ;;  %vm2362_vm12 = vmor %vm2360_vm3, %vm2361_vm9 }
 0x294   : > { %v2969_v16 = vmul.f32 %v2398_v9, %v6418_v48  ;;  %v2372_v44 = vsub.f32 1.0, %v2371_v57  ;;  %v2341_v7 = vmul.f32 %v3985_v29, %v6580_v13  ;;  %vm2376_vm10 = vweird.f32 %v3981_v40  ;;  %v1322_v13 = vpop.f32.mrf.mxu3  ;;  %v1192_v9 = vpop.f32.mrf.mxu1 }
 0x295   : > { %v2358_v12 = vmul.f32 %v3979_v62, %v2357_v60  ;;  %vm6626_vm11 = vcmp.eq.f32.partialorder %v2349_v1, 8.507059e+37  ;;  %3990 = vrcp.f32 %v6620_v37  ;;  %v2352_v50 = vor.u32 1.1754944e-38, %v2351_v5  ;;  %vm2377_vm13 = vmor %vm2375_vm4, %vm2376_vm10 }
 0x296   : > { %v3080_v21 = vmul.f32 %v5816_v31, %v2969_v16  ;;  %v3130_v15 = vmul.f32 %v5825_v22, %v2969_v16  ;;  %v2373_v52 = vmul.f32 %v3981_v40, %v2372_v44  ;;  %v2342_v0 = vsub.f32 1.0, %v2341_v7 }
 0x297   : > { %v2359_v30 = vadd.f32 %v3979_v62, %v2358_v12  ;;  %v3987_v58 = vpop.eup %3986  ;;  %vm2346_vm14 = vweird.f32 %v3985_v29  ;;  %v2469_v61 = vand.u32 2147483647, %v6590_v41  ;;  %v2471_v14 = vand.u32 2147483648, %v6590_v41 }
 0x298   : > { %v3097_v56 = vadd.f32 %v5818_v45, %v3080_v21  ;;  %v3147_v19 = vadd.f32 %v5827_v34, %v3130_v15  ;;  %v2374_v20 = vadd.f32 %v3981_v40, %v2373_v52  ;;  %v3989_v8 = vpop.eup %3988  ;;  %v2343_v35 = vmul.f32 %v3985_v29, %v2342_v0  ;;  %vm2347_vm15 = vmor %vm2345_vm8, %vm2346_vm14 }
 0x299   : > { %v2363_v51 = vsel %vm2362_vm12, %v3979_v62, %v2359_v30  ;;  %v2461_v46 = vmul.f32 %v3987_v58, %v6590_v41  ;;  %vm2466_vm0 = vweird.f32 %v3987_v58  ;;  %3992 = vpow2.f32 %v1577_v49 }
 0x29a   : > { %3113 = vst [vmem:[%s5924_s2 + $0x40] sm:$0xff] %v3097_v56  ;;  %v2368_v36 = vsel %vm6604_vm6, %v2367_v39, %v2363_v51  ;;  %v2378_v3 = vsel %vm2377_vm13, %v3981_v40, %v2374_v20  ;;  %v2344_v62 = vadd.f32 %v3985_v29, %v2343_v35  ;;  %v6650_v40 = vadd.f32 1.0, %v3989_v8  ;;  %v1390_v51 = vpop.f32.mrf.mxu0 }
 0x29b   : > { %3163 = vst [vmem:[%s5933_s20 + $0x40] sm:$0xff] %v3147_v19  ;;  %v2967_v47 = vmul.f32 %v2368_v36, %v6506_v24  ;;  %v2383_v4 = vsel %vm6609_vm7, %v2382_v27, %v2378_v3  ;;  %v2462_v42 = vsub.f32 1.0, %v2461_v46  ;;  %v3991_v18 = vpop.eup %3990  ;;  %v1593_v6 = vmul.f32 1.442695, %v1459_v32 }
 0x29c   : > { %v2968_v11 = vmul.f32 %v2383_v4, %v6509_v10  ;;  %v2348_v23 = vsel %vm2347_vm15, %v3985_v29, %v2344_v62  ;;  %v1457_v24 = vsub.f32 0.0, %v6596_v17  ;;  %vm2465_vm1 = vweird.f32 %v6590_v41 }
 0x29d   : > { %3055 = vst [vmem:[%s5947_s29 + $0x80] sm:$0xff] %v2967_v47  ;;  %v2463_v39 = vmul.f32 %v3987_v58, %v2462_v42  ;;  %v2353_v27 = vsel %vm6626_vm11, %v2352_v50, %v2348_v23  ;;  %v2431_v10 = vmul.f32 %v3991_v18, %v6620_v37  ;;  %3994 = vrcp.f32 %v6650_v40  ;;  %vm2467_vm2 = vmor %vm2465_vm1, %vm2466_vm0  ;;  %v1325_v42 = vpop.f32.mrf.mxu3 }
 0x29e   : > { %3056 = vst [vmem:[%s5947_s29 + $0x88] sm:$0xff] %v2968_v11  ;;  %v2966_v57 = vmul.f32 %v2353_v27, %v6515_v38  ;;  %v2472_v1 = vor.u32 1.1754944e-38, %v2471_v14  ;;  %v2439_v43 = vand.u32 2147483647, %v6620_v37  ;;  %v2441_v5 = vand.u32 2147483648, %v6620_v37  ;;  %v1260_v14 = vpop.f32.mrf.mxu2 }
 0x29f   : > { %v2464_v26 = vadd.f32 %v3987_v58, %v2463_v39  ;;  %v2432_v60 = vsub.f32 1.0, %v2431_v10  ;;  %3996 = vpow2.f32 %v1593_v6  ;;  %v1589_v29 = vmul.f32 1.442695, %v1457_v24  ;;  %v3993_v38 = vpop.eup %3992 }
 0x2a0   : > { %3024 = vst [vmem:[%s5484_s7 + $0x88] sm:$0xff] %v2966_v57  ;;  %vm2470_vm3 = vcmp.eq.f32.partialorder %v2469_v61, 8.507059e+37  ;;  %vm2436_vm4 = vweird.f32 %v3991_v18  ;;  %v6666_v16 = vadd.f32 %v1322_v13, %v5766_v28  ;;  %v6669_v12 = vadd.f32 %v1192_v9, %v5769_v2 }
 0x2a1   : > { %v2468_v41 = vsel %vm2467_vm2, %v3987_v58, %v2464_v26  ;;  %v2433_v49 = vmul.f32 %v3991_v18, %v2432_v60  ;;  %3998 = vpow2.f32 %v1589_v29  ;;  %v6672_v32 = vadd.f32 1.0, %v3993_v38 }
 0x2a2   : > { %v2473_v44 = vsel %vm2470_vm3, %v2472_v1, %v2468_v41  ;;  %vm2435_vm5 = vweird.f32 %v6620_v37  ;;  %vm2440_vm6 = vcmp.eq.f32.partialorder %v2439_v43, 8.507059e+37  ;;  %v2442_v52 = vor.u32 1.1754944e-38, %v2441_v5  ;;  %v1195_v41 = vpop.f32.mrf.mxu1 }
 0x2a3   : > { %v2974_v7 = vmul.f32 %v2473_v44, %v6541_v59  ;;  %v3995_v21 = vpop.eup %3994  ;;  %v2434_v15 = vadd.f32 %v3991_v18, %v2433_v49  ;;  %vm2437_vm7 = vmor %vm2435_vm5, %vm2436_vm4  ;;  %v1458_v58 = vsub.f32 0.0, %v6666_v16  ;;  %vm2450_vm8 = vweird.f32 %v6650_v40 }
 0x2a4   : > { %v2446_v48 = vmul.f32 %v3995_v21, %v6650_v40  ;;  %4000 = vrcp.f32 %v6672_v32  ;;  %v1456_v37 = vsub.f32 0.0, %v6669_v12  ;;  %v2454_v36 = vand.u32 2147483647, %v6650_v40 }
 0x2a5   : > { %v3081_v30 = vmul.f32 %v5816_v31, %v2974_v7  ;;  %v3131_v0 = vmul.f32 %v5825_v22, %v2974_v7  ;;  %v3997_v56 = vpop.eup %3996  ;;  %v2438_v59 = vsel %vm2437_vm7, %v3991_v18, %v2434_v15  ;;  %v2456_v3 = vand.u32 2147483648, %v6650_v40 }
 0x2a6   : > { %v2443_v50 = vsel %vm2440_vm6, %v2442_v52, %v2438_v59  ;;  %v2447_v8 = vsub.f32 1.0, %v2446_v48  ;;  %v6688_v61 = vadd.f32 1.0, %v3997_v56  ;;  %vm2451_vm9 = vweird.f32 %v3995_v21 }
 0x2a7   : > { %v3098_v19 = vadd.f32 %v5818_v45, %v3081_v30  ;;  %v3148_v20 = vadd.f32 %v5827_v34, %v3131_v0  ;;  %v3999_v35 = vpop.eup %3998  ;;  %v2972_v46 = vmul.f32 %v2443_v50, %v6555_v63  ;;  %v1591_v62 = vmul.f32 1.442695, %v1458_v58  ;;  %vm2452_vm10 = vmor %vm2450_vm8, %vm2451_vm9  ;;  %v1393_v0 = vpop.f32.mrf.mxu0 }
 0x2a8   : > { %v2448_v47 = vmul.f32 %v3995_v21, %v2447_v8  ;;  %v6691_v4 = vadd.f32 1.0, %v3999_v35  ;;  %v2424_v11 = vand.u32 2147483647, %v6672_v32  ;;  %v2426_v63 = vand.u32 2147483648, %v6672_v32 }
 0x2a9   : > { %3114 = vst [vmem:[%s5924_s2 + $0x48] sm:$0xff] %v3098_v19  ;;  %4002 = vrcp.f32 %v6688_v61  ;;  %v1587_v18 = vmul.f32 1.442695, %v1456_v37  ;;  %v6700_v39 = vadd.f32 %v1390_v51, %v5668_v53  ;;  %v6703_v6 = vadd.f32 %v1260_v14, %v5759_v33  ;;  %v1263_v14 = vpop.f32.mrf.mxu2 }
 0x2aa   : > { %3164 = vst [vmem:[%s5933_s20 + $0x48] sm:$0xff] %v3148_v20  ;;  %v2449_v23 = vadd.f32 %v3995_v21, %v2448_v47  ;;  %4004 = vrcp.f32 %v6691_v4  ;;  %v4001_v24 = vpop.eup %4000  ;;  %vm2455_vm11 = vcmp.eq.f32.partialorder %v2454_v36, 8.507059e+37  ;;  %v2457_v27 = vor.u32 1.1754944e-38, %v2456_v3 }
 0x2ab   : > { %3057 = vst [vmem:[%s5947_s29 + $0x90] sm:$0xff] %v2972_v46  ;;  %4006 = vpow2.f32 %v1591_v62  ;;  %v6709_v10 = vadd.f32 %v1325_v42, %v5766_v28  ;;  %v2416_v57 = vmul.f32 %v4001_v24, %v6672_v32  ;;  %vm2420_vm12 = vweird.f32 %v6672_v32 }
 0x2ac   : > { %v2453_v13 = vsel %vm2452_vm10, %v3995_v21, %v2449_v23  ;;  %v2544_v26 = vand.u32 2147483647, %v6688_v61  ;;  %vm6714_vm13 = vcmp.eq.f32.partialorder %v2424_v11, 8.507059e+37  ;;  %v2427_v40 = vor.u32 1.1754944e-38, %v2426_v63 }
 0x2ad   : > { %v2458_v1 = vsel %vm2455_vm11, %v2457_v27, %v2453_v13  ;;  %4008 = vpow2.f32 %v1587_v18  ;;  %v2417_v60 = vsub.f32 1.0, %v2416_v57  ;;  %vm2540_vm14 = vweird.f32 %v6688_v61 }
 0x2ae   : > { %v2973_v9 = vmul.f32 %v2458_v1, %v6562_v54  ;;  %v1464_v5 = vsub.f32 0.0, %v6700_v39  ;;  %v1462_v29 = vsub.f32 0.0, %v6703_v6  ;;  %v2546_v44 = vand.u32 2147483648, %v6688_v61 }
 0x2af   : > { %v4003_v38 = vpop.eup %4002  ;;  %vm2510_vm15 = vweird.f32 %v6691_v4  ;;  %v2514_v49 = vand.u32 2147483647, %v6691_v4  ;;  %v1463_v7 = vsub.f32 0.0, %v6709_v10  ;;  %v2418_v54 = vmul.f32 %v4001_v24, %v2417_v60 }
 0x2b0   : > { %v4005_v21 = vpop.eup %4004  ;;  %3058 = vst [vmem:[%s5947_s29 + $0x98] sm:$0xff] %v2973_v9  ;;  %vm2421_vm0 = vweird.f32 %v4001_v24  ;;  %v2536_v15 = vmul.f32 %v4003_v38, %v6688_v61  ;;  %vm6728_vm1 = vcmp.eq.f32.partialorder %v2544_v26, 8.507059e+37  ;;  %v1603_v30 = vmul.f32 1.442695, %v1464_v5 }
 0x2b1   : > { %v4007_v48 = vpop.eup %4006  ;;  %v2506_v58 = vmul.f32 %v4005_v21, %v6691_v4  ;;  %v2516_v56 = vand.u32 2147483648, %v6691_v4  ;;  %v1599_v59 = vmul.f32 1.442695, %v1462_v29  ;;  %v6735_v37 = vadd.f32 %v1195_v41, %v5769_v2  ;;  %vm2422_vm2 = vmor %vm2420_vm12, %vm2421_vm0 }
 0x2b2   : > { %v2419_v19 = vadd.f32 %v4001_v24, %v2418_v54  ;;  %v2537_v20 = vsub.f32 1.0, %v2536_v15  ;;  %v6737_v50 = vadd.f32 1.0, %v4007_v48  ;;  %4010 = vpow2.f32 %v1603_v30 }
 0x2b3   : > { %v4009_v8 = vpop.eup %4008  ;;  %v2507_v51 = vsub.f32 1.0, %v2506_v58  ;;  %4012 = vpow2.f32 %v1599_v59  ;;  %v1601_v35 = vmul.f32 1.442695, %v1463_v7  ;;  %v6743_v46 = vadd.f32 %v1393_v0, %v5668_v53 }
 0x2b4   : > { %v2423_v36 = vsel %vm2422_vm2, %v4001_v24, %v2419_v19  ;;  %v2538_v3 = vmul.f32 %v4003_v38, %v2537_v20  ;;  %vm2541_vm3 = vweird.f32 %v4003_v38  ;;  %4014 = vrcp.f32 %v6737_v50 }
 0x2b5   : > { %v2428_v47 = vsel %vm6714_vm13, %v2427_v40, %v2423_v36  ;;  %v2547_v62 = vor.u32 1.1754944e-38, %v2546_v44  ;;  %v2508_v42 = vmul.f32 %v4005_v21, %v2507_v51  ;;  %vm2511_vm4 = vweird.f32 %v4005_v21  ;;  %vm2542_vm6 = vmor %vm2540_vm14, %vm2541_vm3 }
 0x2b6   : > { %v2971_v32 = vmul.f32 %v2428_v47, %v6583_v25  ;;  %v2539_v11 = vadd.f32 %v4003_v38, %v2538_v3  ;;  %vm6749_vm5 = vcmp.eq.f32.partialorder %v2514_v49, 8.507059e+37  ;;  %v6753_v18 = vadd.f32 1.0, %v4009_v8  ;;  %vm2512_vm7 = vmor %vm2510_vm15, %vm2511_vm4 }
 0x2b7   : > { %v2509_v23 = vadd.f32 %v4005_v21, %v2508_v42  ;;  %v2517_v24 = vor.u32 1.1754944e-38, %v2516_v56  ;;  %4016 = vpow2.f32 %v1601_v35  ;;  %v6758_v27 = vadd.f32 %v1263_v14, %v5759_v33 }
 0x2b8   : > { %v4011_v13 = vpop.eup %4010  ;;  %3026 = vst [vmem:[%s5484_s7 + $0x98] sm:$0xff] %v2971_v32  ;;  %v2543_v57 = vsel %vm2542_vm6, %v4003_v38, %v2539_v11  ;;  %4018 = vrcp.f32 %v6753_v18  ;;  %v1461_v25 = vsub.f32 0.0, %v6735_v37  ;;  %v1469_v26 = vsub.f32 0.0, %v6743_v46 }
 0x2b9   : > { %v4013_v61 = vpop.eup %4012  ;;  %v2548_v1 = vsel %vm6728_vm1, %v2547_v62, %v2543_v57  ;;  %v2513_v43 = vsel %vm2512_vm7, %v4005_v21, %v2509_v23  ;;  %v2529_v40 = vand.u32 2147483647, %v6737_v50  ;;  %v6769_v9 = vadd.f32 1.0, %v4011_v13 }
 0x2ba   : > { %v4015_v60 = vpop.eup %4014  ;;  %v2979_v4 = vmul.f32 %v2548_v1, %v6593_v55  ;;  %v2518_v5 = vsel %vm6749_vm5, %v2517_v24, %v2513_v43  ;;  %v2531_v29 = vand.u32 2147483648, %v6737_v50  ;;  %v6775_v41 = vadd.f32 1.0, %v4013_v61 }
 0x2bb   : > { %v2977_v38 = vmul.f32 %v2518_v5, %v6596_v17  ;;  %v2521_v44 = vmul.f32 %v4015_v60, %v6737_v50  ;;  %vm2525_vm8 = vweird.f32 %v6737_v50  ;;  %v2499_v49 = vand.u32 2147483647, %v6753_v18  ;;  %v1198_v17 = vpop.f32.mrf.mxu1 }
 0x2bc   : > { %v3082_v7 = vmul.f32 %v5816_v31, %v2979_v4  ;;  %v3132_v21 = vmul.f32 %v5825_v22, %v2979_v4  ;;  %v2501_v55 = vand.u32 2147483648, %v6753_v18  ;;  %4020 = vrcp.f32 %v6769_v9 }
 0x2bd   : > { %v4017_v54 = vpop.eup %4016  ;;  %3059 = vst [vmem:[%s5947_s29 + $0xa0] sm:$0xff] %v2977_v38  ;;  %v2522_v15 = vsub.f32 1.0, %v2521_v44  ;;  %vm6786_vm9 = vcmp.eq.f32.partialorder %v2529_v40, 8.507059e+37  ;;  %4022 = vrcp.f32 %v6775_v41  ;;  %v1597_v52 = vmul.f32 1.442695, %v1461_v25  ;;  %v1328_v25 = vpop.f32.mrf.mxu3 }
 0x2be   : > { %v4019_v30 = vpop.eup %4018  ;;  %v3099_v0 = vadd.f32 %v5818_v45, %v3082_v7  ;;  %v3149_v48 = vadd.f32 %v5827_v34, %v3132_v21  ;;  %v2532_v58 = vor.u32 1.1754944e-38, %v2531_v29  ;;  %vm2495_vm10 = vweird.f32 %v6753_v18 }
 0x2bf   : > { %v2523_v56 = vmul.f32 %v4015_v60, %v2522_v15  ;;  %vm2526_vm11 = vweird.f32 %v4015_v60  ;;  %v2491_v59 = vmul.f32 %v4019_v30, %v6753_v18  ;;  %vm6795_vm12 = vcmp.eq.f32.partialorder %v2499_v49, 8.507059e+37 }
 0x2c0   : > { %v2619_v20 = vand.u32 2147483647, %v6769_v9  ;;  %3115 = vst [vmem:[%s5924_s2 + $0x50] sm:$0xff] %v3099_v0  ;;  %v2502_v8 = vor.u32 1.1754944e-38, %v2501_v55  ;;  %v2621_v51 = vand.u32 2147483648, %v6769_v9  ;;  %v6803_v36 = vadd.f32 1.0, %v4017_v54  ;;  %vm2527_vm14 = vmor %vm2525_vm8, %vm2526_vm11 }
 0x2c1   : > { %v2589_v35 = vand.u32 2147483647, %v6775_v41  ;;  %3165 = vst [vmem:[%s5933_s20 + $0x50] sm:$0xff] %v3149_v48  ;;  %v2524_v3 = vadd.f32 %v4015_v60, %v2523_v56  ;;  %v2492_v14 = vsub.f32 1.0, %v2491_v59  ;;  %vm2615_vm13 = vweird.f32 %v6769_v9 }
 0x2c2   : > { %4024 = vpow2.f32 %v1597_v52  ;;  %v4021_v47 = vpop.eup %4020  ;;  %vm2496_vm15 = vweird.f32 %v4019_v30  ;;  %vm2585_vm0 = vweird.f32 %v6775_v41  ;;  %v1613_v62 = vmul.f32 1.442695, %v1469_v26 }
 0x2c3   : > { %4026 = vrcp.f32 %v6803_v36  ;;  %v4023_v42 = vpop.eup %4022  ;;  %v2528_v32 = vsel %vm2527_vm14, %v4015_v60, %v2524_v3  ;;  %v2493_v11 = vmul.f32 %v4019_v30, %v2492_v14  ;;  %v2611_v63 = vmul.f32 %v4021_v47, %v6769_v9  ;;  %vm2497_vm3 = vmor %vm2495_vm10, %vm2496_vm15 }
 0x2c4   : > { %vm6813_vm1 = vcmp.eq.f32.partialorder %v2619_v20, 8.507059e+37  ;;  %v2533_v50 = vsel %vm6786_vm9, %v2532_v58, %v2528_v32  ;;  %v2622_v24 = vor.u32 1.1754944e-38, %v2621_v51  ;;  %v2581_v13 = vmul.f32 %v4023_v42, %v6775_v41  ;;  %v1396_v51 = vpop.f32.mrf.mxu0 }
 0x2c5   : > { %vm6820_vm2 = vcmp.eq.f32.partialorder %v2589_v35, 8.507059e+37  ;;  %v2978_v26 = vmul.f32 %v2533_v50, %v6666_v16  ;;  %v2494_v61 = vadd.f32 %v4019_v30, %v2493_v11  ;;  %v2612_v1 = vsub.f32 1.0, %v2611_v63 }
 0x2c6   : > { %v2591_v43 = vand.u32 2147483648, %v6775_v41  ;;  %vm2616_vm4 = vweird.f32 %v4021_v47  ;;  %v2582_v40 = vsub.f32 1.0, %v2581_v13  ;;  %4028 = vpow2.f32 %v1613_v62 }
 0x2c7   : > { %v1467_v60 = vsub.f32 0.0, %v6758_v27  ;;  %3060 = vst [vmem:[%s5947_s29 + $0xa8] sm:$0xff] %v2978_v26  ;;  %v2498_v5 = vsel %vm2497_vm3, %v4019_v30, %v2494_v61  ;;  %v2613_v29 = vmul.f32 %v4021_v47, %v2612_v1  ;;  %vm2586_vm5 = vweird.f32 %v4023_v42  ;;  %vm2617_vm6 = vmor %vm2615_vm13, %vm2616_vm4  ;;  %v1331_v26 = vpop.f32.mrf.mxu3 }
 0x2c8   : > { %v4025_v4 = vpop.eup %4024  ;;  %v6832_v16 = vadd.f32 %v1328_v25, %v5766_v28  ;;  %v2503_v44 = vsel %vm6795_vm12, %v2502_v8, %v2498_v5  ;;  %v2583_v18 = vmul.f32 %v4023_v42, %v2582_v40  ;;  %v2592_v54 = vor.u32 1.1754944e-38, %v2591_v43  ;;  %vm2587_vm7 = vmor %vm2585_vm0, %vm2586_vm5  ;;  %v1266_v25 = vpop.f32.mrf.mxu2 }
 0x2c9   : > { %v4027_v38 = vpop.eup %4026  ;;  %v6836_v49 = vadd.f32 1.0, %v4025_v4  ;;  %v1609_v7 = vmul.f32 1.442695, %v1467_v60  ;;  %v2976_v21 = vmul.f32 %v2503_v44, %v6669_v12  ;;  %v2614_v55 = vadd.f32 %v4021_v47, %v2613_v29 }
 0x2ca   : > { %v2596_v15 = vmul.f32 %v4027_v38, %v6803_v36  ;;  %v2584_v52 = vadd.f32 %v4023_v42, %v2583_v18  ;;  %v2604_v30 = vand.u32 2147483647, %v6803_v36  ;;  %v2606_v0 = vand.u32 2147483648, %v6803_v36 }
 0x2cb   : > { %4030 = vrcp.f32 %v6836_v49  ;;  %3028 = vst [vmem:[%s5484_s7 + $0xa8] sm:$0xff] %v2976_v21  ;;  %v2618_v48 = vsel %vm2617_vm6, %v4021_v47, %v2614_v55  ;;  %vm2600_vm8 = vweird.f32 %v6803_v36  ;;  %v1468_v59 = vsub.f32 0.0, %v6832_v16 }
 0x2cc   : > { %v2597_v12 = vsub.f32 1.0, %v2596_v15  ;;  %4032 = vpow2.f32 %v1609_v7  ;;  %v4029_v58 = vpop.eup %4028  ;;  %v2623_v9 = vsel %vm6813_vm1, %v2622_v24, %v2618_v48  ;;  %v2588_v56 = vsel %vm2587_vm7, %v4023_v42, %v2584_v52  ;;  %v1201_v15 = vpop.f32.mrf.mxu1 }
 0x2cd   : > { %v6855_v19 = vadd.f32 %v1198_v17, %v5769_v2  ;;  %v2984_v20 = vmul.f32 %v2623_v9, %v6700_v39  ;;  %v2593_v41 = vsel %vm6820_vm2, %v2592_v54, %v2588_v56  ;;  %vm2601_vm9 = vweird.f32 %v4027_v38 }
 0x2ce   : > { %v2598_v8 = vmul.f32 %v4027_v38, %v2597_v12  ;;  %v2982_v35 = vmul.f32 %v2593_v41, %v6703_v6  ;;  %vm6861_vm10 = vcmp.eq.f32.partialorder %v2604_v30, 8.507059e+37  ;;  %v2607_v14 = vor.u32 1.1754944e-38, %v2606_v0  ;;  %vm2602_vm11 = vmor %vm2600_vm8, %vm2601_vm9  ;;  %v1399_v0 = vpop.f32.mrf.mxu0 }
 0x2cf   : > { %v6865_v47 = vadd.f32 1.0, %v4029_v58  ;;  %v3083_v62 = vmul.f32 %v5816_v31, %v2984_v20  ;;  %v3133_v42 = vmul.f32 %v5825_v22, %v2984_v20  ;;  %v1611_v32 = vmul.f32 1.442695, %v1468_v59 }
 0x2d0   : > { %v2599_v39 = vadd.f32 %v4027_v38, %v2598_v8  ;;  %3061 = vst [vmem:[%s5947_s29 + $0xb0] sm:$0xff] %v2982_v35  ;;  %v2574_v6 = vand.u32 2147483647, %v6836_v49  ;;  %v1466_v63 = vsub.f32 0.0, %v6855_v19  ;;  %v6876_v23 = vadd.f32 %v1396_v51, %v5668_v53 }
 0x2d1   : > { %v4031_v11 = vpop.eup %4030  ;;  %4034 = vrcp.f32 %v6865_v47  ;;  %v3100_v24 = vadd.f32 %v5818_v45, %v3083_v62  ;;  %v3150_v13 = vadd.f32 %v5827_v34, %v3133_v42  ;;  %vm2570_vm12 = vweird.f32 %v6836_v49 }
 0x2d2   : > { %v4033_v50 = vpop.eup %4032  ;;  %v2603_v57 = vsel %vm2602_vm11, %v4027_v38, %v2599_v39  ;;  %v2566_v36 = vmul.f32 %v4031_v11, %v6836_v49  ;;  %v2576_v1 = vand.u32 2147483648, %v6836_v49  ;;  %v2694_v43 = vand.u32 2147483647, %v6865_v47 }
 0x2d3   : > { %v2608_v61 = vsel %vm6861_vm10, %v2607_v14, %v2603_v57  ;;  %3116 = vst [vmem:[%s5924_s2 + $0x58] sm:$0xff] %v3100_v24  ;;  %v6888_v4 = vadd.f32 1.0, %v4033_v50  ;;  %4036 = vpow2.f32 %v1611_v32  ;;  %v1607_v5 = vmul.f32 1.442695, %v1466_v63 }
 0x2d4   : > { %v2983_v40 = vmul.f32 %v2608_v61, %v6709_v10  ;;  %v2567_v60 = vsub.f32 1.0, %v2566_v36  ;;  %3166 = vst [vmem:[%s5933_s20 + $0x58] sm:$0xff] %v3150_v13  ;;  %v1474_v29 = vsub.f32 0.0, %v6876_v23  ;;  %v6893_v38 = vadd.f32 %v1266_v25, %v5759_v33 }
 0x2d5   : > { %v6896_v44 = vadd.f32 %v1331_v26, %v5766_v28  ;;  %vm2571_vm13 = vweird.f32 %v4031_v11  ;;  %vm6899_vm14 = vcmp.eq.f32.partialorder %v2574_v6, 8.507059e+37  ;;  %4038 = vrcp.f32 %v6888_v4 }
 0x2d6   : > { %3062 = vst [vmem:[%s5947_s29 + $0xb8] sm:$0xff] %v2983_v40  ;;  %v2568_v18 = vmul.f32 %v4031_v11, %v2567_v60  ;;  %v2577_v21 = vor.u32 1.1754944e-38, %v2576_v1  ;;  %4040 = vpow2.f32 %v1607_v5  ;;  %v1623_v55 = vmul.f32 1.442695, %v1474_v29  ;;  %vm2572_vm0 = vmor %vm2570_vm12, %vm2571_vm13 }
 0x2d7   : > { %v4035_v10 = vpop.eup %4034  ;;  %v1472_v54 = vsub.f32 0.0, %v6893_v38  ;;  %vm2690_vm15 = vweird.f32 %v6865_v47  ;;  %v2696_v30 = vand.u32 2147483648, %v6865_v47  ;;  %vm6910_vm1 = vcmp.eq.f32.partialorder %v2694_v43, 8.507059e+37 }
 0x2d8   : > { %v2569_v17 = vadd.f32 %v4031_v11, %v2568_v18  ;;  %v2686_v52 = vmul.f32 %v4035_v10, %v6865_v47  ;;  %4042 = vpow2.f32 %v1623_v55  ;;  %v1473_v58 = vsub.f32 0.0, %v6896_v44 }
 0x2d9   : > { %v1619_v12 = vmul.f32 1.442695, %v1472_v54  ;;  %v4037_v9 = vpop.eup %4036  ;;  %v2664_v20 = vand.u32 2147483647, %v6888_v4  ;;  %v6917_v41 = vadd.f32 %v1201_v15, %v5769_v2  ;;  %v6924_v51 = vadd.f32 %v1399_v0, %v5668_v53  ;;  %v1269_v0 = vpop.f32.mrf.mxu2 }
 0x2da   : > { %v2573_v56 = vsel %vm2572_vm0, %v4031_v11, %v2569_v17  ;;  %v2687_v59 = vsub.f32 1.0, %v2686_v52  ;;  %v6921_v8 = vadd.f32 1.0, %v4037_v9  ;;  %vm2691_vm2 = vweird.f32 %v4035_v10 }
 0x2db   : > { %v2578_v49 = vsel %vm6899_vm14, %v2577_v21, %v2573_v56  ;;  %4044 = vpow2.f32 %v1619_v12  ;;  %v4039_v35 = vpop.eup %4038  ;;  %v1471_v62 = vsub.f32 0.0, %v6917_v41  ;;  %v2697_v39 = vor.u32 1.1754944e-38, %v2696_v30  ;;  %vm2692_vm4 = vmor %vm2690_vm15, %vm2691_vm2 }
 0x2dc   : > { %v2981_v3 = vmul.f32 %v2578_v49, %v6735_v37  ;;  %v2688_v14 = vmul.f32 %v4035_v10, %v2687_v59  ;;  %v4041_v42 = vpop.eup %4040  ;;  %v2656_v32 = vmul.f32 %v4039_v35, %v6888_v4  ;;  %4046 = vrcp.f32 %v6921_v8 }
 0x2dd   : > { %v1621_v11 = vmul.f32 1.442695, %v1473_v58  ;;  %vm2660_vm3 = vweird.f32 %v6888_v4  ;;  %v2666_v63 = vand.u32 2147483648, %v6888_v4  ;;  %v6933_v50 = vadd.f32 1.0, %v4041_v42 }
 0x2de   : > { %3030 = vst [vmem:[%s5484_s7 + $0xb8] sm:$0xff] %v2981_v3  ;;  %v2689_v6 = vadd.f32 %v4035_v10, %v2688_v14  ;;  %v4043_v37 = vpop.eup %4042  ;;  %v2657_v24 = vsub.f32 1.0, %v2656_v32  ;;  %vm6937_vm5 = vcmp.eq.f32.partialorder %v2664_v20, 8.507059e+37  ;;  %v1617_v57 = vmul.f32 1.442695, %v1471_v62 }
 0x2df   : > { %v1479_v36 = vsub.f32 0.0, %v6924_v51  ;;  %vm2661_vm6 = vweird.f32 %v4039_v35  ;;  %v2679_v26 = vand.u32 2147483647, %v6921_v8  ;;  %4048 = vrcp.f32 %v6933_v50 }
 0x2e0   : > { %v2693_v25 = vsel %vm2692_vm4, %v4035_v10, %v2689_v6  ;;  %v2658_v47 = vmul.f32 %v4039_v35, %v2657_v24  ;;  %v2681_v43 = vand.u32 2147483648, %v6921_v8  ;;  %4050 = vpow2.f32 %v1621_v11  ;;  %vm2662_vm8 = vmor %vm2660_vm3, %vm2661_vm6 }
 0x2e1   : > { %v4045_v61 = vpop.eup %4044  ;;  %v2698_v1 = vsel %vm6910_vm1, %v2697_v39, %v2693_v25  ;;  %v2667_v60 = vor.u32 1.1754944e-38, %v2666_v63  ;;  %vm2675_vm7 = vweird.f32 %v6921_v8  ;;  %v6949_v5 = vadd.f32 1.0, %v4043_v37 }
 0x2e2   : > { %v2989_v40 = vmul.f32 %v2698_v1, %v6743_v46  ;;  %v4047_v29 = vpop.eup %4046  ;;  %v2659_v18 = vadd.f32 %v4039_v35, %v2658_v47  ;;  %v2649_v7 = vand.u32 2147483647, %v6933_v50  ;;  %4052 = vpow2.f32 %v1617_v57 }
 0x2e3   : > { %v1633_v10 = vmul.f32 1.442695, %v1479_v36  ;;  %v2671_v46 = vmul.f32 %v4047_v29, %v6921_v8  ;;  %vm6958_vm9 = vcmp.eq.f32.partialorder %v2679_v26, 8.507059e+37  ;;  %v6962_v15 = vadd.f32 1.0, %v4045_v61 }
 0x2e4   : > { %v3084_v21 = vmul.f32 %v5816_v31, %v2989_v40  ;;  %v3134_v55 = vmul.f32 %v5825_v22, %v2989_v40  ;;  %v2663_v17 = vsel %vm2662_vm8, %v4039_v35, %v2659_v18  ;;  %v2682_v52 = vor.u32 1.1754944e-38, %v2681_v43 }
 0x2e5   : > { %v2651_v30 = vand.u32 2147483648, %v6933_v50  ;;  %4054 = vrcp.f32 %v6949_v5  ;;  %v4049_v48 = vpop.eup %4048  ;;  %v2668_v58 = vsel %vm6937_vm5, %v2667_v60, %v2663_v17  ;;  %v2672_v9 = vsub.f32 1.0, %v2671_v46  ;;  %v1334_v17 = vpop.f32.mrf.mxu3 }
 0x2e6   : > { %v3101_v4 = vadd.f32 %v5818_v45, %v3084_v21  ;;  %v3151_v12 = vadd.f32 %v5827_v34, %v3134_v55  ;;  %v4051_v56 = vpop.eup %4050  ;;  %v2987_v59 = vmul.f32 %v2668_v58, %v6758_v27  ;;  %v2641_v20 = vmul.f32 %v4049_v48, %v6933_v50 }
 0x2e7   : > { %vm2645_vm10 = vweird.f32 %v6933_v50  ;;  %vm6973_vm11 = vcmp.eq.f32.partialorder %v2649_v7, 8.507059e+37  ;;  %v2673_v35 = vmul.f32 %v4047_v29, %v2672_v9  ;;  %vm2676_vm12 = vweird.f32 %v4047_v29 }
 0x2e8   : > { %3117 = vst [vmem:[%s5924_s2 + $0x60] sm:$0xff] %v3101_v4  ;;  %4056 = vrcp.f32 %v6962_v15  ;;  %v6980_v3 = vadd.f32 %v1269_v0, %v5759_v33  ;;  %v4053_v14 = vpop.eup %4052  ;;  %v2642_v62 = vsub.f32 1.0, %v2641_v20  ;;  %v2652_v27 = vor.u32 1.1754944e-38, %v2651_v30  ;;  %vm2677_vm14 = vmor %vm2675_vm7, %vm2676_vm12 }
 0x2e9   : > { %3167 = vst [vmem:[%s5933_s20 + $0x60] sm:$0xff] %v3151_v12  ;;  %v2769_v42 = vand.u32 2147483647, %v6949_v5  ;;  %v2771_v39 = vand.u32 2147483648, %v6949_v5  ;;  %v2674_v32 = vadd.f32 %v4047_v29, %v2673_v35  ;;  %vm2765_vm13 = vweird.f32 %v6949_v5 }
 0x2ea   : > { %3063 = vst [vmem:[%s5947_s29 + $0xc0] sm:$0xff] %v2987_v59  ;;  %v6987_v11 = vadd.f32 1.0, %v4051_v56  ;;  %v6989_v6 = vadd.f32 1.0, %v4053_v14  ;;  %v2643_v37 = vmul.f32 %v4049_v48, %v2642_v62  ;;  %vm2646_vm15 = vweird.f32 %v4049_v48  ;;  %v1204_v56 = vpop.f32.mrf.mxu1 }
 0x2eb   : > { %v4055_v63 = vpop.eup %4054  ;;  %v2739_v24 = vand.u32 2147483647, %v6962_v15  ;;  %4058 = vpow2.f32 %v1633_v10  ;;  %v2678_v13 = vsel %vm2677_vm14, %v4047_v29, %v2674_v32  ;;  %v2741_v36 = vand.u32 2147483648, %v6962_v15  ;;  %vm2647_vm2 = vmor %vm2645_vm10, %vm2646_vm15 }
 0x2ec   : > { %v2761_v57 = vmul.f32 %v4055_v63, %v6949_v5  ;;  %4060 = vrcp.f32 %v6987_v11  ;;  %v2683_v25 = vsel %vm6958_vm9, %v2682_v52, %v2678_v13  ;;  %v2644_v26 = vadd.f32 %v4049_v48, %v2643_v37 }
 0x2ed   : > { %vm7000_vm0 = vcmp.eq.f32.partialorder %v2769_v42, 8.507059e+37  ;;  %v2772_v61 = vor.u32 1.1754944e-38, %v2771_v39  ;;  %vm2735_vm1 = vweird.f32 %v6962_v15  ;;  %v2988_v47 = vmul.f32 %v2683_v25, %v6832_v16 }
 0x2ee   : > { %v4057_v1 = vpop.eup %4056  ;;  %v2762_v43 = vsub.f32 1.0, %v2761_v57  ;;  %v2756_v40 = vand.u32 2147483648, %v6987_v11  ;;  %4062 = vrcp.f32 %v6989_v6  ;;  %v2648_v60 = vsel %vm2647_vm2, %v4049_v48, %v2644_v26 }
 0x2ef   : > { %v2731_v29 = vmul.f32 %v4057_v1, %v6962_v15  ;;  %vm7011_vm3 = vcmp.eq.f32.partialorder %v2739_v24, 8.507059e+37  ;;  %v2754_v7 = vand.u32 2147483647, %v6987_v11  ;;  %3064 = vst [vmem:[%s5947_s29 + $0xc8] sm:$0xff] %v2988_v47  ;;  %v2653_v16 = vsel %vm6973_vm11, %v2652_v27, %v2648_v60 }
 0x2f0   : > { %v2763_v50 = vmul.f32 %v4055_v63, %v2762_v43  ;;  %vm2766_vm4 = vweird.f32 %v4055_v63  ;;  %v2742_v10 = vor.u32 1.1754944e-38, %v2741_v36  ;;  %v2986_v55 = vmul.f32 %v2653_v16, %v6855_v19 }
 0x2f1   : > { %v4059_v21 = vpop.eup %4058  ;;  %v2732_v46 = vsub.f32 1.0, %v2731_v29  ;;  %vm2736_vm5 = vweird.f32 %v4057_v1  ;;  %vm2750_vm6 = vweird.f32 %v6987_v11  ;;  %v2757_v54 = vor.u32 1.1754944e-38, %v2756_v40  ;;  %vm2767_vm7 = vmor %vm2765_vm13, %vm2766_vm4 }
 0x2f2   : > { %v4061_v52 = vpop.eup %4060  ;;  %v2764_v30 = vadd.f32 %v4055_v63, %v2763_v50  ;;  %v2724_v0 = vand.u32 2147483647, %v6989_v6  ;;  %v2726_v48 = vand.u32 2147483648, %v6989_v6  ;;  %v7023_v4 = vadd.f32 1.0, %v4059_v21  ;;  %3032 = vst [vmem:[%s5484_s7 + $0xc8] sm:$0xff] %v2986_v55  ;;  %vm2737_vm11 = vmor %vm2735_vm1, %vm2736_vm5 }
 0x2f3   : > { %v2733_v19 = vmul.f32 %v4057_v1, %v2732_v46  ;;  %v2746_v12 = vmul.f32 %v4061_v52, %v6987_v11  ;;  %vm7030_vm8 = vcmp.eq.f32.partialorder %v2754_v7, 8.507059e+37  ;;  %vm2720_vm9 = vweird.f32 %v6989_v6 }
 0x2f4   : > { %v1477_v9 = vsub.f32 0.0, %v6980_v3  ;;  %v4063_v59 = vpop.eup %4062  ;;  %v2768_v20 = vsel %vm2767_vm7, %v4055_v63, %v2764_v30  ;;  %vm2751_vm10 = vweird.f32 %v4061_v52  ;;  %4064 = vrcp.f32 %v7023_v4 }
 0x2f5   : > { %v7038_v5 = vadd.f32 %v1334_v17, %v5766_v28  ;;  %v2773_v49 = vsel %vm7000_vm0, %v2772_v61, %v2768_v20  ;;  %v2734_v35 = vadd.f32 %v4057_v1, %v2733_v19  ;;  %v2747_v14 = vsub.f32 1.0, %v2746_v12  ;;  %v1402_v61 = vpop.f32.mrf.mxu0  ;;  %vm2752_vm14 = vmor %vm2750_vm6, %vm2751_vm10 }
 0x2f6   : > { %v2716_v62 = vmul.f32 %v4063_v59, %v6989_v6  ;;  %v2994_v27 = vmul.f32 %v2773_v49, %v6876_v23  ;;  %vm2721_vm12 = vweird.f32 %v4063_v59  ;;  %vm7047_vm13 = vcmp.eq.f32.partialorder %v2724_v0, 8.507059e+37  ;;  %v1207_v6 = vpop.f32.mrf.mxu1 }
 0x2f7   : > { %v2727_v39 = vor.u32 1.1754944e-38, %v2726_v48  ;;  %v2738_v32 = vsel %vm2737_vm11, %v4057_v1, %v2734_v35  ;;  %v2748_v63 = vmul.f32 %v4061_v52, %v2747_v14  ;;  %v1629_v24 = vmul.f32 1.442695, %v1477_v9  ;;  %vm2722_vm0 = vmor %vm2720_vm9, %vm2721_vm12 }
 0x2f8   : > { %v2717_v37 = vsub.f32 1.0, %v2716_v62  ;;  %v3085_v13 = vmul.f32 %v5816_v31, %v2994_v27  ;;  %v3135_v57 = vmul.f32 %v5825_v22, %v2994_v27  ;;  %v2743_v23 = vsel %vm7011_vm3, %v2742_v10, %v2738_v32  ;;  %v1337_v10 = vpop.f32.mrf.mxu3 }
 0x2f9   : > { %v2844_v15 = vand.u32 2147483647, %v7023_v4  ;;  %v2992_v36 = vmul.f32 %v2743_v23, %v6893_v38  ;;  %v2749_v25 = vadd.f32 %v4061_v52, %v2748_v63  ;;  %v2846_v8 = vand.u32 2147483648, %v7023_v4  ;;  %v1272_v38 = vpop.f32.mrf.mxu2 }
 0x2fa   : > { %v2718_v26 = vmul.f32 %v4063_v59, %v2717_v37  ;;  %v4065_v1 = vpop.eup %4064  ;;  %v3102_v47 = vadd.f32 %v5818_v45, %v3085_v13  ;;  %v3152_v43 = vadd.f32 %v5827_v34, %v3135_v57  ;;  %4066 = vpow2.f32 %v1629_v24 }
 0x2fb   : > { %v1478_v40 = vsub.f32 0.0, %v7038_v5  ;;  %3065 = vst [vmem:[%s5947_s29 + $0xd0] sm:$0xff] %v2992_v36  ;;  %v2753_v60 = vsel %vm2752_vm14, %v4061_v52, %v2749_v25  ;;  %v2836_v18 = vmul.f32 %v4065_v1, %v7023_v4  ;;  %vm2841_vm15 = vweird.f32 %v4065_v1 }
 0x2fc   : > { %v2719_v29 = vadd.f32 %v4063_v59, %v2718_v26  ;;  %3118 = vst [vmem:[%s5924_s2 + $0x68] sm:$0xff] %v3102_v47  ;;  %v2758_v7 = vsel %vm7030_vm8, %v2757_v54, %v2753_v60  ;;  %v7073_v16 = vadd.f32 %v1204_v56, %v5769_v2  ;;  %v7076_v50 = vadd.f32 %v1402_v61, %v5668_v53 }
 0x2fd   : > { %v1631_v11 = vmul.f32 1.442695, %v1478_v40  ;;  %3168 = vst [vmem:[%s5933_s20 + $0x68] sm:$0xff] %v3152_v43  ;;  %v2993_v21 = vmul.f32 %v2758_v7, %v6896_v44  ;;  %v2837_v46 = vsub.f32 1.0, %v2836_v18  ;;  %v7081_v54 = vadd.f32 %v1272_v38, %v5759_v33 }
 0x2fe   : > { %v2723_v55 = vsel %vm2722_vm0, %v4063_v59, %v2719_v29  ;;  %v1476_v52 = vsub.f32 0.0, %v7073_v16  ;;  %v1484_v53 = vsub.f32 0.0, %v7076_v50  ;;  %v7091_v48 = vadd.f32 %v1337_v10, %v5766_v28 }
 0x2ff   : > { %v2728_v17 = vsel %vm7047_vm13, %v2727_v39, %v2723_v55  ;;  %4068 = vpow2.f32 %v1631_v11  ;;  %3066 = vst [vmem:[%s5947_s29 + $0xd8] sm:$0xff] %v2993_v21  ;;  %v2838_v0 = vmul.f32 %v4065_v1, %v2837_v46  ;;  %v1482_v44 = vsub.f32 0.0, %v7081_v54 }
 0x300   : > { %v2991_v30 = vmul.f32 %v2728_v17, %v6917_v41  ;;  %v4067_v33 = vpop.eup %4066  ;;  %vm2840_vm1 = vweird.f32 %v7023_v4  ;;  %v1627_v19 = vmul.f32 1.442695, %v1476_v52  ;;  %v1643_v12 = vmul.f32 1.442695, %v1484_v53 }
 0x301   : > { %v7095_v58 = vadd.f32 %v1207_v6, %v5769_v2  ;;  %v2839_v9 = vadd.f32 %v4065_v1, %v2838_v0  ;;  %v1717_v56 = vadd.f32 1.0, %v4067_v33  ;;  %v1639_v59 = vmul.f32 1.442695, %v1482_v44  ;;  %vm2842_vm2 = vmor %vm2840_vm1, %vm2841_vm15 }
 0x302   : > { %3034 = vst [vmem:[%s5484_s7 + $0xd8] sm:$0xff] %v2991_v30  ;;  %v1483_v41 = vsub.f32 0.0, %v7091_v48  ;;  %v2847_v20 = vor.u32 1.1754944e-38, %v2846_v8  ;;  %4070 = vpow2.f32 %v1627_v19  ;;  %vm2845_vm3 = vcmp.eq.f32.partialorder %v2844_v15, 8.507059e+37 }
 0x303   : > { %v2843_v28 = vsel %vm2842_vm2, %v4065_v1, %v2839_v9  ;;  %4072 = vrcp.f32 %v1717_v56  ;;  %v1481_v2 = vsub.f32 0.0, %v7095_v58  ;;  %v2814_v15 = vand.u32 2147483647, %v1717_v56 }
 0x304   : > { %v2848_v4 = vsel %vm2845_vm3, %v2847_v20, %v2843_v28  ;;  %4074 = vpow2.f32 %v1643_v12  ;;  %v1641_v35 = vmul.f32 1.442695, %v1483_v41  ;;  %v2816_v36 = vand.u32 2147483648, %v1717_v56 }
 0x305   : > { %v4069_v49 = vpop.eup %4068  ;;  %v2999_v14 = vmul.f32 %v2848_v4, %v6924_v51  ;;  %4076 = vpow2.f32 %v1639_v59  ;;  %v1637_v32 = vmul.f32 1.442695, %v1481_v2  ;;  %vm2810_vm4 = vweird.f32 %v1717_v56 }
 0x306   : > { %v7102_v62 = vadd.f32 1.0, %v4069_v49  ;;  %4078 = vpow2.f32 %v1641_v35  ;;  %vm7124_vm6 = vcmp.eq.f32.partialorder %v2814_v15, 8.507059e+37  ;;  %v2817_v10 = vor.u32 1.1754944e-38, %v2816_v36 }
 0x307   : > { %v3086_v27 = vmul.f32 %v5816_v31, %v2999_v14  ;;  %v3136_v42 = vmul.f32 %v5825_v22, %v2999_v14 }
 0x308   : > { %4080 = vrcp.f32 %v7102_v62  ;;  %v4071_v39 = vpop.eup %4070  ;;  %v2829_v47 = vand.u32 2147483647, %v7102_v62  ;;  %v2831_v43 = vand.u32 2147483648, %v7102_v62  ;;  %vm2825_vm7 = vweird.f32 %v7102_v62 }
 0x309   : > { %v4073_v63 = vpop.eup %4072  ;;  %v3103_v37 = vadd.f32 %v5818_v45, %v3086_v27  ;;  %v3153_v24 = vadd.f32 %v5827_v34, %v3136_v42  ;;  %v7109_v51 = vadd.f32 1.0, %v4071_v39 }
 0x30a   : > { %v4075_v13 = vpop.eup %4074  ;;  %v2806_v57 = vmul.f32 %v4073_v63, %v1717_v56  ;;  %vm2811_vm5 = vweird.f32 %v4073_v63  ;;  %vm7135_vm9 = vcmp.eq.f32.partialorder %v2829_v47, 8.507059e+37  ;;  %v2832_v6 = vor.u32 1.1754944e-38, %v2831_v43 }
 0x30b   : > { %v4077_v23 = vpop.eup %4076  ;;  %3119 = vst [vmem:[%s5924_s2 + $0x70] sm:$0xff] %v3103_v37  ;;  %4082 = vrcp.f32 %v7109_v51  ;;  %v7114_v8 = vadd.f32 1.0, %v4075_v13  ;;  %v2799_v18 = vand.u32 2147483647, %v7109_v51  ;;  %v2801_v7 = vand.u32 2147483648, %v7109_v51  ;;  %vm2812_vm8 = vmor %vm2810_vm4, %vm2811_vm5 }
 0x30c   : > { %v4079_v25 = vpop.eup %4078  ;;  %3169 = vst [vmem:[%s5933_s20 + $0x70] sm:$0xff] %v3153_v24  ;;  %v2807_v26 = vsub.f32 1.0, %v2806_v57  ;;  %v7116_v61 = vadd.f32 1.0, %v4077_v23  ;;  %4084 = vpow2.f32 %v1637_v32  ;;  %vm2795_vm10 = vweird.f32 %v7109_v51 }
 0x30d   : > { %v7120_v40 = vadd.f32 1.0, %v4079_v25  ;;  %4086 = vrcp.f32 %v7114_v8  ;;  %vm7146_vm12 = vcmp.eq.f32.partialorder %v2799_v18, 8.507059e+37  ;;  %v2802_v33 = vor.u32 1.1754944e-38, %v2801_v7 }
 0x30e   : > { %v4081_v1 = vpop.eup %4080  ;;  %v2808_v38 = vmul.f32 %v4073_v63, %v2807_v26  ;;  %4088 = vrcp.f32 %v7116_v61  ;;  %v2921_v19 = vand.u32 2147483648, %v7114_v8  ;;  %vm2915_vm13 = vweird.f32 %v7114_v8 }
 0x30f   : > { %v2821_v60 = vmul.f32 %v4081_v1, %v7102_v62  ;;  %4090 = vrcp.f32 %v7120_v40  ;;  %vm2826_vm11 = vweird.f32 %v4081_v1  ;;  %v2919_v28 = vand.u32 2147483647, %v7114_v8 }
 0x310   : > { %v2809_v11 = vadd.f32 %v4073_v63, %v2808_v38  ;;  %vm2827_vm14 = vmor %vm2825_vm7, %vm2826_vm11  ;;  %vm2885_vm15 = vweird.f32 %v7116_v61  ;;  %v2922_v27 = vor.u32 1.1754944e-38, %v2921_v19  ;;  %v2889_v42 = vand.u32 2147483647, %v7116_v61 }
 0x311   : > { %v2822_v21 = vsub.f32 1.0, %v2821_v60  ;;  %v4083_v55 = vpop.eup %4082  ;;  %v2904_v36 = vand.u32 2147483647, %v7120_v40  ;;  %v2906_v25 = vand.u32 2147483648, %v7120_v40 }
 0x312   : > { %v4085_v17 = vpop.eup %4084  ;;  %v2813_v52 = vsel %vm2812_vm8, %v4073_v63, %v2809_v11  ;;  %v2791_v30 = vmul.f32 %v4083_v55, %v7109_v51  ;;  %vm2796_vm0 = vweird.f32 %v4083_v55  ;;  %vm2890_vm8 = vcmp.eq.f32.partialorder %v2889_v42, 8.507059e+37 }
 0x313   : > { %v2823_v53 = vmul.f32 %v4081_v1, %v2822_v21  ;;  %v2818_v0 = vsel %vm7124_vm6, %v2817_v10, %v2813_v52  ;;  %v4087_v12 = vpop.eup %4086  ;;  %v7160_v49 = vadd.f32 1.0, %v4085_v17  ;;  %vm2797_vm1 = vmor %vm2795_vm10, %vm2796_vm0  ;;  %vm2920_vm6 = vcmp.eq.f32.partialorder %v2919_v28, 8.507059e+37 }
 0x314   : > { %v2997_v9 = vmul.f32 %v2818_v0, %v6980_v3  ;;  %v2792_v59 = vsub.f32 1.0, %v2791_v30  ;;  %v7153_v41 = vpop.eup %4088  ;;  %v2911_v20 = vmul.f32 %v4087_v12, %v7114_v8  ;;  %vm2916_vm2 = vweird.f32 %v4087_v12 }
 0x315   : > { %v2824_v56 = vadd.f32 %v4081_v1, %v2823_v53  ;;  %v2881_v35 = vmul.f32 %v7153_v41, %v7116_v61  ;;  %v7168_v2 = vpop.eup %4090  ;;  %4092 = vrcp.f32 %v7160_v49  ;;  %vm2886_vm3 = vweird.f32 %v7153_v41  ;;  %vm2917_vm4 = vmor %vm2915_vm13, %vm2916_vm2 }
 0x316   : > { %3067 = vst [vmem:[%s5947_s29 + $0xe0] sm:$0xff] %v2997_v9  ;;  %v2793_v4 = vmul.f32 %v4083_v55, %v2792_v59  ;;  %v2912_v62 = vsub.f32 1.0, %v2911_v20  ;;  %v2896_v37 = vmul.f32 %v7168_v2, %v7120_v40  ;;  %vm2901_vm5 = vweird.f32 %v7168_v2  ;;  %vm2887_vm7 = vmor %vm2885_vm15, %vm2886_vm3 }
 0x317   : > { %v2828_v3 = vsel %vm2827_vm14, %v4081_v1, %v2824_v56  ;;  %v2882_v63 = vsub.f32 1.0, %v2881_v35  ;;  %vm2905_vm11 = vcmp.eq.f32.partialorder %v2904_v36, 8.507059e+37  ;;  %vm2870_vm13 = vweird.f32 %v7160_v49 }
 0x318   : > { %v2833_v14 = vsel %vm7135_vm9, %v2832_v6, %v2828_v3  ;;  %v2794_v32 = vadd.f32 %v4083_v55, %v2793_v4  ;;  %v2913_v24 = vmul.f32 %v4087_v12, %v2912_v62  ;;  %v2897_v23 = vsub.f32 1.0, %v2896_v37 }
 0x319   : > { %v2998_v39 = vmul.f32 %v2833_v14, %v7038_v5  ;;  %v2891_v5 = vand.u32 2147483648, %v7116_v61  ;;  %v2883_v57 = vmul.f32 %v7153_v41, %v2882_v63  ;;  %vm2900_vm9 = vweird.f32 %v7120_v40 }
 0x31a   : > { %v2798_v13 = vsel %vm2797_vm1, %v4083_v55, %v2794_v32  ;;  %v2914_v15 = vadd.f32 %v4087_v12, %v2913_v24  ;;  %v2898_v47 = vmul.f32 %v7168_v2, %v2897_v23  ;;  %vm2902_vm10 = vmor %vm2900_vm9, %vm2901_vm5  ;;  %v2907_v40 = vor.u32 1.1754944e-38, %v2906_v25 }
 0x31b   : > { %3068 = vst [vmem:[%s5947_s29 + $0xe8] sm:$0xff] %v2998_v39  ;;  %v2803_v51 = vsel %vm7146_vm12, %v2802_v33, %v2798_v13  ;;  %v2884_v1 = vadd.f32 %v7153_v41, %v2883_v57  ;;  %v7226_v61 = vpop.eup %4092 }
 0x31c   : > { %v2996_v26 = vmul.f32 %v2803_v51, %v7073_v16  ;;  %v2918_v43 = vsel %vm2917_vm4, %v4087_v12, %v2914_v15  ;;  %v2892_v16 = vor.u32 1.1754944e-38, %v2891_v5  ;;  %v2899_v60 = vadd.f32 %v7168_v2, %v2898_v47 }
 0x31d   : > { %v2923_v8 = vsel %vm2920_vm6, %v2922_v27, %v2918_v43  ;;  %v2888_v38 = vsel %vm2887_vm7, %v7153_v41, %v2884_v1  ;;  %vm2871_vm12 = vweird.f32 %v7226_v61 }
 0x31e   : > { %3036 = vst [vmem:[%s5484_s7 + $0xe8] sm:$0xff] %v2996_v26  ;;  %v3004_v29 = vmul.f32 %v2923_v8, %v7076_v50  ;;  %v2893_v18 = vsel %vm2890_vm8, %v2892_v16, %v2888_v38  ;;  %v2903_v11 = vsel %vm2902_vm10, %v7168_v2, %v2899_v60  ;;  %v2866_v50 = vmul.f32 %v7226_v61, %v7160_v49  ;;  %vm7268_vm14 = vmor %vm2870_vm13, %vm2871_vm12 }
 0x31f   : > { %v3002_v7 = vmul.f32 %v2893_v18, %v7081_v54  ;;  %v2908_v55 = vsel %vm2905_vm11, %v2907_v40, %v2903_v11 }
 0x320   : > { %v3087_v10 = vmul.f32 %v5816_v31, %v3004_v29  ;;  %v3137_v21 = vmul.f32 %v5825_v22, %v3004_v29  ;;  %v3003_v54 = vmul.f32 %v2908_v55, %v7091_v48  ;;  %v2867_v46 = vsub.f32 1.0, %v2866_v50 }
 0x321   : > { %3069 = vst [vmem:[%s5947_s29 + $0xf0] sm:$0xff] %v3002_v7  ;;  %v2876_v31 = vand.u32 2147483648, %v7160_v49  ;;  %v2874_v48 = vand.u32 2147483647, %v7160_v49 }
 0x322   : > { %v3104_v6 = vadd.f32 %v5818_v45, %v3087_v10  ;;  %v3154_v17 = vadd.f32 %v5827_v34, %v3137_v21  ;;  %3070 = vst [vmem:[%s5947_s29 + $0xf8] sm:$0xff] %v3003_v54  ;;  %v2868_v22 = vmul.f32 %v7226_v61, %v2867_v46  ;;  %s7591_s29 = sand.u32 1, %s4520_s17  }
 0x323   : > { %v2877_v52 = vor.u32 1.1754944e-38, %v2876_v31  ;;  %s7274_s13 = scalar_lea.sflag [#allocation12], %s7591_s29 }
 0x324   : > { %3120 = vst [vmem:[%s5924_s2 + $0x78] sm:$0xff] %v3104_v6  ;;  %v2869_v45 = vadd.f32 %v7226_v61, %v2868_v22  ;;  %s4232_s2 = sshra.s32 %s7217_s14, 4  ;;  %s4233_s2 = int_to_ptr.hbm [resolvable:$true] %s4232_s2 }
 0x325   : > { %3170 = vst [vmem:[%s5933_s20 + $0x78] sm:$0xff] %v3154_v17  ;;  %s4234_s27 = scalar_lea.hbm %s4233_s2, 256  ;;  %p4239_p10 = scmp.lt.s32.totalorder %s4233_s2, %s7584_s18 }
 0x326   : > { %p4235_p1 = scmp.ne.s32.totalorder %s4233_s2, %s4234_s27  ;;  %p4240_p11 = scmp.lt.s32.totalorder %s4238_s25, %s4234_s27 }
 0x328   : > { %p4236_p4 = pnand %p4235_p1, %p4581_p3  ;;  %p4241_p12 = por %p4240_p11, %p4239_p10 }
 0x32a   : > { %p4237_p8 = pneg %p4236_p4 }
 0x32c   : > { %p4242_p13 = pnand %p4241_p12, %p4237_p8 }
 0x32e   : > { %4245 = shalt.err (!%p4242_p13)
}
 0x32f   : > { %s7401_s17 = smov 256   ;;  %s4426_s29 = smov 16   ;;  %v2873_v53 = vsel %vm7268_vm14, %v7226_v61, %v2869_v45  ;;  %vm7296_vm15 = vcmp.eq.f32.partialorder %v2874_v48, 8.507059e+37 }
 0x330   : > { %3592 = dma.vmem_to_hbm [thread:$0]  (%p4581_p3), %s7211_s9, 4096, %s7217_s14, %s7274_s13, %s7401_s17, %s7401_s17, %s4426_s29  }
 0x331   : > { %s4260_s0 = sshra.s32 %s7259_s8, 4  ;;  %s4266_s2 = scalar_lea.hbm %s7586_s22, 512  ;;  %s4261_s0 = int_to_ptr.hbm [resolvable:$true] %s4260_s0 }
 0x332   : > { %s4262_s4 = scalar_lea.hbm %s4261_s0, 128  ;;  %p4267_p9 = scmp.lt.s32.totalorder %s4261_s0, %s7586_s22 }
 0x333   : > { %p4263_p0 = scmp.ne.s32.totalorder %s4261_s0, %s4262_s4  ;;  %p4268_p2 = scmp.lt.s32.totalorder %s4266_s2, %s4262_s4 }
 0x335   : > { %p4264_p5 = pnand %p4263_p0, %p4581_p3  ;;  %p4269_p1 = por %p4268_p2, %p4267_p9 }
 0x337   : > { %p4265_p7 = pneg %p4264_p5 }
 0x339   : > { %p4270_p4 = pnand %p4269_p1, %p4265_p7 }
 0x33b   : > { %4273 = shalt.err (!%p4270_p4)
}
 0x33c   : > { %s4427_s27 = smov 128   ;;  %s4428_s20 = smov 8   ;;  %v2878_v0 = vsel %vm7296_vm15, %v2877_v52, %v2873_v53 }
 0x33d   : > { %3593 = dma.vmem_to_hbm [thread:$0]  (%p4581_p3), %s7248_s6, 2048, %s7259_s8, %s7274_s13, %s4427_s27, %s4427_s27, %s4428_s20  }
 0x33e   : > { %s3187_s25 = scalar_lea.sflag [#allocation15], %s4610_s30  ;;  %s4288_s0 = sshra.s32 %s7266_s1, 4  ;;  %s4289_s0 = int_to_ptr.hbm [resolvable:$true] %s4288_s0 }
 0x33f   : > { %s4290_s4 = scalar_lea.hbm %s4289_s0, 128  ;;  %s4294_s9 = scalar_lea.hbm %s7587_s24, 512 }
 0x340   : > { %p4291_p8 = scmp.ne.s32.totalorder %s4289_s0, %s4290_s4  ;;  %p4295_p12 = scmp.lt.s32.totalorder %s4289_s0, %s7587_s24 }
 0x341   : > { %p4296_p13 = scmp.lt.s32.totalorder %s4294_s9, %s4290_s4 }
 0x342   : > { %p4292_p10 = pnand %p4291_p8, %p4581_p3 }
 0x343   : > { %p4297_p0 = por %p4296_p13, %p4295_p12 }
 0x344   : > { %p4293_p11 = pneg %p4292_p10 }
 0x346   : > { %p4298_p5 = pnand %p4297_p0, %p4293_p11 }
 0x348   : > { %4301 = shalt.err (!%p4298_p5)
}
 0x349   : > { %3594 = dma.vmem_to_hbm [thread:$0]  (%p4581_p3), %s7264_s19, 2048, %s7266_s1, %s3187_s25, %s4427_s27, %s4427_s27, %s4428_s20   ;;  %v3001_v44 = vmul.f32 %v2878_v0, %v7095_v58 }
 0x34a   : > { %s7594_s8 = sshll.u32 %s5484_s7, 4  ;;  %s7595_s6 = sshll.u32 %s7224_s21, 4  ;;  %s3203_s8 = int_to_ptr.vmem [resolvable:$true] %s7594_s8  ;;  %s3205_s6 = int_to_ptr.hbm [resolvable:$true] %s7595_s6 }
 0x34b   : > { %3038 = vst [vmem:[%s5484_s7 + $0xf8] sm:$0xff] %v3001_v44  ;;  %s3172_s13 = scalar_lea.sflag [#allocation4], %s4610_s30  ;;  %s4316_s17 = sshra.s32 %s3205_s6, 4  ;;  %s4317_s17 = int_to_ptr.hbm [resolvable:$true] %s4316_s17 }
 0x34c   : > { %s4318_s0 = scalar_lea.hbm %s4317_s17, 256  ;;  %s4322_s2 = scalar_lea.hbm %s7585_s28, 1024 }
 0x34d   : > { %p4319_p7 = scmp.ne.s32.totalorder %s4317_s17, %s4318_s0  ;;  %p4323_p1 = scmp.lt.s32.totalorder %s4317_s17, %s7585_s28 }
 0x34e   : > { %p4324_p4 = scmp.lt.s32.totalorder %s4322_s2, %s4318_s0 }
 0x34f   : > { %p4320_p9 = pnand %p4319_p7, %p4581_p3 }
 0x350   : > { %p4325_p8 = por %p4324_p4, %p4323_p1 }
 0x351   : > { %p4321_p2 = pneg %p4320_p9 }
 0x353   : > { %p4326_p10 = pnand %p4325_p8, %p4321_p2 }
 0x355   : > { %4329 = shalt.err (!%p4326_p10)
}
 0x356   : > { %s7596_s30 = smov 256  }
 0x357   : > { %3591 = dma.vmem_to_hbm [thread:$0]  (%p4581_p3), %s3203_s8, 4096, %s3205_s6, %s3172_s13, %s7596_s30, %s7596_s30, %s4426_s29  }
 0x358 PF: > { %s7597_s7 = sld [smem:[#allocation22_spill]]  ;;  %p3633_p11 = scmp.ge.s32.totalorder %s4416_s16, 2 }
 0x35a   : > { %p3614_p12 = pnand %p3633_p11, %p4536_p6 }
 0x35c   : > { %p3615_p13 = pneg %p3614_p12 }
 0x35e   : > { %s3277_s27 = sand.u32 1, %s7597_s7  }
 0x35f   : > { %s3278_s20 = scalar_lea.sflag [#allocation4], %s3277_s27 }
 0x360   : > { %4375 = dma.done.wait (%p3615_p13), %s3278_s20, 4096  }
 0x361   : > { %4377 = vsyncadd (%p3615_p13), %s3278_s20, 4294963200  ;;  %s7599_s25 = sadd.s32 4294967294, %s4416_s16  }
 0x362   : > { %s3287_s9 = sand.u32 1, %s7599_s25  }
 0x363   : > { %s3288_s3 = scalar_lea.sflag [#allocation12], %s3287_s9 }
 0x364   : > { %4379 = dma.done.wait (%p3615_p13), %s3288_s3, 6144  }
 0x365   : > { %4381 = vsyncadd (%p3615_p13), %s3288_s3, 4294961152  ;;  %s3308_s14 = scalar_lea.sflag [#allocation15], %s3277_s27 }
 0x366   : > { %4383 = dma.done.wait (%p3615_p13), %s3308_s14, 2048  }
 0x367   : > { %4385 = vsyncadd (%p3615_p13), %s3308_s14, 4294965248  ;;  %s34_s16 = sadd.s32 1, %s4416_s16   ;;  %s7600_s12 = sld [smem:[#allocation23_spill]] }
 0x368   : > { %p31_p3 = scmp.ge.s32.totalorder %s34_s16, 6   ;;  %s7601_s14 = sld [smem:[#allocation25_spill]] }
 0x369   : > { %s7602_s30 = smov %s4392_s10  ;;  %s7603_s10 = smov %s4396_s11 }
 0x36a   : > { %s7604_s11 = smov %s4598_s23  ;;  %s7605_s13 = smov %s4412_s15 }
 0x36b   : > { %s7606_s15 = smov %s7612_s26  ;;  %33 = sbr.rel (!%p31_p3) target bundleno = 23 (0x17), region = 150 }
 0x370   :  { %3314 = vsyncpa [#allocation3], 1 }
 0x371   :  { %3316 = vsyncpa [#allocation3 + $0x1], 1 }
 0x372   :  { %3317 = vsyncpa [#allocation6], 1 }
 0x373   :  { %3318 = vsyncpa [#allocation9], 1 }
 0x374   :  { %3319 = vsyncpa [#allocation4], 1 }
 0x375   :  { %3321 = vsyncpa [#allocation4 + $0x1], 1 }
 0x376   :  { %3322 = vsyncpa [#allocation12], 1 }
 0x377   :  { %3324 = vsyncpa [#allocation12 + $0x1], 1 }
 0x378   :  { %3325 = vsyncpa [#allocation15], 1 }
 0x379   :  { %3327 = vsyncpa [#allocation15 + $0x1], 1 }

</bundles_post_ra>
